<compile_context>
chip_gen: v5e
topology: v5e:2x2
jax: 0.10.0
libtpu: 0.0.40
codegen_flags: <defaults>
</compile_context>

<pallas_src>
import jax
import jax.numpy as jnp
from jax import lax
from jax.experimental import pallas as pl
from jax.experimental.pallas import tpu as pltpu


# ----------------------------------------------------------------------------
# Fused kernel: per-point MLP -> running max over points -> classification head
# ----------------------------------------------------------------------------
def _make_kernel(n_total, tile_n, bt):
    needs_mask = (n_total % tile_n) != 0
    if needs_mask:
        assert bt == 1, "partial point tiles only supported with bt == 1"

    def kernel(x_ref,
               w1_ref, s1_ref, b1_ref,
               w2_ref, s2_ref, b2_ref,
               w3_ref, s3_ref, b3_ref,
               w4_ref, s4_ref, b4_ref,
               w5_ref, s5_ref, b5_ref,
               w6_ref, b6_ref,
               out_ref, acc_ref):
        n_id = pl.program_id(1)

        # ---- init running-max accumulator on the first points tile ----------
        @pl.when(n_id == 0)
        def _init():
            acc_ref[...] = jnp.full(acc_ref.shape, -jnp.inf, acc_ref.dtype)

        # ---- per-point feature MLP on this tile ------------------------------
        if bt == 1:
            x = x_ref[0]                                    # (TILE_N, 3)
        else:
            x = x_ref[...].reshape(bt * tile_n, 3)          # (BT*TILE_N, 3)

        h1 = jnp.dot(x, w1_ref[...], preferred_element_type=jnp.float32)
        h1 = jnp.maximum(h1 * s1_ref[...] + b1_ref[...], 0.0)        # (R, 64)

        h2 = jnp.dot(h1, w2_ref[...], preferred_element_type=jnp.float32)
        h2 = jnp.maximum(h2 * s2_ref[...] + b2_ref[...], 0.0)        # (R, 128)

        # dominant matmul: bf16 on the MXU, f32 accumulate
        h3 = jnp.dot(h2.astype(jnp.bfloat16), w3_ref[...],
                     preferred_element_type=jnp.float32)
        h3 = jnp.maximum(h3 * s3_ref[...] + b3_ref[...], 0.0)        # (R, 1024)

        if needs_mask:
            # last tile may run past N: exclude garbage rows from the max.
            row = (n_id * tile_n
                   + lax.broadcasted_iota(jnp.int32, (tile_n, 1), 0))
            h3 = jnp.where(row < n_total, h3, -jnp.inf)

        if bt == 1:
            tile_max = jnp.max(h3, axis=0, keepdims=True)             # (1, 1024)
        else:
            tile_max = jnp.max(h3.reshape(bt, tile_n, 1024), axis=1)  # (BT, 1024)

        acc_ref[...] = jnp.maximum(acc_ref[...], tile_max)

        # ---- classification head on the last points tile ---------------------
        @pl.when(n_id == pl.num_programs(1) - 1)
        def _head():
            g = acc_ref[...]                                          # (BT, 1024)

            h4 = jnp.dot(g.astype(jnp.bfloat16), w4_ref[...],
                         preferred_element_type=jnp.float32)
            h4 = jnp.maximum(h4 * s4_ref[...] + b4_ref[...], 0.0)     # (BT, 512)
            # dropout: identity (inference mode)

            h5 = jnp.dot(h4, w5_ref[...], preferred_element_type=jnp.float32)
            h5 = jnp.maximum(h5 * s5_ref[...] + b5_ref[...], 0.0)     # (BT, 256)

            out_ref[...] = (jnp.dot(h5, w6_ref[...],
                                    preferred_element_type=jnp.float32)
                            + b6_ref[...])                            # (BT, C)

    return kernel


@jax.jit
def improved_pointnet_forward(x_ncw, fused):
    """x_ncw: (B, 3, N) float32, PyTorch NCW layout. Returns (B, num_classes)."""
    B, c_in, N = x_ncw.shape
    assert c_in == 3
    x = jnp.transpose(x_ncw, (0, 2, 1))  # (B, N, 3) points-major layout

    (w1, s1, b1, w2, s2, b2, w3, s3, b3,
     w4, s4, b4, w5, s5, b5, w6, bias6) = fused
    num_classes = w6.shape[1]

    # ---- static tiling decisions (trace-time Python) -------------------------
    MAX_TILE_N = 1024          # h3 tile <= 4 MiB f32: safe for v7x's 64 MiB VMEM
    tile_n = N if N <= MAX_TILE_N else MAX_TILE_N
    n_tiles = pl.cdiv(N, tile_n)

    # For small point clouds, process multiple samples per step (the 1x1 convs
    # are per-point, so flattening rows is exact) to amortize per-step overhead.
    MAX_ROWS_PER_STEP = 2048
    if tile_n == N and N % 8 == 0 and B * N <= MAX_ROWS_PER_STEP:
        bt = B
    else:
        bt = 1
    assert B % bt == 0
    b_tiles = B // bt

    kernel = _make_kernel(N, tile_n, bt)

    def _const(shape):
        return pl.BlockSpec(shape, lambda b, n, _s=shape: (0,) * len(_s))

    in_specs = [
        pl.BlockSpec((bt, tile_n, 3), lambda b, n: (b, n, 0)),
        _const(w1.shape), _const(s1.shape), _const(b1.shape),
        _const(w2.shape), _const(s2.shape), _const(b2.shape),
        _const(w3.shape), _const(s3.shape), _const(b3.shape),
        _const(w4.shape), _const(s4.shape), _const(b4.shape),
        _const(w5.shape), _const(s5.shape), _const(b5.shape),
        _const(w6.shape), _const(bias6.shape),
    ]

    logits = pl.pallas_call(
        kernel,
        out_shape=jax.ShapeDtypeStruct((B, num_classes), jnp.float32),
        grid_spec=pltpu.PrefetchScalarGridSpec(
            num_scalar_prefetch=0,
            grid=(b_tiles, n_tiles),
            in_specs=in_specs,
            out_specs=pl.BlockSpec((bt, num_classes), lambda b, n: (b, 0)),
            scratch_shapes=[pltpu.VMEM((bt, 1024), jnp.float32)],
        ),
        compiler_params=pltpu.CompilerParams(
            dimension_semantics=("parallel", "arbitrary"),
            vmem_limit_bytes=32 * 1024 * 1024),
    )(x, w1, s1, b1, w2, s2, b2, w3, s3, b3,
      w4, s4, b4, w5, s5, b5, w6, bias6)

    return logits


# ----------------------------------------------------------------------------
# Parameter construction (deterministic, synthetic) + BN fusion glue.
# ----------------------------------------------------------------------------
def _make_raw_params(key, num_classes):
    dims_conv = [(3, 64), (64, 128), (128, 1024)]
    dims_fc = [(1024, 512), (512, 256), (256, num_classes)]
    params = {}
    keys = jax.random.split(key, 32)
    ki = 0

    def nxt():
        nonlocal ki
        k = keys[ki]
        ki += 1
        return k

    for i, (cin, cout) in enumerate(dims_conv + dims_fc, start=1):
        params[f"W{i}"] = (jax.random.normal(nxt(), (cin, cout), jnp.float32)
                           * 0.05)
        params[f"c{i}"] = (jax.random.normal(nxt(), (cout,), jnp.float32)
                           * 0.01)  # conv/fc bias
        if i <= 5:  # layers followed by BatchNorm1d
            params[f"gamma{i}"] = 1.0 + 0.1 * jax.random.normal(
                nxt(), (cout,), jnp.float32)
            params[f"beta{i}"] = 0.1 * jax.random.normal(
                nxt(), (cout,), jnp.float32)
            params[f"mean{i}"] = 0.05 * jax.random.normal(
                nxt(), (cout,), jnp.float32)
            params[f"var{i}"] = 1.0 + 0.1 * jax.random.uniform(
                nxt(), (cout,), jnp.float32)
    return params


def _fuse_params(p, eps=1e-5):
    """Fold conv/fc bias + BatchNorm (inference) into per-channel scale/bias.

    W3 / W4 (the FLOP-dominant matmuls) are stored bf16 so the MXU runs them
    at the bf16 rate and their HBM/VMEM footprint is halved.
    """
    fused = []
    for i in range(1, 6):
        scale = p[f"gamma{i}"] / jnp.sqrt(p[f"var{i}"] + eps)
        bias = p[f"beta{i}"] + (p[f"c{i}"] - p[f"mean{i}"]) * scale
        w = p[f"W{i}"]
        if i in (3, 4):
            w = w.astype(jnp.bfloat16)
        fused += [w, scale[None, :], bias[None, :]]
    fused += [p["W6"], p["c6"][None, :]]
    return tuple(fused)


# ----------------------------------------------------------------------------
# References.
# ----------------------------------------------------------------------------
def _dot_f32(a, b):
    return jnp.dot(a, b, preferred_element_type=jnp.float32)


def _reference_forward_fused(x_ncw, fused):
    """Pure-JAX reference using the *same* fused params and bf16 casts as the
    kernel (so only matmul accumulation order differs)."""
    (w1, s1, b1, w2, s2, b2, w3, s3, b3,
     w4, s4, b4, w5, s5, b5, w6, bias6) = fused
    x = jnp.transpose(x_ncw, (0, 2, 1))                       # (B, N, 3)
    h = jnp.maximum(_dot_f32(x, w1) * s1 + b1, 0.0)
    h = jnp.maximum(_dot_f32(h, w2) * s2 + b2, 0.0)
    h = jnp.maximum(_dot_f32(h.astype(jnp.bfloat16), w3) * s3 + b3, 0.0)
    g = jnp.max(h, axis=1)                                    # (B, 1024)
    h = jnp.maximum(_dot_f32(g.astype(jnp.bfloat16), w4) * s4 + b4, 0.0)
    h = jnp.maximum(_dot_f32(h, w5) * s5 + b5, 0.0)
    return _dot_f32(h, w6) + bias6


def _reference_forward_f32(x_ncw, p, eps=1e-5):
    """Pure-JAX f32 reference mirroring the PyTorch forward (eval mode)."""
    x = jnp.transpose(x_ncw, (0, 2, 1))  # (B, N, 3)

    def bn_relu(h, i):
        h = (h - p[f"mean{i}"]) / jnp.sqrt(p[f"var{i}"] + eps)
        h = h * p[f"gamma{i}"] + p[f"beta{i}"]
        return jnp.maximum(h, 0.0)

    h = bn_relu(x @ p["W1"] + p["c1"], 1)
    h = bn_relu(h @ p["W2"] + p["c2"], 2)
    h = bn_relu(h @ p["W3"] + p["c3"], 3)
    g = jnp.max(h, axis=1)                      # torch.max(x, 2)[0]
    h = bn_relu(g @ p["W4"] + p["c4"], 4)
    h = bn_relu(h @ p["W5"] + p["c5"], 5)       # dropout = identity (eval)
    return h @ p["W6"] + p["c6"]


if __name__ == "__main__":
    key = jax.random.PRNGKey(0)
    k_x, k_p = jax.random.split(key)

    B, N, num_classes = 2, 128, 10
    x = jax.random.normal(k_x, (B, 3, N), jnp.float32)  # PyTorch NCW layout

    raw = _make_raw_params(k_p, num_classes)
    fused = _fuse_params(raw)

    out = jax.block_until_ready(improved_pointnet_forward(x, fused))
    assert out.shape == (B, num_classes)

    # Strict check: reference uses the exact same fused params / bf16 casts.
    ref_exact = _reference_forward_fused(x, fused)
    err_exact = jnp.max(jnp.abs(out - ref_exact))
    assert jnp.allclose(out, ref_exact, atol=1e-3, rtol=1e-3), (
        f"mismatch vs fused reference: max abs err {err_exact}")

    # Loose check against the pure-f32 PyTorch-style reference (bf16 matmuls
    # in the kernel introduce ~1e-3 absolute error here).
    ref_f32 = _reference_forward_f32(x, raw)
    err_f32 = jnp.max(jnp.abs(out - ref_f32))
    assert jnp.allclose(out, ref_f32, atol=5e-2, rtol=5e-2), (
        f"mismatch vs f32 reference: max abs err {err_f32}")

    print("KERNEL_OK")
</pallas_src>

<mosaic_0001>
module attributes {stable_mosaic.version = 11 : i64} {
  func.func @kernel(%arg0: i32, %arg1: i32, %arg2: memref<2x128x3xf32, #tpu.memory_space<vmem>>, %arg3: memref<3x64xf32, #tpu.memory_space<vmem>>, %arg4: memref<1x64xf32, #tpu.memory_space<vmem>>, %arg5: memref<1x64xf32, #tpu.memory_space<vmem>>, %arg6: memref<64x128xf32, #tpu.memory_space<vmem>>, %arg7: memref<1x128xf32, #tpu.memory_space<vmem>>, %arg8: memref<1x128xf32, #tpu.memory_space<vmem>>, %arg9: memref<128x1024xbf16, #tpu.memory_space<vmem>>, %arg10: memref<1x1024xf32, #tpu.memory_space<vmem>>, %arg11: memref<1x1024xf32, #tpu.memory_space<vmem>>, %arg12: memref<1024x512xbf16, #tpu.memory_space<vmem>>, %arg13: memref<1x512xf32, #tpu.memory_space<vmem>>, %arg14: memref<1x512xf32, #tpu.memory_space<vmem>>, %arg15: memref<512x256xf32, #tpu.memory_space<vmem>>, %arg16: memref<1x256xf32, #tpu.memory_space<vmem>>, %arg17: memref<1x256xf32, #tpu.memory_space<vmem>>, %arg18: memref<256x10xf32, #tpu.memory_space<vmem>>, %arg19: memref<1x10xf32, #tpu.memory_space<vmem>>, %arg20: memref<2x10xf32, #tpu.memory_space<vmem>>, %arg21: memref<2x1024xf32, #tpu.memory_space<vmem>>) attributes {dimension_semantics = [#tpu.dimension_semantics<parallel>, #tpu.dimension_semantics<arbitrary>], iteration_bounds = array<i64: 1, 1>, scalar_prefetch = 0 : i64, scratch_operands = 1 : i64, tpu.core_type = #tpu.core_type<tc>, window_params = [{transform_indices = @transform_0, window_bounds = array<i64: 2, 128, 3>}, {pipeline_mode = #tpu.pipeline_mode<synchronous>, transform_indices = @transform_1, window_bounds = array<i64: 3, 64>}, {pipeline_mode = #tpu.pipeline_mode<synchronous>, transform_indices = @transform_2, window_bounds = array<i64: 1, 64>}, {pipeline_mode = #tpu.pipeline_mode<synchronous>, transform_indices = @transform_3, window_bounds = array<i64: 1, 64>}, {pipeline_mode = #tpu.pipeline_mode<synchronous>, transform_indices = @transform_4, window_bounds = array<i64: 64, 128>}, {pipeline_mode = #tpu.pipeline_mode<synchronous>, transform_indices = @transform_5, window_bounds = array<i64: 1, 128>}, {pipeline_mode = #tpu.pipeline_mode<synchronous>, transform_indices = @transform_6, window_bounds = array<i64: 1, 128>}, {pipeline_mode = #tpu.pipeline_mode<synchronous>, transform_indices = @transform_7, window_bounds = array<i64: 128, 1024>}, {pipeline_mode = #tpu.pipeline_mode<synchronous>, transform_indices = @transform_8, window_bounds = array<i64: 1, 1024>}, {pipeline_mode = #tpu.pipeline_mode<synchronous>, transform_indices = @transform_9, window_bounds = array<i64: 1, 1024>}, {pipeline_mode = #tpu.pipeline_mode<synchronous>, transform_indices = @transform_10, window_bounds = array<i64: 1024, 512>}, {pipeline_mode = #tpu.pipeline_mode<synchronous>, transform_indices = @transform_11, window_bounds = array<i64: 1, 512>}, {pipeline_mode = #tpu.pipeline_mode<synchronous>, transform_indices = @transform_12, window_bounds = array<i64: 1, 512>}, {pipeline_mode = #tpu.pipeline_mode<synchronous>, transform_indices = @transform_13, window_bounds = array<i64: 512, 256>}, {pipeline_mode = #tpu.pipeline_mode<synchronous>, transform_indices = @transform_14, window_bounds = array<i64: 1, 256>}, {pipeline_mode = #tpu.pipeline_mode<synchronous>, transform_indices = @transform_15, window_bounds = array<i64: 1, 256>}, {pipeline_mode = #tpu.pipeline_mode<synchronous>, transform_indices = @transform_16, window_bounds = array<i64: 256, 10>}, {pipeline_mode = #tpu.pipeline_mode<synchronous>, transform_indices = @transform_17, window_bounds = array<i64: 1, 10>}, {transform_indices = @transform_18, window_bounds = array<i64: 2, 10>}]} {
    %c0_i32 = arith.constant 0 : i32
    %0 = arith.cmpi eq, %arg1, %c0_i32 : i32
    %1 = arith.extui %0 : i1 to i32
    %c0_i32_0 = arith.constant 0 : i32
    %2 = arith.cmpi ne, %1, %c0_i32_0 : i32
    scf.if %2 {
      %cst_33 = arith.constant 0xFF800000 : f32
      %44 = vector.broadcast %cst_33 : f32 to vector<2x1024xf32>
      %c0_34 = arith.constant 0 : index
      %c0_35 = arith.constant 0 : index
      %45 = vector.load %arg21[%c0_34, %c0_35] : memref<2x1024xf32, #tpu.memory_space<vmem>>, vector<2x1024xf32>
      tpu.vector_store %arg21[%c0_34, %c0_35], %44 {strides = array<i32>} : memref<2x1024xf32, #tpu.memory_space<vmem>>, vector<2x1024xf32>,
    } else {
    }
    %c0 = arith.constant 0 : index
    %c0_1 = arith.constant 0 : index
    %c0_2 = arith.constant 0 : index
    %3 = vector.load %arg2[%c0, %c0_1, %c0_2] : memref<2x128x3xf32, #tpu.memory_space<vmem>>, vector<2x128x3xf32>
    %4 = vector.shape_cast %3 : vector<2x128x3xf32> to vector<256x3xf32>
    %c0_3 = arith.constant 0 : index
    %c0_4 = arith.constant 0 : index
    %5 = vector.load %arg3[%c0_3, %c0_4] : memref<3x64xf32, #tpu.memory_space<vmem>>, vector<3x64xf32>
    %cst = arith.constant dense<0.000000e+00> : vector<256x64xf32>
    %6 = tpu.matmul %4, %5, %cst {dimension_numbers = #tpu.dot_dimension_numbers<[1], [0], [0], [1], [0, 0, 1, 1], [], []>} : vector<256x3xf32>, vector<3x64xf32>, vector<256x64xf32> -> vector<256x64xf32>
    %c0_5 = arith.constant 0 : index
    %c0_6 = arith.constant 0 : index
    %7 = vector.load %arg4[%c0_5, %c0_6] : memref<1x64xf32, #tpu.memory_space<vmem>>, vector<1x64xf32>
    %8 = vector.broadcast %7 : vector<1x64xf32> to vector<256x64xf32>
    %9 = arith.mulf %6, %8 : vector<256x64xf32>
    %c0_7 = arith.constant 0 : index
    %c0_8 = arith.constant 0 : index
    %10 = vector.load %arg5[%c0_7, %c0_8] : memref<1x64xf32, #tpu.memory_space<vmem>>, vector<1x64xf32>
    %11 = vector.broadcast %10 : vector<1x64xf32> to vector<256x64xf32>
    %12 = arith.addf %9, %11 : vector<256x64xf32>
    %cst_9 = arith.constant 0.000000e+00 : f32
    %13 = vector.broadcast %cst_9 : f32 to vector<256x64xf32>
    %14 = arith.maximumf %12, %13 : vector<256x64xf32>
    %c0_10 = arith.constant 0 : index
    %c0_11 = arith.constant 0 : index
    %15 = vector.load %arg6[%c0_10, %c0_11] : memref<64x128xf32, #tpu.memory_space<vmem>>, vector<64x128xf32>
    %cst_12 = arith.constant dense<0.000000e+00> : vector<256x128xf32>
    %16 = tpu.matmul %14, %15, %cst_12 {dimension_numbers = #tpu.dot_dimension_numbers<[1], [0], [0], [1], [0, 0, 1, 1], [], []>} : vector<256x64xf32>, vector<64x128xf32>, vector<256x128xf32> -> vector<256x128xf32>
    %c0_13 = arith.constant 0 : index
    %c0_14 = arith.constant 0 : index
    %17 = vector.load %arg7[%c0_13, %c0_14] : memref<1x128xf32, #tpu.memory_space<vmem>>, vector<1x128xf32>
    %18 = vector.broadcast %17 : vector<1x128xf32> to vector<256x128xf32>
    %19 = arith.mulf %16, %18 : vector<256x128xf32>
    %c0_15 = arith.constant 0 : index
    %c0_16 = arith.constant 0 : index
    %20 = vector.load %arg8[%c0_15, %c0_16] : memref<1x128xf32, #tpu.memory_space<vmem>>, vector<1x128xf32>
    %21 = vector.broadcast %20 : vector<1x128xf32> to vector<256x128xf32>
    %22 = arith.addf %19, %21 : vector<256x128xf32>
    %cst_17 = arith.constant 0.000000e+00 : f32
    %23 = vector.broadcast %cst_17 : f32 to vector<256x128xf32>
    %24 = arith.maximumf %22, %23 : vector<256x128xf32>
    %25 = arith.truncf %24 : vector<256x128xf32> to vector<256x128xbf16>
    %c0_18 = arith.constant 0 : index
    %c0_19 = arith.constant 0 : index
    %26 = vector.load %arg9[%c0_18, %c0_19] : memref<128x1024xbf16, #tpu.memory_space<vmem>>, vector<128x1024xbf16>
    %cst_20 = arith.constant dense<0.000000e+00> : vector<256x1024xf32>
    %27 = tpu.matmul %25, %26, %cst_20 {dimension_numbers = #tpu.dot_dimension_numbers<[1], [0], [0], [1], [0, 0, 1, 1], [], []>} : vector<256x128xbf16>, vector<128x1024xbf16>, vector<256x1024xf32> -> vector<256x1024xf32>
    %c0_21 = arith.constant 0 : index
    %c0_22 = arith.constant 0 : index
    %28 = vector.load %arg10[%c0_21, %c0_22] : memref<1x1024xf32, #tpu.memory_space<vmem>>, vector<1x1024xf32>
    %29 = vector.broadcast %28 : vector<1x1024xf32> to vector<256x1024xf32>
    %30 = arith.mulf %27, %29 : vector<256x1024xf32>
    %c0_23 = arith.constant 0 : index
    %c0_24 = arith.constant 0 : index
    %31 = vector.load %arg11[%c0_23, %c0_24] : memref<1x1024xf32, #tpu.memory_space<vmem>>, vector<1x1024xf32>
    %32 = vector.broadcast %31 : vector<1x1024xf32> to vector<256x1024xf32>
    %33 = arith.addf %30, %32 : vector<256x1024xf32>
    %cst_25 = arith.constant 0.000000e+00 : f32
    %34 = vector.broadcast %cst_25 : f32 to vector<256x1024xf32>
    %35 = arith.maximumf %33, %34 : vector<256x1024xf32>
    %36 = vector.shape_cast %35 : vector<256x1024xf32> to vector<2x128x1024xf32>
    %cst_26 = arith.constant dense<0xFF800000> : vector<2x1024xf32>
    %37 = vector.multi_reduction <maximumf>, %36, %cst_26 [1] : vector<2x128x1024xf32> to vector<2x1024xf32>
    %c0_27 = arith.constant 0 : index
    %c0_28 = arith.constant 0 : index
    %38 = vector.load %arg21[%c0_27, %c0_28] : memref<2x1024xf32, #tpu.memory_space<vmem>>, vector<2x1024xf32>
    %39 = arith.maximumf %38, %37 : vector<2x1024xf32>
    %c0_29 = arith.constant 0 : index
    %c0_30 = arith.constant 0 : index
    %40 = vector.load %arg21[%c0_29, %c0_30] : memref<2x1024xf32, #tpu.memory_space<vmem>>, vector<2x1024xf32>
    tpu.vector_store %arg21[%c0_29, %c0_30], %39 {strides = array<i32>} : memref<2x1024xf32, #tpu.memory_space<vmem>>, vector<2x1024xf32>,
    %c0_i32_31 = arith.constant 0 : i32
    %41 = arith.cmpi eq, %arg1, %c0_i32_31 : i32
    %42 = arith.extui %41 : i1 to i32
    %c0_i32_32 = arith.constant 0 : i32
    %43 = arith.cmpi ne, %42, %c0_i32_32 : i32
    scf.if %43 {
      %c0_33 = arith.constant 0 : index
      %c0_34 = arith.constant 0 : index
      %44 = vector.load %arg21[%c0_33, %c0_34] : memref<2x1024xf32, #tpu.memory_space<vmem>>, vector<2x1024xf32>
      %45 = arith.truncf %44 : vector<2x1024xf32> to vector<2x1024xbf16>
      %c0_35 = arith.constant 0 : index
      %c0_36 = arith.constant 0 : index
      %46 = vector.load %arg12[%c0_35, %c0_36] : memref<1024x512xbf16, #tpu.memory_space<vmem>>, vector<1024x512xbf16>
      %cst_37 = arith.constant dense<0.000000e+00> : vector<2x512xf32>
      %47 = tpu.matmul %45, %46, %cst_37 {dimension_numbers = #tpu.dot_dimension_numbers<[1], [0], [0], [1], [0, 0, 1, 1], [], []>} : vector<2x1024xbf16>, vector<1024x512xbf16>, vector<2x512xf32> -> vector<2x512xf32>
      %c0_38 = arith.constant 0 : index
      %c0_39 = arith.constant 0 : index
      %48 = vector.load %arg13[%c0_38, %c0_39] : memref<1x512xf32, #tpu.memory_space<vmem>>, vector<1x512xf32>
      %49 = vector.broadcast %48 : vector<1x512xf32> to vector<2x512xf32>
      %50 = arith.mulf %47, %49 : vector<2x512xf32>
      %c0_40 = arith.constant 0 : index
      %c0_41 = arith.constant 0 : index
      %51 = vector.load %arg14[%c0_40, %c0_41] : memref<1x512xf32, #tpu.memory_space<vmem>>, vector<1x512xf32>
      %52 = vector.broadcast %51 : vector<1x512xf32> to vector<2x512xf32>
      %53 = arith.addf %50, %52 : vector<2x512xf32>
      %cst_42 = arith.constant 0.000000e+00 : f32
      %54 = vector.broadcast %cst_42 : f32 to vector<2x512xf32>
      %55 = arith.maximumf %53, %54 : vector<2x512xf32>
      %c0_43 = arith.constant 0 : index
      %c0_44 = arith.constant 0 : index
      %56 = vector.load %arg15[%c0_43, %c0_44] : memref<512x256xf32, #tpu.memory_space<vmem>>, vector<512x256xf32>
      %cst_45 = arith.constant dense<0.000000e+00> : vector<2x256xf32>
      %57 = tpu.matmul %55, %56, %cst_45 {dimension_numbers = #tpu.dot_dimension_numbers<[1], [0], [0], [1], [0, 0, 1, 1], [], []>} : vector<2x512xf32>, vector<512x256xf32>, vector<2x256xf32> -> vector<2x256xf32>
      %c0_46 = arith.constant 0 : index
      %c0_47 = arith.constant 0 : index
      %58 = vector.load %arg16[%c0_46, %c0_47] : memref<1x256xf32, #tpu.memory_space<vmem>>, vector<1x256xf32>
      %59 = vector.broadcast %58 : vector<1x256xf32> to vector<2x256xf32>
      %60 = arith.mulf %57, %59 : vector<2x256xf32>
      %c0_48 = arith.constant 0 : index
      %c0_49 = arith.constant 0 : index
      %61 = vector.load %arg17[%c0_48, %c0_49] : memref<1x256xf32, #tpu.memory_space<vmem>>, vector<1x256xf32>
      %62 = vector.broadcast %61 : vector<1x256xf32> to vector<2x256xf32>
      %63 = arith.addf %60, %62 : vector<2x256xf32>
      %cst_50 = arith.constant 0.000000e+00 : f32
      %64 = vector.broadcast %cst_50 : f32 to vector<2x256xf32>
      %65 = arith.maximumf %63, %64 : vector<2x256xf32>
      %c0_51 = arith.constant 0 : index
      %c0_52 = arith.constant 0 : index
      %66 = vector.load %arg18[%c0_51, %c0_52] : memref<256x10xf32, #tpu.memory_space<vmem>>, vector<256x10xf32>
      %cst_53 = arith.constant dense<0.000000e+00> : vector<2x10xf32>
      %67 = tpu.matmul %65, %66, %cst_53 {dimension_numbers = #tpu.dot_dimension_numbers<[1], [0], [0], [1], [0, 0, 1, 1], [], []>} : vector<2x256xf32>, vector<256x10xf32>, vector<2x10xf32> -> vector<2x10xf32>
      %c0_54 = arith.constant 0 : index
      %c0_55 = arith.constant 0 : index
      %68 = vector.load %arg19[%c0_54, %c0_55] : memref<1x10xf32, #tpu.memory_space<vmem>>, vector<1x10xf32>
      %69 = vector.broadcast %68 : vector<1x10xf32> to vector<2x10xf32>
      %70 = arith.addf %67, %69 : vector<2x10xf32>
      %c0_56 = arith.constant 0 : index
      %c0_57 = arith.constant 0 : index
      %71 = vector.load %arg20[%c0_56, %c0_57] : memref<2x10xf32, #tpu.memory_space<vmem>>, vector<2x10xf32>
      tpu.vector_store %arg20[%c0_56, %c0_57], %70 {strides = array<i32>} : memref<2x10xf32, #tpu.memory_space<vmem>>, vector<2x10xf32>,
    } else {
    }
    return
  }
  func.func @transform_0(%arg0: i32, %arg1: i32) -> (i32, i32, i32) {
    %c0_i32 = arith.constant 0 : i32
    %c0_i32_0 = arith.constant 0 : i32
    return %arg0, %arg1, %c0_i32 : i32, i32, i32
  }
  func.func @transform_1(%arg0: i32, %arg1: i32) -> (i32, i32) {
    %c0_i32 = arith.constant 0 : i32
    %c0_i32_0 = arith.constant 0 : i32
    %c0_i32_1 = arith.constant 0 : i32
    return %c0_i32, %c0_i32_0 : i32, i32
  }
  func.func @transform_2(%arg0: i32, %arg1: i32) -> (i32, i32) {
    %c0_i32 = arith.constant 0 : i32
    %c0_i32_0 = arith.constant 0 : i32
    %c0_i32_1 = arith.constant 0 : i32
    return %c0_i32, %c0_i32_0 : i32, i32
  }
  func.func @transform_3(%arg0: i32, %arg1: i32) -> (i32, i32) {
    %c0_i32 = arith.constant 0 : i32
    %c0_i32_0 = arith.constant 0 : i32
    %c0_i32_1 = arith.constant 0 : i32
    return %c0_i32, %c0_i32_0 : i32, i32
  }
  func.func @transform_4(%arg0: i32, %arg1: i32) -> (i32, i32) {
    %c0_i32 = arith.constant 0 : i32
    %c0_i32_0 = arith.constant 0 : i32
    %c0_i32_1 = arith.constant 0 : i32
    return %c0_i32, %c0_i32_0 : i32, i32
  }
  func.func @transform_5(%arg0: i32, %arg1: i32) -> (i32, i32) {
    %c0_i32 = arith.constant 0 : i32
    %c0_i32_0 = arith.constant 0 : i32
    %c0_i32_1 = arith.constant 0 : i32
    return %c0_i32, %c0_i32_0 : i32, i32
  }
  func.func @transform_6(%arg0: i32, %arg1: i32) -> (i32, i32) {
    %c0_i32 = arith.constant 0 : i32
    %c0_i32_0 = arith.constant 0 : i32
    %c0_i32_1 = arith.constant 0 : i32
    return %c0_i32, %c0_i32_0 : i32, i32
  }
  func.func @transform_7(%arg0: i32, %arg1: i32) -> (i32, i32) {
    %c0_i32 = arith.constant 0 : i32
    %c0_i32_0 = arith.constant 0 : i32
    %c0_i32_1 = arith.constant 0 : i32
    return %c0_i32, %c0_i32_0 : i32, i32
  }
  func.func @transform_8(%arg0: i32, %arg1: i32) -> (i32, i32) {
    %c0_i32 = arith.constant 0 : i32
    %c0_i32_0 = arith.constant 0 : i32
    %c0_i32_1 = arith.constant 0 : i32
    return %c0_i32, %c0_i32_0 : i32, i32
  }
  func.func @transform_9(%arg0: i32, %arg1: i32) -> (i32, i32) {
    %c0_i32 = arith.constant 0 : i32
    %c0_i32_0 = arith.constant 0 : i32
    %c0_i32_1 = arith.constant 0 : i32
    return %c0_i32, %c0_i32_0 : i32, i32
  }
  func.func @transform_10(%arg0: i32, %arg1: i32) -> (i32, i32) {
    %c0_i32 = arith.constant 0 : i32
    %c0_i32_0 = arith.constant 0 : i32
    %c0_i32_1 = arith.constant 0 : i32
    return %c0_i32, %c0_i32_0 : i32, i32
  }
  func.func @transform_11(%arg0: i32, %arg1: i32) -> (i32, i32) {
    %c0_i32 = arith.constant 0 : i32
    %c0_i32_0 = arith.constant 0 : i32
    %c0_i32_1 = arith.constant 0 : i32
    return %c0_i32, %c0_i32_0 : i32, i32
  }
  func.func @transform_12(%arg0: i32, %arg1: i32) -> (i32, i32) {
    %c0_i32 = arith.constant 0 : i32
    %c0_i32_0 = arith.constant 0 : i32
    %c0_i32_1 = arith.constant 0 : i32
    return %c0_i32, %c0_i32_0 : i32, i32
  }
  func.func @transform_13(%arg0: i32, %arg1: i32) -> (i32, i32) {
    %c0_i32 = arith.constant 0 : i32
    %c0_i32_0 = arith.constant 0 : i32
    %c0_i32_1 = arith.constant 0 : i32
    return %c0_i32, %c0_i32_0 : i32, i32
  }
  func.func @transform_14(%arg0: i32, %arg1: i32) -> (i32, i32) {
    %c0_i32 = arith.constant 0 : i32
    %c0_i32_0 = arith.constant 0 : i32
    %c0_i32_1 = arith.constant 0 : i32
    return %c0_i32, %c0_i32_0 : i32, i32
  }
  func.func @transform_15(%arg0: i32, %arg1: i32) -> (i32, i32) {
    %c0_i32 = arith.constant 0 : i32
    %c0_i32_0 = arith.constant 0 : i32
    %c0_i32_1 = arith.constant 0 : i32
    return %c0_i32, %c0_i32_0 : i32, i32
  }
  func.func @transform_16(%arg0: i32, %arg1: i32) -> (i32, i32) {
    %c0_i32 = arith.constant 0 : i32
    %c0_i32_0 = arith.constant 0 : i32
    %c0_i32_1 = arith.constant 0 : i32
    return %c0_i32, %c0_i32_0 : i32, i32
  }
  func.func @transform_17(%arg0: i32, %arg1: i32) -> (i32, i32) {
    %c0_i32 = arith.constant 0 : i32
    %c0_i32_0 = arith.constant 0 : i32
    %c0_i32_1 = arith.constant 0 : i32
    return %c0_i32, %c0_i32_0 : i32, i32
  }
  func.func @transform_18(%arg0: i32, %arg1: i32) -> (i32, i32) {
    %c0_i32 = arith.constant 0 : i32
    %c0_i32_0 = arith.constant 0 : i32
    return %arg0, %c0_i32 : i32, i32
  }
}

</mosaic_0001>

<bundles_post_ra>
// kernel: improved_pointnet_forward.1
= control target key start
LH: loop header
LB: loop body
LE: loop exit
PB: predicated region body
PF: predicated region fallthrough
CT: control target
= control target key end

     0   :  { %s9584_s0 = inlined_call_operand.vmem [shape: f32[2,128,3], index: 0, kind: input, shape index: {}]   ;;  %s9585_s1 = inlined_call_operand.vmem [shape: f32[3,64], index: 1, kind: input, shape index: {}]   ;;  %s9586_s2 = inlined_call_operand.hbm [shape: f32[1,64], index: 2, kind: input, shape index: {}]   ;;  %s9587_s3 = inlined_call_operand.hbm [shape: f32[1,64], index: 3, kind: input, shape index: {}]   ;;  %s9588_s4 = inlined_call_operand.hbm [shape: f32[64,128], index: 4, kind: input, shape index: {}]   ;;  %s9589_s5 = inlined_call_operand.hbm [shape: f32[1,128], index: 5, kind: input, shape index: {}]   ;;  %s9590_s6 = inlined_call_operand.hbm [shape: f32[1,128], index: 6, kind: input, shape index: {}]   ;;  %s9591_s7 = inlined_call_operand.vmem [shape: bf16[128,1024], index: 7, kind: input, shape index: {}]   ;;  %s9592_s8 = inlined_call_operand.vmem [shape: f32[1,1024], index: 8, kind: input, shape index: {}]   ;;  %s9593_s9 = inlined_call_operand.hbm [shape: f32[1,1024], index: 9, kind: input, shape index: {}]   ;;  %s9594_s10 = inlined_call_operand.hbm [shape: bf16[1024,512], index: 10, kind: input, shape index: {}]   ;;  %s9595_s11 = inlined_call_operand.hbm [shape: f32[1,512], index: 11, kind: input, shape index: {}]   ;;  %s9596_s12 = inlined_call_operand.vmem [shape: f32[1,512], index: 12, kind: input, shape index: {}]   ;;  %s9597_s13 = inlined_call_operand.hbm [shape: f32[512,256], index: 13, kind: input, shape index: {}]   ;;  %s9598_s14 = inlined_call_operand.vmem [shape: f32[1,256], index: 14, kind: input, shape index: {}]   ;;  %s9599_s15 = inlined_call_operand.hbm [shape: f32[1,256], index: 15, kind: input, shape index: {}]   ;;  %s9600_s16 = inlined_call_operand.vmem [shape: f32[256,10], index: 16, kind: input, shape index: {}]   ;;  %s9601_s17 = inlined_call_operand.hbm [shape: f32[1,10], index: 17, kind: input, shape index: {}]   ;;  %s9602_s18 = inlined_call_operand.hbm [shape: f32[2,10], index: 18, kind: output, shape index: {}]  }
   0x1   :  { %9604 = sst [smem:[#allocation29_spill]] %s9584_s0 }
   0x2   :  { %9605 = sst [smem:[#allocation30_spill]] %s9585_s1 }
   0x3   :  { %9606 = sst [smem:[#allocation31_spill]] %s9586_s2 }
   0x4   :  { %23 = vsyncpa [#allocation4], 0 }
   0x5   :  { %24 = vsyncpa [#allocation7], 0 }
   0x6   :  { %25 = vsyncpa [#allocation10], 0 }
   0x7   :  { %26 = vsyncpa [#allocation13], 0 }
   0x8   :  { %27 = vsyncpa [#allocation16], 0 }
   0x9   :  { %28 = vsyncpa [#allocation19], 0  ;;  %s50_s29 = sshll.u32 %s9587_s3, 4  ;;  %s51_s29 = int_to_ptr.hbm [resolvable:$true] %s50_s29 }
   0xa   :  { %29 = vsyncpa [#allocation5], 0  ;;  %s7633_s30 = smov [#allocation6]   ;;  %s74_s20 = sshll.u32 %s9589_s5, 4  ;;  %s75_s20 = int_to_ptr.hbm [resolvable:$true] %s74_s20 }
   0xb   :  { %s52_s0 = sshll.u32 %s7633_s30, 4  ;;  %s7634_s21 = smov [#allocation9]   ;;  %s53_s0 = int_to_ptr.vmem [resolvable:$true] %s52_s0 }
   0xc   :  { %55 = dma.hbm_to_vmem [thread:$0]  %s51_s29, 16, %s53_s0, [#allocation7]  }
   0xd   :  { %s76_s22 = sshll.u32 %s7634_s21, 4  ;;  %s100_s24 = sshll.u32 %s9593_s9, 4  ;;  %s77_s22 = int_to_ptr.vmem [resolvable:$true] %s76_s22  ;;  %s101_s24 = int_to_ptr.hbm [resolvable:$true] %s100_s24 }
   0xe   :  { %79 = dma.hbm_to_vmem [thread:$0]  %s75_s20, 16, %s77_s22, [#allocation10]  }
   0xf   :  { %s124_s26 = sshll.u32 %s9595_s11, 4  ;;  %s7635_s27 = smov [#allocation12]   ;;  %s125_s26 = int_to_ptr.hbm [resolvable:$true] %s124_s26 }
  0x10   :  { %s102_s28 = sshll.u32 %s7635_s27, 4  ;;  %s7636_s5 = smov [#allocation15]   ;;  %s103_s28 = int_to_ptr.vmem [resolvable:$true] %s102_s28 }
  0x11   :  { %105 = dma.hbm_to_vmem [thread:$0]  %s101_s24, 128, %s103_s28, [#allocation13]  }
  0x12   :  { %s126_s29 = sshll.u32 %s7636_s5, 4  ;;  %s152_s19 = sshll.u32 %s9599_s15, 4  ;;  %s127_s29 = int_to_ptr.vmem [resolvable:$true] %s126_s29  ;;  %s153_s19 = int_to_ptr.hbm [resolvable:$true] %s152_s19 }
  0x13   :  { %129 = dma.hbm_to_vmem [thread:$0]  %s125_s26, 64, %s127_s29, [#allocation16]  }
  0x14   :  { %s9607_s20 = sld [smem:[#allocation31_spill]]  ;;  %s7637_s22 = smov [#allocation18]  }
  0x15   :  { %s154_s11 = sshll.u32 %s7637_s22, 4  ;;  %s7638_s2 = smov [#allocation3]   ;;  %s155_s11 = int_to_ptr.vmem [resolvable:$true] %s154_s11 }
  0x16   :  { %157 = dma.hbm_to_vmem [thread:$0]  %s153_s19, 32, %s155_s11, [#allocation19]  }
  0x17   :  { %s41_s23 = sshll.u32 %s7638_s2, 4  ;;  %s60_s25 = sshll.u32 %s9588_s4, 4  ;;  %s42_s23 = int_to_ptr.vmem [resolvable:$true] %s41_s23  ;;  %s61_s25 = int_to_ptr.hbm [resolvable:$true] %s60_s25 }
  0x18   :  { %s7639_s15 = smov [#allocation8]   ;;  %s85_s5 = sshll.u32 %s9590_s6, 4  ;;  %s86_s5 = int_to_ptr.hbm [resolvable:$true] %s85_s5 }
  0x19   :  { %s62_s26 = sshll.u32 %s7639_s15, 4  ;;  %s7640_s29 = smov 128   ;;  %s63_s26 = int_to_ptr.vmem [resolvable:$true] %s62_s26 }
  0x1a   :  { %s39_s21 = sshll.u32 %s9607_s20, 4  ;;  %s7641_s30 = smov 8   ;;  %s40_s21 = int_to_ptr.hbm [resolvable:$true] %s39_s21 }
  0x1b   :  { %44 = dma.hbm_to_vmem [thread:$0]  %s40_s21, 16, %s42_s23, [#allocation4]  }
  0x1c   :  { %68 = dma.hbm_to_vmem [thread:$0]  %s61_s25, 1024, %s63_s26, [#allocation7], %s7640_s29, %s7640_s29, %s7641_s30  }
  0x1d   :  { %s7642_s0 = smov [#allocation11]   ;;  %s110_s4 = sshll.u32 %s9594_s10, 4  ;;  %s111_s4 = int_to_ptr.hbm [resolvable:$true] %s110_s4 }
  0x1e   :  { %s87_s19 = sshll.u32 %s7642_s0, 4  ;;  %s7643_s20 = smov [#allocation14]   ;;  %s88_s19 = int_to_ptr.vmem [resolvable:$true] %s87_s19 }
  0x1f   :  { %90 = dma.hbm_to_vmem [thread:$0]  %s86_s5, 16, %s88_s19, [#allocation10]  }
  0x20   :  { %s112_s21 = sshll.u32 %s7643_s20, 4  ;;  %s136_s6 = sshll.u32 %s9597_s13, 4  ;;  %s113_s21 = int_to_ptr.vmem [resolvable:$true] %s112_s21  ;;  %s137_s6 = int_to_ptr.hbm [resolvable:$true] %s136_s6 }
  0x21   :  { %s7644_s2 = smov 256   ;;  %s7645_s23 = smov 16  }
  0x22   :  { %118 = dma.hbm_to_vmem [thread:$0]  %s111_s4, 32768, %s113_s21, [#allocation13], %s7644_s2, %s7644_s2, %s7645_s23  }
  0x23   :  { %s7646_s24 = smov [#allocation17]   ;;  %s165_s10 = sshll.u32 %s9601_s17, 4  ;;  %s166_s10 = int_to_ptr.hbm [resolvable:$true] %s165_s10 }
  0x24   :  { %s138_s3 = sshll.u32 %s7646_s24, 4  ;;  %s7647_s26 = smov [#allocation20]   ;;  %s139_s3 = int_to_ptr.vmem [resolvable:$true] %s138_s3 }
  0x25   :  { %144 = dma.hbm_to_vmem [thread:$0]  %s137_s6, 16384, %s139_s3, [#allocation16], %s7644_s2, %s7644_s2, %s7645_s23  }
  0x26   :  { %s167_s27 = sshll.u32 %s7647_s26, 4  ;;  %s168_s27 = int_to_ptr.vmem [resolvable:$true] %s167_s27 }
  0x27   :  { %170 = dma.hbm_to_vmem [thread:$0]  %s166_s10, 16, %s168_s27, [#allocation19]  }
  0x28   :  { %7619 = dma.done.wait [#allocation4], 16  }
  0x29   :  { %7620 = vsyncadd [#allocation4], 4294967280 }
  0x2a   :  { %7621 = dma.done.wait [#allocation7], 1040  }
  0x2b   :  { %7622 = vsyncadd [#allocation7], 4294966256 }
  0x2c   :  { %7623 = dma.done.wait [#allocation10], 32  }
  0x2d   :  { %7624 = vsyncadd [#allocation10], 4294967264 }
  0x2e   :  { %7625 = dma.done.wait [#allocation13], 32896  }
  0x2f   :  { %7626 = vsyncadd [#allocation13], 4294934400 }
  0x30   :  { %7627 = dma.done.wait [#allocation16], 16448  }
  0x31   :  { %7628 = vsyncadd [#allocation16], 4294950848 }
  0x32   :  { %7629 = dma.done.wait [#allocation19], 48  }
  0x33   :  { %7630 = vsyncadd [#allocation19], 4294967248  ;;  %vm351_vm0 = vcmask 1042432   ;;  %vm254_vm1 = vcmask 23552   ;;  %s9608_s28 = sld [smem:[#allocation30_spill]]  ;;  %v579_v12 = vld [vmem:[#allocation8 + $0x38] sm:$0xff] }
  0x34   :  { %s9609_s30 = sld [smem:[#allocation29_spill]]  ;;  %v578_v13 = vld [vmem:[#allocation8 + $0x30] sm:$0xff]  ;;  %685 = vmatpush.msra.mxu1 %v579_v12  ;;  %v577_v15 = vld [vmem:[#allocation8 + $0x28] sm:$0xff]  ;;  %v576_v16 = vld [vmem:[#allocation8 + $0x20] sm:$0xff]  ;;  %vm580_vm2 = vcmask 523264   ;;  %vm3176_vm3 = vcmask 1041408  }
  0x35   :  { %v575_v17 = vld [vmem:[#allocation8 + $0x18] sm:$0xff]  ;;  %v574_v19 = vld [vmem:[#allocation8 + $0x10] sm:$0xff]  ;;  %v573_v20 = vld [vmem:[#allocation8 + $0x8] sm:$0xff]  ;;  %vm3178_vm4 = vcmask 1045508   ;;  %vm3180_vm5 = vcmask 1043456   ;;  %vm3196_vm6 = vcmask 1041409  }
  0x36   :  { %686 = vmatpush.msra.mxu1 %v578_v13  ;;  %v572_v21 = vld [vmem:[#allocation8] sm:$0xff]  ;;  %v7844_v25 = vld [vmem:[#allocation3] ss:$0 sm:$0xff]  ;;  %v7846_v26 = vld [vmem:[#allocation6] ss:$0 sm:$0xff]  ;;  %vm3198_vm7 = vcmask 1043459  }
  0x37   :  { %v5942_v12 = vld [vmem:[%s9591_s7 + $0x1e8] sm:$0xf0]  ;;  %vm3200_vm8 = vcmask 1045509   ;;  %vm3202_vm9 = vcmask 1047559   ;;  %s5626_s25 = sshll.u32 %s9602_s18, 4  ;;  %vm5617_vm10 = vcmask 74752   ;;  %s5627_s25 = int_to_ptr.hbm [resolvable:$true] %s5626_s25 }
  0x38   :  { %687 = vmatpush.msra.mxu1 %v577_v15 }
  0x39   :  { %v253_v0 = vld [vmem:[%s9608_s28] sm:$0x7] }
  0x3a   :  { %v221_v1 = vld [vmem:[%s9609_s30] sm:$0xff]  ;;  %5641 = vmatpush.msk.msra.mxu0 %vm351_vm0, %v253_v0  ;;  %v222_v2 = vld [vmem:[%s9609_s30 + $0x8] sm:$0xff]  ;;  %v223_v3 = vld [vmem:[%s9609_s30 + $0x10] sm:$0xff]  ;;  %688 = vmatpush.msra.mxu1 %v576_v16 }
  0x3b   :  { %5642 = vmatmul.msk.f32.vlgmr.msra.gmra.mxu0 %vm254_vm1, %v221_v1  ;;  %v224_v4 = vld [vmem:[%s9609_s30 + $0x18] sm:$0xff]  ;;  %v225_v5 = vld [vmem:[%s9609_s30 + $0x20] sm:$0xff]  ;;  %v226_v6 = vld [vmem:[%s9609_s30 + $0x28] sm:$0xff] }
  0x3c   :  { %v227_v7 = vld [vmem:[%s9609_s30 + $0x30] sm:$0xff]  ;;  %v228_v8 = vld [vmem:[%s9609_s30 + $0x38] sm:$0xff]  ;;  %v229_v9 = vld [vmem:[%s9609_s30 + $0x40] sm:$0xff]  ;;  %689 = vmatpush.msra.mxu1 %v575_v17 }
  0x3d   :  { %v230_v10 = vld [vmem:[%s9609_s30 + $0x48] sm:$0xff]  ;;  %v231_v11 = vld [vmem:[%s9609_s30 + $0x50] sm:$0xff]  ;;  %v232_v14 = vld [vmem:[%s9609_s30 + $0x58] sm:$0xff] }
  0x3e   :  { %v233_v18 = vld [vmem:[%s9609_s30 + $0x60] sm:$0xff]  ;;  %690 = vmatpush.msra.mxu1 %v574_v19  ;;  %v234_v22 = vld [vmem:[%s9609_s30 + $0x68] sm:$0xff]  ;;  %v235_v23 = vld [vmem:[%s9609_s30 + $0x70] sm:$0xff] }
  0x3f   :  { %v236_v24 = vld [vmem:[%s9609_s30 + $0x78] sm:$0xff]  ;;  %v237_v28 = vld [vmem:[%s9609_s30 + $0x80] sm:$0xff]  ;;  %v238_v33 = vld [vmem:[%s9609_s30 + $0x88] sm:$0xff] }
  0x40   :  { %691 = vmatpush.msra.mxu1 %v573_v20  ;;  %v239_v38 = vld [vmem:[%s9609_s30 + $0x90] sm:$0xff]  ;;  %v240_v43 = vld [vmem:[%s9609_s30 + $0x98] sm:$0xff]  ;;  %v241_v48 = vld [vmem:[%s9609_s30 + $0xa0] sm:$0xff] }
  0x41   :  { %v242_v53 = vld [vmem:[%s9609_s30 + $0xa8] sm:$0xff]  ;;  %v243_v58 = vld [vmem:[%s9609_s30 + $0xb0] sm:$0xff]  ;;  %v244_v63 = vld [vmem:[%s9609_s30 + $0xb8] sm:$0xff] }
  0x42   :  { %692 = vmatpush.msra.mxu1 %v572_v21  ;;  %v246_v15 = vld [vmem:[%s9609_s30 + $0xc8] sm:$0xff]  ;;  %v247_v20 = vld [vmem:[%s9609_s30 + $0xd0] sm:$0xff] }
  0x43   :  { %5643 = vmatmul.msk.f32.gmra.mxu0 %vm254_vm1, %v222_v2 }
  0x4b   :  { %5644 = vmatmul.msk.f32.gmra.mxu0 %vm254_vm1, %v223_v3 }
  0x53   :  { %5645 = vmatmul.msk.f32.gmra.mxu0 %vm254_vm1, %v224_v4  ;;  %v245_v4 = vld [vmem:[%s9609_s30 + $0xc0] sm:$0xff] }
  0x5b   :  { %5646 = vmatmul.msk.f32.gmra.mxu0 %vm254_vm1, %v225_v5 }
  0x63   :  { %5647 = vmatmul.msk.f32.gmra.mxu0 %vm254_vm1, %v226_v6 }
  0x6b   :  { %5648 = vmatmul.msk.f32.gmra.mxu0 %vm254_vm1, %v227_v7 }
  0x73   :  { %5649 = vmatmul.msk.f32.gmra.mxu0 %vm254_vm1, %v228_v8  ;;  %v5940_v8 = vld [vmem:[%s9591_s7 + $0x1c8] sm:$0xf] }
  0x7b   :  { %5650 = vmatmul.msk.f32.gmra.mxu0 %vm254_vm1, %v229_v9  ;;  %v7047_v9 = vld [vmem:[%s9591_s7 + $0x1e4] sm:$0xf0] }
  0x83   :  { %5651 = vmatmul.msk.f32.gmra.mxu0 %vm254_vm1, %v230_v10  ;;  %v5941_v10 = vor.u32 %v7047_v9, %v5940_v8  ;;  %v5806_v8 = vld [vmem:[%s9591_s7 + $0xe0] sm:$0xf0]  ;;  %v5812_v9 = vld [vmem:[%s9591_s7 + $0xc8] sm:$0xf] }
  0x85   :  { %1472 = vmatpush.bf16.msrb.mxu0 %v5941_v10 }
  0x8b   :  { %5652 = vmatmul.msk.f32.gmra.mxu0 %vm254_vm1, %v231_v11  ;;  %v7043_v11 = vld [vmem:[%s9591_s7 + $0x1cc] sm:$0xf] }
  0x8c   :  { %v5945_v13 = vor.u32 %v7043_v11, %v5942_v12  ;;  %v7035_v11 = vld [vmem:[%s9591_s7 + $0x18c] sm:$0xf] }
  0x8d   :  { %v5910_v12 = vld [vmem:[%s9591_s7 + $0x1a8] sm:$0xf0] }
  0x8e   :  { %1561 = vmatpush.bf16.msrb.mxu1 %v5945_v13 }
  0x93   :  { %5653 = vmatmul.msk.f32.gmra.mxu0 %vm254_vm1, %v232_v14 }
  0x9b   :  { %5654 = vmatmul.msk.f32.gmra.mxu0 %vm254_vm1, %v233_v18 }
  0xa3   :  { %5655 = vmatmul.msk.f32.gmra.mxu0 %vm254_vm1, %v234_v22 }
  0xab   :  { %5656 = vmatmul.msk.f32.gmra.mxu0 %vm254_vm1, %v235_v23  ;;  %v5932_v23 = vld [vmem:[%s9591_s7 + $0x1c0] sm:$0xf] }
  0xb3   :  { %5657 = vmatmul.msk.f32.gmra.mxu0 %vm254_vm1, %v236_v24  ;;  %v7046_v24 = vld [vmem:[%s9591_s7 + $0x1dc] sm:$0xf0] }
  0xb8   :  { %v372_v27 = vpop.f32.mrf.mxu0 }
  0xb9   :  { %v472_v29 = vmul.f32 %v7844_v25, %v372_v27  ;;  %v7042_v27 = vld [vmem:[%s9591_s7 + $0x1c4] sm:$0xf] }
  0xbb   :  { %v508_v30 = vadd.f32 %v7846_v26, %v472_v29  ;;  %5658 = vmatmul.msk.f32.gmra.mxu0 %vm254_vm1, %v237_v28  ;;  %v5933_v28 = vor.u32 %v7046_v24, %v5932_v23  ;;  %v5934_v29 = vld [vmem:[%s9591_s7 + $0x1e0] sm:$0xf0]  ;;  %v5780_v24 = vld [vmem:[%s9591_s7 + $0x88] sm:$0xf] }
  0xbc   :  { %v5774_v23 = vld [vmem:[%s9591_s7 + $0xa0] sm:$0xf0] }
  0xbd   :  { %v540_v31 = vmax.f32 %v508_v30, 0.0  ;;  %1294 = vmatpush.bf16.msra.mxu2 %v5933_v28 }
  0xbf   :  { %5674 = vmatmul.msk.f32.vlgmr.msra.gmra.mxu1 %vm580_vm2, %v540_v31  ;;  %v5937_v31 = vor.u32 %v7042_v27, %v5934_v29  ;;  %v7007_v27 = vld [vmem:[%s9591_s7 + $0xa4] sm:$0xf0] }
  0xc0   :  { %v375_v32 = vpop.f32.mrf.mxu0 }
  0xc1   :  { %v473_v34 = vmul.f32 %v7844_v25, %v375_v32  ;;  %v248_v32 = vld [vmem:[%s9609_s30 + $0xd8] sm:$0xff]  ;;  %1383 = vmatpush.bf16.msra.mxu3 %v5937_v31 }
  0xc3   :  { %v509_v35 = vadd.f32 %v7846_v26, %v473_v34  ;;  %5659 = vmatmul.msk.f32.gmra.mxu0 %vm254_vm1, %v238_v33  ;;  %v5900_v33 = vld [vmem:[%s9591_s7 + $0x180] sm:$0xf] }
  0xc4   :  { %v7038_v34 = vld [vmem:[%s9591_s7 + $0x19c] sm:$0xf0] }
  0xc5   :  { %v541_v36 = vmax.f32 %v509_v35, 0.0  ;;  %v7034_v35 = vld [vmem:[%s9591_s7 + $0x184] sm:$0xf] }
  0xc7   :  { %5675 = vmatmul.msk.f32.gmra.mxu1 %vm580_vm2, %v541_v36 }
  0xc8   :  { %v378_v37 = vpop.f32.mrf.mxu0 }
  0xc9   :  { %v474_v39 = vmul.f32 %v7844_v25, %v378_v37  ;;  %v5901_v37 = vor.u32 %v7038_v34, %v5900_v33  ;;  %v6998_v33 = vld [vmem:[%s9591_s7 + $0x5c] sm:$0xf0]  ;;  %v6994_v34 = vld [vmem:[%s9591_s7 + $0x44] sm:$0xf] }
  0xcb   :  { %v510_v40 = vadd.f32 %v7846_v26, %v474_v39  ;;  %5660 = vmatmul.msk.f32.gmra.mxu0 %vm254_vm1, %v239_v38  ;;  %v5902_v38 = vld [vmem:[%s9591_s7 + $0x1a0] sm:$0xf0]  ;;  %v5908_v39 = vld [vmem:[%s9591_s7 + $0x188] sm:$0xf]  ;;  %1295 = vmatpush.bf16.msra.mxu2 %v5901_v37 }
  0xcc   :  { %v5748_v37 = vld [vmem:[%s9591_s7 + $0x48] sm:$0xf] }
  0xcd   :  { %v542_v41 = vmax.f32 %v510_v40, 0.0  ;;  %v7039_v40 = vld [vmem:[%s9591_s7 + $0x1a4] sm:$0xf0] }
  0xcf   :  { %5676 = vmatmul.msk.f32.gmra.mxu1 %vm580_vm2, %v542_v41 }
  0xd0   :  { %v381_v42 = vpop.f32.mrf.mxu0 }
  0xd1   :  { %v475_v44 = vmul.f32 %v7844_v25, %v381_v42  ;;  %v5905_v42 = vor.u32 %v7034_v35, %v5902_v38  ;;  %v6999_v38 = vld [vmem:[%s9591_s7 + $0x64] sm:$0xf0] }
  0xd3   :  { %v511_v45 = vadd.f32 %v7846_v26, %v475_v44  ;;  %5661 = vmatmul.msk.f32.gmra.mxu0 %vm254_vm1, %v240_v43  ;;  %v5909_v43 = vor.u32 %v7039_v40, %v5908_v39  ;;  %1384 = vmatpush.bf16.msra.mxu3 %v5905_v42  ;;  %v251_v42 = vld [vmem:[%s9609_s30 + $0xf0] sm:$0xff] }
  0xd5   :  { %v543_v46 = vmax.f32 %v511_v45, 0.0  ;;  %v5868_v45 = vld [vmem:[%s9591_s7 + $0x140] sm:$0xf]  ;;  %1473 = vmatpush.bf16.msrb.mxu0 %v5909_v43 }
  0xd6   :  { %v5708_v43 = vld [vmem:[%s9591_s7] sm:$0xf] }
  0xd7   :  { %5677 = vmatmul.msk.f32.gmra.mxu1 %vm580_vm2, %v543_v46  ;;  %v7030_v46 = vld [vmem:[%s9591_s7 + $0x15c] sm:$0xf0] }
  0xd8   :  { %v384_v47 = vpop.f32.mrf.mxu0 }
  0xd9   :  { %v476_v49 = vmul.f32 %v7844_v25, %v384_v47  ;;  %v7026_v47 = vld [vmem:[%s9591_s7 + $0x144] sm:$0xf] }
  0xdb   :  { %v512_v50 = vadd.f32 %v7846_v26, %v476_v49  ;;  %5662 = vmatmul.msk.f32.gmra.mxu0 %vm254_vm1, %v241_v48  ;;  %v5869_v48 = vor.u32 %v7030_v46, %v5868_v45  ;;  %v5870_v49 = vld [vmem:[%s9591_s7 + $0x160] sm:$0xf0] }
  0xdc   :  { %v6986_v45 = vld [vmem:[%s9591_s7 + $0x4] sm:$0xf] }
  0xdd   :  { %v544_v51 = vmax.f32 %v512_v50, 0.0  ;;  %v5876_v50 = vld [vmem:[%s9591_s7 + $0x148] sm:$0xf]  ;;  %1296 = vmatpush.bf16.msra.mxu2 %v5869_v48  ;;  %v5710_v48 = vld [vmem:[%s9591_s7 + $0x20] sm:$0xf0] }
  0xdf   :  { %5678 = vmatmul.msk.f32.gmra.mxu1 %vm580_vm2, %v544_v51  ;;  %v7031_v51 = vld [vmem:[%s9591_s7 + $0x164] sm:$0xf0] }
  0xe0   :  { %v387_v52 = vpop.f32.mrf.mxu0 }
  0xe1   :  { %v477_v54 = vmul.f32 %v7844_v25, %v387_v52 }
  0xe3   :  { %v513_v55 = vadd.f32 %v7846_v26, %v477_v54  ;;  %5663 = vmatmul.msk.f32.gmra.mxu0 %vm254_vm1, %v242_v53  ;;  %v5873_v53 = vor.u32 %v7026_v47, %v5870_v49  ;;  %v5877_v54 = vor.u32 %v7031_v51, %v5876_v50  ;;  %v5716_v49 = vld [vmem:[%s9591_s7 + $0x8] sm:$0xf] }
  0xe4   :  { %v6991_v50 = vld [vmem:[%s9591_s7 + $0x24] sm:$0xf0] }
  0xe5   :  { %v545_v56 = vmax.f32 %v513_v55, 0.0  ;;  %v249_v55 = vld [vmem:[%s9609_s30 + $0xe0] sm:$0xff]  ;;  %1385 = vmatpush.bf16.msra.mxu3 %v5873_v53  ;;  %1474 = vmatpush.bf16.msrb.mxu0 %v5877_v54  ;;  %v5717_v53 = vor.u32 %v6991_v50, %v5716_v49 }
  0xe7   :  { %5679 = vmatmul.msk.f32.gmra.mxu1 %vm580_vm2, %v545_v56  ;;  %v5836_v56 = vld [vmem:[%s9591_s7 + $0x100] sm:$0xf] }
  0xe8   :  { %v390_v57 = vpop.f32.mrf.mxu0 }
  0xe9   :  { %v478_v59 = vmul.f32 %v7844_v25, %v390_v57  ;;  %v7022_v57 = vld [vmem:[%s9591_s7 + $0x11c] sm:$0xf0] }
  0xeb   :  { %v514_v60 = vadd.f32 %v7846_v26, %v478_v59  ;;  %5664 = vmatmul.msk.f32.gmra.mxu0 %vm254_vm1, %v243_v58  ;;  %v7018_v58 = vld [vmem:[%s9591_s7 + $0x104] sm:$0xf] }
  0xed   :  { %v546_v61 = vmax.f32 %v514_v60, 0.0  ;;  %v5837_v60 = vor.u32 %v7022_v57, %v5836_v56  ;;  %v252_v57 = vld [vmem:[%s9609_s30 + $0xf8] sm:$0xff] }
  0xef   :  { %5680 = vmatmul.msk.f32.gmra.mxu1 %vm580_vm2, %v546_v61  ;;  %v5838_v61 = vld [vmem:[%s9591_s7 + $0x120] sm:$0xf0]  ;;  %1297 = vmatpush.bf16.msra.mxu2 %v5837_v60 }
  0xf0   :  { %v393_v62 = vpop.f32.mrf.mxu0 }
  0xf1   :  { %v479_v0 = vmul.f32 %v7844_v25, %v393_v62  ;;  %v5844_v62 = vld [vmem:[%s9591_s7 + $0x108] sm:$0xf] }
  0xf3   :  { %v515_v1 = vadd.f32 %v7846_v26, %v479_v0  ;;  %5665 = vmatmul.msk.f32.gmra.mxu0 %vm254_vm1, %v244_v63  ;;  %v7023_v63 = vld [vmem:[%s9591_s7 + $0x124] sm:$0xf0] }
  0xf5   :  { %v547_v2 = vmax.f32 %v515_v1, 0.0  ;;  %v5841_v1 = vor.u32 %v7018_v58, %v5838_v61 }
  0xf7   :  { %5681 = vmatmul.msk.f32.gmra.mxu1 %vm580_vm2, %v547_v2  ;;  %v5845_v2 = vor.u32 %v7023_v63, %v5844_v62  ;;  %1386 = vmatpush.bf16.msra.mxu3 %v5841_v1  ;;  %v8118_v1 = vld [vmem:[#allocation9] ss:$0 sm:$0xff] }
  0xf8   :  { %v396_v3 = vpop.f32.mrf.mxu0 }
  0xf9   :  { %v480_v5 = vmul.f32 %v7844_v25, %v396_v3  ;;  %1475 = vmatpush.bf16.msrb.mxu0 %v5845_v2 }
  0xfb   :  { %v516_v6 = vadd.f32 %v7846_v26, %v480_v5  ;;  %5666 = vmatmul.msk.f32.gmra.mxu0 %vm254_vm1, %v245_v4  ;;  %v5804_v4 = vld [vmem:[%s9591_s7 + $0xc0] sm:$0xf] }
  0xfc   :  { %v7014_v5 = vld [vmem:[%s9591_s7 + $0xdc] sm:$0xf0] }
  0xfd   :  { %v548_v7 = vmax.f32 %v516_v6, 0.0  ;;  %v5805_v6 = vor.u32 %v7014_v5, %v5804_v4  ;;  %v5878_v4 = vld [vmem:[%s9591_s7 + $0x168] sm:$0xf0] }
  0xff   :  { %5682 = vmatmul.msk.f32.gmra.mxu1 %vm580_vm2, %v548_v7  ;;  %v7010_v7 = vld [vmem:[%s9591_s7 + $0xc4] sm:$0xf]  ;;  %1298 = vmatpush.bf16.msra.mxu2 %v5805_v6 }
 0x100   :  { %v399_v14 = vpop.f32.mrf.mxu0  ;;  %v5809_v13 = vor.u32 %v7010_v7, %v5806_v8  ;;  %v8128_v8 = vld [vmem:[#allocation11] ss:$0 sm:$0xff] }
 0x101   :  { %v481_v16 = vmul.f32 %v7844_v25, %v399_v14  ;;  %v250_v14 = vld [vmem:[%s9609_s30 + $0xe8] sm:$0xff] }
 0x102   :  { %1387 = vmatpush.bf16.msra.mxu3 %v5809_v13 }
 0x103   :  { %v517_v17 = vadd.f32 %v7846_v26, %v481_v16  ;;  %5667 = vmatmul.msk.f32.gmra.mxu0 %vm254_vm1, %v246_v15  ;;  %v5913_v15 = vor.u32 %v7035_v11, %v5910_v12  ;;  %v7015_v16 = vld [vmem:[%s9591_s7 + $0xe4] sm:$0xf0] }
 0x105   :  { %v549_v18 = vmax.f32 %v517_v17, 0.0  ;;  %v5813_v17 = vor.u32 %v7015_v16, %v5812_v9  ;;  %1562 = vmatpush.bf16.msrb.mxu1 %v5913_v15 }
 0x107   :  { %5683 = vmatmul.msk.f32.gmra.mxu1 %vm580_vm2, %v549_v18  ;;  %v5772_v18 = vld [vmem:[%s9591_s7 + $0x80] sm:$0xf]  ;;  %1476 = vmatpush.bf16.msrb.mxu0 %v5813_v17 }
 0x108   :  { %v402_v19 = vpop.f32.mrf.mxu0 }
 0x109   :  { %v482_v21 = vmul.f32 %v7844_v25, %v402_v19  ;;  %v7006_v19 = vld [vmem:[%s9591_s7 + $0x9c] sm:$0xf0] }
 0x10b   :  { %v518_v22 = vadd.f32 %v7846_v26, %v482_v21  ;;  %5668 = vmatmul.msk.f32.gmra.mxu0 %vm254_vm1, %v247_v20  ;;  %v7002_v20 = vld [vmem:[%s9591_s7 + $0x84] sm:$0xf] }
 0x10c   :  { %v5777_v29 = vor.u32 %v7002_v20, %v5774_v23 }
 0x10d   :  { %v550_v30 = vmax.f32 %v518_v22, 0.0  ;;  %v5773_v22 = vor.u32 %v7006_v19, %v5772_v18 }
 0x10e   :  { %1388 = vmatpush.bf16.msra.mxu3 %v5777_v29 }
 0x10f   :  { %5684 = vmatmul.msk.f32.gmra.mxu1 %vm580_vm2, %v550_v30  ;;  %v5781_v30 = vor.u32 %v7007_v27, %v5780_v24  ;;  %1299 = vmatpush.bf16.msra.mxu2 %v5773_v22 }
 0x110   :  { %v405_v36 = vpop.f32.mrf.mxu0 }
 0x111   :  { %v483_v41 = vmul.f32 %v7844_v25, %v405_v36  ;;  %v5742_v36 = vld [vmem:[%s9591_s7 + $0x60] sm:$0xf0]  ;;  %1477 = vmatpush.bf16.msrb.mxu0 %v5781_v30 }
 0x112   :  { %v5745_v40 = vor.u32 %v6994_v34, %v5742_v36 }
 0x113   :  { %v519_v44 = vadd.f32 %v7846_v26, %v483_v41  ;;  %5669 = vmatmul.msk.f32.gmra.mxu0 %vm254_vm1, %v248_v32  ;;  %v5740_v32 = vld [vmem:[%s9591_s7 + $0x40] sm:$0xf]  ;;  %v5749_v41 = vor.u32 %v6999_v38, %v5748_v37 }
 0x114   :  { %v5741_v35 = vor.u32 %v6998_v33, %v5740_v32  ;;  %1389 = vmatpush.bf16.msra.mxu3 %v5745_v40 }
 0x115   :  { %v551_v52 = vmax.f32 %v519_v44, 0.0  ;;  %v6990_v44 = vld [vmem:[%s9591_s7 + $0x1c] sm:$0xf0]  ;;  %1478 = vmatpush.bf16.msrb.mxu0 %v5749_v41 }
 0x116   :  { %1300 = vmatpush.bf16.msra.mxu2 %v5741_v35  ;;  %v5709_v47 = vor.u32 %v6990_v44, %v5708_v43  ;;  %v7019_v43 = vld [vmem:[%s9591_s7 + $0x10c] sm:$0xf] }
 0x117   :  { %5685 = vmatmul.msk.f32.gmra.mxu1 %vm580_vm2, %v551_v52  ;;  %v5713_v52 = vor.u32 %v6986_v45, %v5710_v48  ;;  %v5846_v44 = vld [vmem:[%s9591_s7 + $0x128] sm:$0xf0] }
 0x118   :  { %v408_v59 = vpop.f32.mrf.mxu0  ;;  %v5849_v45 = vor.u32 %v7019_v43, %v5846_v44 }
 0x119   :  { %v484_v0 = vmul.f32 %v7844_v25, %v408_v59  ;;  %1390 = vmatpush.bf16.msra.mxu3 %v5713_v52  ;;  %1479 = vmatpush.bf16.msrb.mxu0 %v5717_v53 }
 0x11a   :  { %1301 = vmatpush.bf16.msra.mxu2 %v5709_v47 }
 0x11b   :  { %v520_v3 = vadd.f32 %v7846_v26, %v484_v0  ;;  %5670 = vmatmul.msk.f32.gmra.mxu0 %vm254_vm1, %v249_v55 }
 0x11d   :  { %v552_v10 = vmax.f32 %v520_v3, 0.0  ;;  %v7027_v3 = vld [vmem:[%s9591_s7 + $0x14c] sm:$0xf] }
 0x11e   :  { %v5881_v5 = vor.u32 %v7027_v3, %v5878_v4 }
 0x11f   :  { %5686 = vmatmul.msk.f32.gmra.mxu1 %vm580_vm2, %v552_v10 }
 0x120   :  { %v411_v21 = vpop.f32.mrf.mxu0  ;;  %1563 = vmatpush.bf16.msrb.mxu1 %v5881_v5 }
 0x121   :  { %v485_v28 = vmul.f32 %v7844_v25, %v411_v21 }
 0x123   :  { %v521_v31 = vadd.f32 %v7846_v26, %v485_v28  ;;  %5671 = vmatmul.msk.f32.gmra.mxu0 %vm254_vm1, %v250_v14 }
 0x124   :  { %1564 = vmatpush.bf16.msrb.mxu1 %v5849_v45  ;;  %v7003_v45 = vld [vmem:[%s9591_s7 + $0x8c] sm:$0xf] }
 0x125   :  { %v553_v39 = vmax.f32 %v521_v31, 0.0 }
 0x127   :  { %5687 = vmatmul.msk.f32.gmra.mxu1 %vm580_vm2, %v553_v39 }
 0x128   :  { %v414_v46 = vpop.f32.mrf.mxu0 }
 0x129   :  { %v486_v51 = vmul.f32 %v7844_v25, %v414_v46 }
 0x12b   :  { %v522_v54 = vadd.f32 %v7846_v26, %v486_v51  ;;  %5672 = vmatmul.msk.f32.gmra.mxu0 %vm254_vm1, %v251_v42 }
 0x12d   :  { %v554_v55 = vmax.f32 %v522_v54, 0.0 }
 0x12f   :  { %5688 = vmatmul.msk.f32.gmra.mxu1 %vm580_vm2, %v554_v55 }
 0x130   :  { %v417_v56 = vpop.f32.mrf.mxu0 }
 0x131   :  { %v487_v58 = vmul.f32 %v7844_v25, %v417_v56 }
 0x133   :  { %v523_v59 = vadd.f32 %v7846_v26, %v487_v58  ;;  %5673 = vmatmul.msk.f32.gmra.mxu0 %vm254_vm1, %v252_v57 }
 0x135   :  { %v555_v60 = vmax.f32 %v523_v59, 0.0 }
 0x137   :  { %5689 = vmatmul.msk.f32.gmra.mxu1 %vm580_vm2, %v555_v60 }
 0x138   :  { %v420_v61 = vpop.f32.mrf.mxu0 }
 0x139   :  { %v488_v62 = vmul.f32 %v7844_v25, %v420_v61 }
 0x13b   :  { %v524_v63 = vadd.f32 %v7846_v26, %v488_v62 }
 0x13c   :  { %v694_v0 = vpop.f32.mrf.mxu1 }
 0x13d   :  { %v556_v2 = vmax.f32 %v524_v63, 0.0  ;;  %v794_v7 = vmul.f32 %v8118_v1, %v694_v0 }
 0x13f   :  { %5690 = vmatmul.msk.f32.gmra.mxu1 %vm580_vm2, %v556_v2  ;;  %v830_v12 = vadd.f32 %v8128_v8, %v794_v7 }
 0x140   :  { %v423_v6 = vpop.f32.mrf.mxu0 }
 0x141   :  { %v489_v9 = vmul.f32 %v7844_v25, %v423_v6  ;;  %v862_v17 = vmax.f32 %v830_v12, 0.0 }
 0x143   :  { %v525_v10 = vadd.f32 %v7846_v26, %v489_v9 }
 0x144   :  { %v697_v11 = vpop.f32.mrf.mxu1 }
 0x145   :  { %v795_v13 = vmul.f32 %v8118_v1, %v697_v11  ;;  %v557_v14 = vmax.f32 %v525_v10, 0.0 }
 0x147   :  { %v831_v15 = vadd.f32 %v8128_v8, %v795_v13  ;;  %5691 = vmatmul.msk.f32.gmra.mxu1 %vm580_vm2, %v557_v14 }
 0x148   :  { %v426_v16 = vpop.f32.mrf.mxu0 }
 0x149   :  { %v863_v18 = vmax.f32 %v831_v15, 0.0  ;;  %v490_v19 = vmul.f32 %v7844_v25, %v426_v16 }
 0x14b   :  { %v8137_v20 = vpack.c.bf16 %v863_v18, %v862_v17  ;;  %v526_v21 = vadd.f32 %v7846_v26, %v490_v19  ;;  %v7011_v18 = vld [vmem:[%s9591_s7 + $0xcc] sm:$0xf] }
 0x14c   :  { %v700_v22 = vpop.f32.mrf.mxu1  ;;  %v5814_v19 = vld [vmem:[%s9591_s7 + $0xe8] sm:$0xf0] }
 0x14d   :  { %v558_v23 = vmax.f32 %v526_v21, 0.0  ;;  %1302 = vmatmul.bf16.vlgmr.msra.gmra.mxu2 %v8137_v20  ;;  %1391 = vmatmul.bf16.vlgmr.msra.gmra.mxu3 %v8137_v20  ;;  %v796_v27 = vmul.f32 %v8118_v1, %v700_v22  ;;  %v5817_v21 = vor.u32 %v7011_v18, %v5814_v19 }
 0x14e   :  { %1480 = vmatmul.bf16.vlgmr.msrb.gmra.mxu0 %v8137_v20 }
 0x14f   :  { %5692 = vmatmul.msk.f32.gmra.mxu1 %vm580_vm2, %v558_v23  ;;  %v832_v31 = vadd.f32 %v8128_v8, %v796_v27 }
 0x150   :  { %v429_v24 = vpop.f32.mrf.mxu0  ;;  %1565 = vmatpush.bf16.msrb.mxu1 %v5817_v21 }
 0x151   :  { %v491_v28 = vmul.f32 %v7844_v25, %v429_v24  ;;  %v864_v36 = vmax.f32 %v832_v31, 0.0 }
 0x153   :  { %v527_v29 = vadd.f32 %v7846_v26, %v491_v28 }
 0x154   :  { %v703_v30 = vpop.f32.mrf.mxu1 }
 0x155   :  { %v797_v32 = vmul.f32 %v8118_v1, %v703_v30  ;;  %v559_v33 = vmax.f32 %v527_v29, 0.0 }
 0x157   :  { %v833_v34 = vadd.f32 %v8128_v8, %v797_v32  ;;  %5693 = vmatmul.msk.f32.gmra.mxu1 %vm580_vm2, %v559_v33 }
 0x158   :  { %v432_v35 = vpop.f32.mrf.mxu0 }
 0x159   :  { %v865_v37 = vmax.f32 %v833_v34, 0.0  ;;  %v492_v38 = vmul.f32 %v7844_v25, %v432_v35 }
 0x15b   :  { %v8152_v39 = vpack.c.bf16 %v865_v37, %v864_v36  ;;  %v528_v40 = vadd.f32 %v7846_v26, %v492_v38 }
 0x15c   :  { %v706_v41 = vpop.f32.mrf.mxu1 }
 0x15d   :  { %v560_v42 = vmax.f32 %v528_v40, 0.0  ;;  %1307 = vmatmul.bf16.gmra.mxu2 %v8152_v39  ;;  %1396 = vmatmul.bf16.gmra.mxu3 %v8152_v39  ;;  %v798_v47 = vmul.f32 %v8118_v1, %v706_v41 }
 0x15e   :  { %1485 = vmatmul.bf16.gmra.mxu0 %v8152_v39 }
 0x15f   :  { %5694 = vmatmul.msk.f32.gmra.mxu1 %vm580_vm2, %v560_v42  ;;  %v834_v51 = vadd.f32 %v8128_v8, %v798_v47 }
 0x160   :  { %v435_v46 = vpop.f32.mrf.mxu0 }
 0x161   :  { %v493_v48 = vmul.f32 %v7844_v25, %v435_v46  ;;  %v866_v56 = vmax.f32 %v834_v51, 0.0  ;;  %v5782_v46 = vld [vmem:[%s9591_s7 + $0xa8] sm:$0xf0] }
 0x163   :  { %v529_v49 = vadd.f32 %v7846_v26, %v493_v48  ;;  %v5785_v48 = vor.u32 %v7003_v45, %v5782_v46 }
 0x164   :  { %v709_v50 = vpop.f32.mrf.mxu1 }
 0x165   :  { %v799_v52 = vmul.f32 %v8118_v1, %v709_v50  ;;  %v561_v53 = vmax.f32 %v529_v49, 0.0  ;;  %1566 = vmatpush.bf16.msrb.mxu1 %v5785_v48  ;;  %v8284_v48 = vld [vmem:[%s9592_s8] sm:$0xff] }
 0x167   :  { %v835_v54 = vadd.f32 %v8128_v8, %v799_v52  ;;  %5695 = vmatmul.msk.f32.gmra.mxu1 %vm580_vm2, %v561_v53  ;;  %v6995_v53 = vld [vmem:[%s9591_s7 + $0x4c] sm:$0xf] }
 0x168   :  { %v438_v55 = vpop.f32.mrf.mxu0 }
 0x169   :  { %v867_v57 = vmax.f32 %v835_v54, 0.0  ;;  %v494_v58 = vmul.f32 %v7844_v25, %v438_v55  ;;  %v5750_v54 = vld [vmem:[%s9591_s7 + $0x68] sm:$0xf0] }
 0x16b   :  { %v8173_v59 = vpack.c.bf16 %v867_v57, %v866_v56  ;;  %v530_v60 = vadd.f32 %v7846_v26, %v494_v58  ;;  %v5753_v56 = vor.u32 %v6995_v53, %v5750_v54  ;;  %v8291_v53 = vld [vmem:[#allocation12] sm:$0xff] }
 0x16c   :  { %v712_v61 = vpop.f32.mrf.mxu1 }
 0x16d   :  { %v562_v62 = vmax.f32 %v530_v60, 0.0  ;;  %1312 = vmatmul.bf16.gmra.mxu2 %v8173_v59  ;;  %1401 = vmatmul.bf16.gmra.mxu3 %v8173_v59  ;;  %v800_v0 = vmul.f32 %v8118_v1, %v712_v61 }
 0x16e   :  { %1490 = vmatmul.bf16.gmra.mxu0 %v8173_v59  ;;  %1567 = vmatpush.bf16.msrb.mxu1 %v5753_v56 }
 0x16f   :  { %5696 = vmatmul.msk.f32.gmra.mxu1 %vm580_vm2, %v562_v62  ;;  %v836_v5 = vadd.f32 %v8128_v8, %v800_v0  ;;  %v6987_v62 = vld [vmem:[%s9591_s7 + $0xc] sm:$0xf] }
 0x170   :  { %v441_v63 = vpop.f32.mrf.mxu0 }
 0x171   :  { %v495_v2 = vmul.f32 %v7844_v25, %v441_v63  ;;  %v868_v11 = vmax.f32 %v836_v5, 0.0  ;;  %v5718_v63 = vld [vmem:[%s9591_s7 + $0x28] sm:$0xf0] }
 0x173   :  { %v531_v3 = vadd.f32 %v7846_v26, %v495_v2 }
 0x174   :  { %v715_v4 = vpop.f32.mrf.mxu1 }
 0x175   :  { %v801_v6 = vmul.f32 %v8118_v1, %v715_v4  ;;  %v563_v7 = vmax.f32 %v531_v3, 0.0  ;;  %v5721_v3 = vor.u32 %v6987_v62, %v5718_v63  ;;  %v8309_v62 = vperm.slane %v8291_v53, 0 }
 0x177   :  { %v837_v9 = vadd.f32 %v8128_v8, %v801_v6  ;;  %5697 = vmatmul.msk.f32.gmra.mxu1 %vm580_vm2, %v563_v7 }
 0x178   :  { %v444_v10 = vpop.f32.mrf.mxu0  ;;  %1568 = vmatpush.bf16.msrb.mxu1 %v5721_v3 }
 0x179   :  { %v869_v12 = vmax.f32 %v837_v9, 0.0  ;;  %v496_v13 = vmul.f32 %v7844_v25, %v444_v10 }
 0x17b   :  { %v8188_v14 = vpack.c.bf16 %v869_v12, %v868_v11  ;;  %v532_v15 = vadd.f32 %v7846_v26, %v496_v13 }
 0x17c   :  { %v718_v16 = vpop.f32.mrf.mxu1 }
 0x17d   :  { %v564_v17 = vmax.f32 %v532_v15, 0.0  ;;  %1317 = vmatmul.bf16.gmra.mxu2 %v8188_v14  ;;  %1406 = vmatmul.bf16.gmra.mxu3 %v8188_v14  ;;  %v802_v23 = vmul.f32 %v8118_v1, %v718_v16 }
 0x17e   :  { %1495 = vmatmul.bf16.gmra.mxu0 %v8188_v14 }
 0x17f   :  { %5698 = vmatmul.msk.f32.gmra.mxu1 %vm580_vm2, %v564_v17  ;;  %v838_v29 = vadd.f32 %v8128_v8, %v802_v23 }
 0x180   :  { %v447_v22 = vpop.f32.mrf.mxu0 }
 0x181   :  { %v497_v24 = vmul.f32 %v7844_v25, %v447_v22  ;;  %v870_v34 = vmax.f32 %v838_v29, 0.0 }
 0x183   :  { %v533_v27 = vadd.f32 %v7846_v26, %v497_v24 }
 0x184   :  { %v721_v28 = vpop.f32.mrf.mxu1 }
 0x185   :  { %v565_v30 = vmax.f32 %v533_v27, 0.0  ;;  %v803_v31 = vmul.f32 %v8118_v1, %v721_v28 }
 0x187   :  { %v839_v32 = vadd.f32 %v8128_v8, %v803_v31  ;;  %5699 = vmatmul.msk.f32.gmra.mxu1 %vm580_vm2, %v565_v30 }
 0x188   :  { %v450_v33 = vpop.f32.mrf.mxu0 }
 0x189   :  { %v871_v35 = vmax.f32 %v839_v32, 0.0  ;;  %v498_v36 = vmul.f32 %v7844_v25, %v450_v33 }
 0x18b   :  { %v8209_v37 = vpack.c.bf16 %v871_v35, %v870_v34  ;;  %v534_v38 = vadd.f32 %v7846_v26, %v498_v36 }
 0x18c   :  { %v724_v40 = vpop.f32.mrf.mxu1 }
 0x18d   :  { %v566_v41 = vmax.f32 %v534_v38, 0.0  ;;  %1322 = vmatmul.bf16.gmra.mxu2 %v8209_v37  ;;  %1411 = vmatmul.bf16.gmra.mxu3 %v8209_v37  ;;  %v804_v43 = vmul.f32 %v8118_v1, %v724_v40 }
 0x18e   :  { %1500 = vmatmul.bf16.gmra.mxu0 %v8209_v37 }
 0x18f   :  { %5700 = vmatmul.msk.f32.gmra.mxu1 %vm580_vm2, %v566_v41  ;;  %v840_v50 = vadd.f32 %v8128_v8, %v804_v43 }
 0x190   :  { %v453_v42 = vpop.f32.mrf.mxu0 }
 0x191   :  { %v499_v44 = vmul.f32 %v7844_v25, %v453_v42  ;;  %v872_v58 = vmax.f32 %v840_v50, 0.0 }
 0x193   :  { %v535_v47 = vadd.f32 %v7846_v26, %v499_v44 }
 0x194   :  { %v727_v49 = vpop.f32.mrf.mxu1 }
 0x195   :  { %v567_v51 = vmax.f32 %v535_v47, 0.0  ;;  %v805_v52 = vmul.f32 %v8118_v1, %v727_v49 }
 0x197   :  { %v841_v55 = vadd.f32 %v8128_v8, %v805_v52  ;;  %5701 = vmatmul.msk.f32.gmra.mxu1 %vm580_vm2, %v567_v51  ;;  %v8289_v51 = vperm.slane %v8284_v48, 2 }
 0x198   :  { %v456_v57 = vpop.f32.mrf.mxu0 }
 0x199   :  { %v873_v60 = vmax.f32 %v841_v55, 0.0  ;;  %v500_v61 = vmul.f32 %v7844_v25, %v456_v57  ;;  %v8299_v55 = vperm.slane %v8291_v53, 2 }
 0x19b   :  { %v8242_v0 = vpack.c.bf16 %v873_v60, %v872_v58  ;;  %v536_v2 = vadd.f32 %v7846_v26, %v500_v61  ;;  %v8303_v58 = vperm.slane %v8284_v48, 0  ;;  %v8306_v61 = vperm.slane %v8284_v48, 1 }
 0x19c   :  { %v730_v4 = vpop.f32.mrf.mxu1 }
 0x19d   :  { %v568_v5 = vmax.f32 %v536_v2, 0.0  ;;  %1327 = vmatmul.bf16.gmra.mxu2 %v8242_v0  ;;  %1416 = vmatmul.bf16.gmra.mxu3 %v8242_v0  ;;  %v806_v7 = vmul.f32 %v8118_v1, %v730_v4 }
 0x19e   :  { %1505 = vmatmul.bf16.gmra.mxu0 %v8242_v0 }
 0x19f   :  { %5702 = vmatmul.msk.f32.gmra.mxu1 %vm580_vm2, %v568_v5  ;;  %v842_v12 = vadd.f32 %v8128_v8, %v806_v7 }
 0x1a0   :  { %v459_v6 = vpop.f32.mrf.mxu0 }
 0x1a1   :  { %v501_v9 = vmul.f32 %v7844_v25, %v459_v6  ;;  %v874_v18 = vmax.f32 %v842_v12, 0.0 }
 0x1a3   :  { %v537_v10 = vadd.f32 %v7846_v26, %v501_v9  ;;  %v8317_v9 = vperm.slane %v8291_v53, 1 }
 0x1a4   :  { %v733_v11 = vpop.f32.mrf.mxu1 }
 0x1a5   :  { %v569_v13 = vmax.f32 %v537_v10, 0.0  ;;  %v807_v15 = vmul.f32 %v8118_v1, %v733_v11 }
 0x1a7   :  { %v843_v16 = vadd.f32 %v8128_v8, %v807_v15  ;;  %5703 = vmatmul.msk.f32.gmra.mxu1 %vm580_vm2, %v569_v13 }
 0x1a8   :  { %v462_v17 = vpop.f32.mrf.mxu0 }
 0x1a9   :  { %v875_v19 = vmax.f32 %v843_v16, 0.0  ;;  %v502_v21 = vmul.f32 %v7844_v25, %v462_v17 }
 0x1ab   :  { %v8257_v22 = vpack.c.bf16 %v875_v19, %v874_v18  ;;  %v538_v23 = vadd.f32 %v7846_v26, %v502_v21 }
 0x1ac   :  { %v736_v24 = vpop.f32.mrf.mxu1 }
 0x1ad   :  { %v570_v27 = vmax.f32 %v538_v23, 0.0  ;;  %1332 = vmatmul.bf16.gmra.mxu2 %v8257_v22  ;;  %1421 = vmatmul.bf16.gmra.mxu3 %v8257_v22  ;;  %v808_v29 = vmul.f32 %v8118_v1, %v736_v24 }
 0x1ae   :  { %1510 = vmatmul.bf16.gmra.mxu0 %v8257_v22 }
 0x1af   :  { %5704 = vmatmul.msk.f32.gmra.mxu1 %vm580_vm2, %v570_v27  ;;  %v844_v33 = vadd.f32 %v8128_v8, %v808_v29 }
 0x1b0   :  { %v465_v28 = vpop.f32.mrf.mxu0 }
 0x1b1   :  { %v503_v30 = vmul.f32 %v7844_v25, %v465_v28  ;;  %v876_v38 = vmax.f32 %v844_v33, 0.0 }
 0x1b3   :  { %v539_v31 = vadd.f32 %v7846_v26, %v503_v30 }
 0x1b4   :  { %v739_v32 = vpop.f32.mrf.mxu1 }
 0x1b5   :  { %v571_v34 = vmax.f32 %v539_v31, 0.0  ;;  %v809_v35 = vmul.f32 %v8118_v1, %v739_v32 }
 0x1b7   :  { %v845_v36 = vadd.f32 %v8128_v8, %v809_v35  ;;  %5705 = vmatmul.msk.f32.gmra.mxu1 %vm580_vm2, %v571_v34 }
 0x1b9   :  { %v877_v40 = vmax.f32 %v845_v36, 0.0 }
 0x1bb   :  { %v8271_v41 = vpack.c.bf16 %v877_v40, %v876_v38 }
 0x1bc   :  { %v742_v42 = vpop.f32.mrf.mxu1 }
 0x1bd   :  { %1337 = vmatmul.bf16.gmra.mxu2 %v8271_v41  ;;  %1426 = vmatmul.bf16.gmra.mxu3 %v8271_v41  ;;  %v810_v25 = vmul.f32 %v8118_v1, %v742_v42 }
 0x1be   :  { %1515 = vmatmul.bf16.gmra.mxu0 %v8271_v41 }
 0x1bf   :  { %1569 = vmatmul.bf16.vlgmr.msrb.gmra.mxu1 %v8137_v20  ;;  %v846_v43 = vadd.f32 %v8128_v8, %v810_v25 }
 0x1c1   :  { %v878_v46 = vmax.f32 %v846_v43, 0.0 }
 0x1c4   :  { %v745_v26 = vpop.f32.mrf.mxu1 }
 0x1c5   :  { %v811_v44 = vmul.f32 %v8118_v1, %v745_v26 }
 0x1c7   :  { %v847_v45 = vadd.f32 %v8128_v8, %v811_v44 }
 0x1c9   :  { %v879_v47 = vmax.f32 %v847_v45, 0.0 }
 0x1cb   :  { %v8286_v49 = vpack.c.bf16 %v879_v47, %v878_v46  ;;  %v1481_v50 = vpop.f32.mrf.mxu0 }
 0x1cc   :  { %v748_v52 = vpop.f32.mrf.mxu1  ;;  %v2026_v54 = vmul.f32 %v8289_v51, %v1481_v50 }
 0x1cd   :  { %1342 = vmatmul.bf16.gmra.mxu2 %v8286_v49  ;;  %1431 = vmatmul.bf16.gmra.mxu3 %v8286_v49  ;;  %v812_v56 = vmul.f32 %v8118_v1, %v748_v52 }
 0x1ce   :  { %1520 = vmatmul.bf16.gmra.mxu0 %v8286_v49  ;;  %v2300_v2 = vadd.f32 %v8299_v55, %v2026_v54 }
 0x1cf   :  { %1574 = vmatmul.bf16.gmra.mxu1 %v8152_v39  ;;  %v848_v3 = vadd.f32 %v8128_v8, %v812_v56 }
 0x1d0   :  { %v1303_v57 = vpop.f32.mrf.mxu2  ;;  %v1392_v60 = vpop.f32.mrf.mxu3  ;;  %v2556_v13 = vmax.f32 %v2300_v2, 0.0 }
 0x1d1   :  { %v2024_v4 = vmul.f32 %v8303_v58, %v1303_v57  ;;  %v2025_v7 = vmul.f32 %v8306_v61, %v1392_v60  ;;  %v880_v15 = vmax.f32 %v848_v3, 0.0 }
 0x1d3   :  { %v1483_v63 = vpop.f32.mrf.mxu0  ;;  %v2298_v16 = vadd.f32 %v8309_v62, %v2024_v4  ;;  %v2299_v21 = vadd.f32 %v8317_v9, %v2025_v7 }
 0x1d4   :  { %v2034_v5 = vmul.f32 %v8289_v51, %v1483_v63  ;;  %v751_v6 = vpop.f32.mrf.mxu1 }
 0x1d5   :  { %v813_v10 = vmul.f32 %v8118_v1, %v751_v6  ;;  %v2554_v35 = vmax.f32 %v2298_v16, 0.0  ;;  %v2555_v36 = vmax.f32 %v2299_v21, 0.0 }
 0x1d6   :  { %v2308_v11 = vadd.f32 %v8299_v55, %v2034_v5 }
 0x1d7   :  { %v849_v12 = vadd.f32 %v8128_v8, %v813_v10 }
 0x1d8   :  { %v2564_v17 = vmax.f32 %v2308_v11, 0.0  ;;  %v1305_v18 = vpop.f32.mrf.mxu2  ;;  %v1394_v19 = vpop.f32.mrf.mxu3 }
 0x1d9   :  { %v881_v23 = vmax.f32 %v849_v12, 0.0  ;;  %v2032_v24 = vmul.f32 %v8303_v58, %v1305_v18  ;;  %v2033_v27 = vmul.f32 %v8306_v61, %v1394_v19 }
 0x1da   :  { %v2852_v28 = vmax.f32 %v2556_v13, %v2564_v17 }
 0x1db   :  { %v8326_v29 = vpack.c.bf16 %v881_v23, %v880_v15  ;;  %v2306_v30 = vadd.f32 %v8309_v62, %v2032_v24  ;;  %v2307_v31 = vadd.f32 %v8317_v9, %v2033_v27  ;;  %v1486_v32 = vpop.f32.mrf.mxu0 }
 0x1dc   :  { %v2042_v33 = vmul.f32 %v8289_v51, %v1486_v32  ;;  %v754_v34 = vpop.f32.mrf.mxu1 }
 0x1dd   :  { %v2562_v38 = vmax.f32 %v2306_v30, 0.0  ;;  %v2563_v40 = vmax.f32 %v2307_v31, 0.0  ;;  %1347 = vmatmul.bf16.gmra.mxu2 %v8326_v29  ;;  %1436 = vmatmul.bf16.gmra.mxu3 %v8326_v29  ;;  %v814_v46 = vmul.f32 %v8118_v1, %v754_v34 }
 0x1de   :  { %v2316_v42 = vadd.f32 %v8299_v55, %v2042_v33  ;;  %1525 = vmatmul.bf16.gmra.mxu0 %v8326_v29 }
 0x1df   :  { %v2810_v25 = vmax.f32 %v2554_v35, %v2562_v38  ;;  %v2831_v26 = vmax.f32 %v2555_v36, %v2563_v40  ;;  %1579 = vmatmul.bf16.gmra.mxu1 %v8173_v59  ;;  %v850_v2 = vadd.f32 %v8128_v8, %v814_v46 }
 0x1e0   :  { %v2572_v43 = vmax.f32 %v2316_v42, 0.0  ;;  %v1308_v44 = vpop.f32.mrf.mxu2  ;;  %v1397_v45 = vpop.f32.mrf.mxu3 }
 0x1e1   :  { %v2040_v47 = vmul.f32 %v8303_v58, %v1308_v44  ;;  %v2041_v50 = vmul.f32 %v8306_v61, %v1397_v45  ;;  %v882_v16 = vmax.f32 %v850_v2, 0.0 }
 0x1e2   :  { %v2853_v52 = vmax.f32 %v2852_v28, %v2572_v43 }
 0x1e3   :  { %v2314_v54 = vadd.f32 %v8309_v62, %v2040_v47  ;;  %v2315_v56 = vadd.f32 %v8317_v9, %v2041_v50  ;;  %v1488_v57 = vpop.f32.mrf.mxu0 }
 0x1e4   :  { %v2050_v60 = vmul.f32 %v8289_v51, %v1488_v57  ;;  %v757_v63 = vpop.f32.mrf.mxu1 }
 0x1e5   :  { %v2570_v3 = vmax.f32 %v2314_v54, 0.0  ;;  %v2571_v4 = vmax.f32 %v2315_v56, 0.0  ;;  %v815_v5 = vmul.f32 %v8118_v1, %v757_v63 }
 0x1e6   :  { %v2324_v6 = vadd.f32 %v8299_v55, %v2050_v60 }
 0x1e7   :  { %v2811_v7 = vmax.f32 %v2810_v25, %v2570_v3  ;;  %v2832_v10 = vmax.f32 %v2831_v26, %v2571_v4  ;;  %v851_v11 = vadd.f32 %v8128_v8, %v815_v5 }
 0x1e8   :  { %v2580_v12 = vmax.f32 %v2324_v6, 0.0  ;;  %v1310_v13 = vpop.f32.mrf.mxu2  ;;  %v1399_v15 = vpop.f32.mrf.mxu3 }
 0x1e9   :  { %v883_v17 = vmax.f32 %v851_v11, 0.0  ;;  %v2048_v18 = vmul.f32 %v8303_v58, %v1310_v13  ;;  %v2049_v19 = vmul.f32 %v8306_v61, %v1399_v15 }
 0x1ea   :  { %v2854_v21 = vmax.f32 %v2853_v52, %v2580_v12 }
 0x1eb   :  { %v8348_v23 = vpack.c.bf16 %v883_v17, %v882_v16  ;;  %v2322_v24 = vadd.f32 %v8309_v62, %v2048_v18  ;;  %v2323_v27 = vadd.f32 %v8317_v9, %v2049_v19  ;;  %v1491_v28 = vpop.f32.mrf.mxu0  ;;  %v7044_v16 = vld [vmem:[%s9591_s7 + $0x1d4] sm:$0xf] }
 0x1ec   :  { %v2058_v30 = vmul.f32 %v8289_v51, %v1491_v28  ;;  %v760_v31 = vpop.f32.mrf.mxu1  ;;  %v5950_v17 = vld [vmem:[%s9591_s7 + $0x1f0] sm:$0xf0]  ;;  %v5948_v28 = vld [vmem:[%s9591_s7 + $0x1d0] sm:$0xf] }
 0x1ed   :  { %v2578_v32 = vmax.f32 %v2322_v24, 0.0  ;;  %v2579_v33 = vmax.f32 %v2323_v27, 0.0  ;;  %1352 = vmatmul.bf16.gmra.mxu2 %v8348_v23  ;;  %1441 = vmatmul.bf16.gmra.mxu3 %v8348_v23  ;;  %v816_v25 = vmul.f32 %v8118_v1, %v760_v31  ;;  %v5953_v27 = vor.u32 %v7044_v16, %v5950_v17 }
 0x1ee   :  { %v2332_v34 = vadd.f32 %v8299_v55, %v2058_v30  ;;  %1530 = vmatmul.bf16.gmra.mxu0 %v8348_v23  ;;  %v7048_v30 = vld [vmem:[%s9591_s7 + $0x1ec] sm:$0xf0] }
 0x1ef   :  { %v2812_v35 = vmax.f32 %v2811_v7, %v2578_v32  ;;  %v2833_v36 = vmax.f32 %v2832_v10, %v2579_v33  ;;  %1584 = vmatmul.bf16.gmra.mxu1 %v8188_v14  ;;  %v852_v54 = vadd.f32 %v8128_v8, %v816_v25  ;;  %v5949_v33 = vor.u32 %v7048_v30, %v5948_v28  ;;  %v7049_v25 = vld [vmem:[%s9591_s7 + $0x1f4] sm:$0xf0] }
 0x1f0   :  { %v2588_v38 = vmax.f32 %v2332_v34, 0.0  ;;  %v1313_v40 = vpop.f32.mrf.mxu2  ;;  %v1402_v42 = vpop.f32.mrf.mxu3  ;;  %1739 = vmatpush.bf16.msrb.mxu3 %v5953_v27 }
 0x1f1   :  { %v2056_v26 = vmul.f32 %v8303_v58, %v1313_v40  ;;  %v2057_v43 = vmul.f32 %v8306_v61, %v1402_v42  ;;  %v884_v10 = vmax.f32 %v852_v54, 0.0  ;;  %1650 = vmatpush.bf16.msrb.mxu2 %v5949_v33  ;;  %v5956_v42 = vld [vmem:[%s9591_s7 + $0x1d8] sm:$0xf] }
 0x1f2   :  { %v2855_v44 = vmax.f32 %v2854_v21, %v2588_v38 }
 0x1f3   :  { %v2330_v45 = vadd.f32 %v8309_v62, %v2056_v26  ;;  %v2331_v46 = vadd.f32 %v8317_v9, %v2057_v43  ;;  %v1493_v47 = vpop.f32.mrf.mxu0  ;;  %v7045_v26 = vld [vmem:[%s9591_s7 + $0x1dc] sm:$0xf] }
 0x1f4   :  { %v2066_v50 = vmul.f32 %v8289_v51, %v1493_v47  ;;  %v763_v52 = vpop.f32.mrf.mxu1  ;;  %v5958_v47 = vld [vmem:[%s9591_s7 + $0x1f8] sm:$0xf0] }
 0x1f5   :  { %v2586_v56 = vmax.f32 %v2330_v45, 0.0  ;;  %v2587_v57 = vmax.f32 %v2331_v46, 0.0  ;;  %v817_v60 = vmul.f32 %v8118_v1, %v763_v52  ;;  %v5957_v46 = vor.u32 %v7049_v25, %v5956_v42 }
 0x1f6   :  { %v2340_v63 = vadd.f32 %v8299_v55, %v2066_v50 }
 0x1f7   :  { %v2813_v2 = vmax.f32 %v2812_v35, %v2586_v56  ;;  %v2834_v3 = vmax.f32 %v2833_v36, %v2587_v57  ;;  %v853_v4 = vadd.f32 %v8128_v8, %v817_v60  ;;  %v5961_v56 = vor.u32 %v7045_v26, %v5958_v47  ;;  %1828 = vmatpush.bf16.msra.mxu0 %v5957_v46  ;;  %v5916_v47 = vld [vmem:[%s9591_s7 + $0x190] sm:$0xf] }
 0x1f8   :  { %v2596_v5 = vmax.f32 %v2340_v63, 0.0  ;;  %v1315_v6 = vpop.f32.mrf.mxu2  ;;  %v1404_v7 = vpop.f32.mrf.mxu3 }
 0x1f9   :  { %v885_v11 = vmax.f32 %v853_v4, 0.0  ;;  %v2064_v12 = vmul.f32 %v8303_v58, %v1315_v6  ;;  %v2065_v13 = vmul.f32 %v8306_v61, %v1404_v7  ;;  %1917 = vmatpush.bf16.msra.mxu1 %v5961_v56 }
 0x1fa   :  { %v2856_v15 = vmax.f32 %v2855_v44, %v2596_v5 }
 0x1fb   :  { %v8376_v18 = vpack.c.bf16 %v885_v11, %v884_v10  ;;  %v2338_v19 = vadd.f32 %v8309_v62, %v2064_v12  ;;  %v2339_v21 = vadd.f32 %v8317_v9, %v2065_v13  ;;  %v1496_v24 = vpop.f32.mrf.mxu0 }
 0x1fc   :  { %v2074_v31 = vmul.f32 %v8289_v51, %v1496_v24  ;;  %v766_v32 = vpop.f32.mrf.mxu1 }
 0x1fd   :  { %v2594_v34 = vmax.f32 %v2338_v19, 0.0  ;;  %v2595_v35 = vmax.f32 %v2339_v21, 0.0  ;;  %1357 = vmatmul.bf16.gmra.mxu2 %v8376_v18  ;;  %1446 = vmatmul.bf16.gmra.mxu3 %v8376_v18  ;;  %v818_v50 = vmul.f32 %v8118_v1, %v766_v32 }
 0x1fe   :  { %v2348_v36 = vadd.f32 %v8299_v55, %v2074_v31  ;;  %1535 = vmatmul.bf16.gmra.mxu0 %v8376_v18 }
 0x1ff   :  { %v2814_v38 = vmax.f32 %v2813_v2, %v2594_v34  ;;  %v2835_v40 = vmax.f32 %v2834_v3, %v2595_v35  ;;  %1589 = vmatmul.bf16.gmra.mxu1 %v8209_v37  ;;  %v854_v5 = vadd.f32 %v8128_v8, %v818_v50  ;;  %v7040_v50 = vld [vmem:[%s9591_s7 + $0x1ac] sm:$0xf0] }
 0x200   :  { %v2604_v43 = vmax.f32 %v2348_v36, 0.0  ;;  %v1318_v44 = vpop.f32.mrf.mxu2  ;;  %v1407_v45 = vpop.f32.mrf.mxu3  ;;  %v5917_v56 = vor.u32 %v7040_v50, %v5916_v47  ;;  %v7024_v47 = vld [vmem:[%s9591_s7 + $0x12c] sm:$0xf0] }
 0x201   :  { %v2072_v52 = vmul.f32 %v8303_v58, %v1318_v44  ;;  %v2073_v54 = vmul.f32 %v8306_v61, %v1407_v45  ;;  %v886_v21 = vmax.f32 %v854_v5, 0.0 }
 0x202   :  { %v2857_v57 = vmax.f32 %v2856_v15, %v2604_v43  ;;  %1651 = vmatpush.bf16.msrb.mxu2 %v5917_v56 }
 0x203   :  { %v2346_v60 = vadd.f32 %v8309_v62, %v2072_v52  ;;  %v2347_v63 = vadd.f32 %v8317_v9, %v2073_v54  ;;  %v1498_v2 = vpop.f32.mrf.mxu0 }
 0x204   :  { %v2082_v3 = vmul.f32 %v8289_v51, %v1498_v2  ;;  %v769_v4 = vpop.f32.mrf.mxu1 }
 0x205   :  { %v2602_v6 = vmax.f32 %v2346_v60, 0.0  ;;  %v2603_v7 = vmax.f32 %v2347_v63, 0.0  ;;  %v819_v10 = vmul.f32 %v8118_v1, %v769_v4  ;;  %v5918_v60 = vld [vmem:[%s9591_s7 + $0x1b0] sm:$0xf0]  ;;  %v7041_v4 = vld [vmem:[%s9591_s7 + $0x1b4] sm:$0xf0] }
 0x206   :  { %v2356_v11 = vadd.f32 %v8299_v55, %v2082_v3  ;;  %v5924_v3 = vld [vmem:[%s9591_s7 + $0x198] sm:$0xf] }
 0x207   :  { %v2815_v12 = vmax.f32 %v2814_v38, %v2602_v6  ;;  %v2836_v13 = vmax.f32 %v2835_v40, %v2603_v7  ;;  %v855_v15 = vadd.f32 %v8128_v8, %v819_v10  ;;  %v5925_v10 = vor.u32 %v7041_v4, %v5924_v3 }
 0x208   :  { %v2612_v16 = vmax.f32 %v2356_v11, 0.0  ;;  %v1320_v17 = vpop.f32.mrf.mxu2  ;;  %v1409_v19 = vpop.f32.mrf.mxu3 }
 0x209   :  { %v887_v24 = vmax.f32 %v855_v15, 0.0  ;;  %v2080_v27 = vmul.f32 %v8303_v58, %v1320_v17  ;;  %v2081_v28 = vmul.f32 %v8306_v61, %v1409_v19  ;;  %v5884_v15 = vld [vmem:[%s9591_s7 + $0x150] sm:$0xf]  ;;  %v7028_v17 = vld [vmem:[%s9591_s7 + $0x154] sm:$0xf]  ;;  %1829 = vmatpush.bf16.msra.mxu0 %v5925_v10 }
 0x20a   :  { %v2858_v30 = vmax.f32 %v2857_v57, %v2612_v16  ;;  %v7036_v57 = vld [vmem:[%s9591_s7 + $0x194] sm:$0xf]  ;;  %v7032_v16 = vld [vmem:[%s9591_s7 + $0x16c] sm:$0xf0] }
 0x20b   :  { %v8416_v31 = vpack.c.bf16 %v887_v24, %v886_v21  ;;  %v2354_v32 = vadd.f32 %v8309_v62, %v2080_v27  ;;  %v2355_v33 = vadd.f32 %v8317_v9, %v2081_v28  ;;  %v1501_v34 = vpop.f32.mrf.mxu0  ;;  %v5921_v2 = vor.u32 %v7036_v57, %v5918_v60  ;;  %v5886_v28 = vld [vmem:[%s9591_s7 + $0x170] sm:$0xf0]  ;;  %v5860_v60 = vld [vmem:[%s9591_s7 + $0x118] sm:$0xf] }
 0x20c   :  { %v2090_v35 = vmul.f32 %v8289_v51, %v1501_v34  ;;  %v772_v36 = vpop.f32.mrf.mxu1  ;;  %v5885_v27 = vor.u32 %v7032_v16, %v5884_v15  ;;  %v7033_v34 = vld [vmem:[%s9591_s7 + $0x174] sm:$0xf0] }
 0x20d   :  { %v2610_v38 = vmax.f32 %v2354_v32, 0.0  ;;  %v2611_v40 = vmax.f32 %v2355_v33, 0.0  ;;  %1362 = vmatmul.bf16.gmra.mxu2 %v8416_v31  ;;  %1451 = vmatmul.bf16.gmra.mxu3 %v8416_v31  ;;  %v820_v44 = vmul.f32 %v8118_v1, %v772_v36  ;;  %v5889_v33 = vor.u32 %v7028_v17, %v5886_v28  ;;  %v7012_v17 = vld [vmem:[%s9591_s7 + $0xd4] sm:$0xf]  ;;  %v7017_v28 = vld [vmem:[%s9591_s7 + $0xf4] sm:$0xf0] }
 0x20e   :  { %v2364_v42 = vadd.f32 %v8299_v55, %v2090_v35  ;;  %1540 = vmatmul.bf16.gmra.mxu0 %v8416_v31  ;;  %1740 = vmatpush.bf16.msrb.mxu3 %v5921_v2  ;;  %v7025_v2 = vld [vmem:[%s9591_s7 + $0x134] sm:$0xf0] }
 0x20f   :  { %v2816_v25 = vmax.f32 %v2815_v12, %v2610_v38  ;;  %v2837_v26 = vmax.f32 %v2836_v13, %v2611_v40  ;;  %1594 = vmatmul.bf16.gmra.mxu1 %v8242_v0  ;;  %v856_v11 = vadd.f32 %v8128_v8, %v820_v44  ;;  %1652 = vmatpush.bf16.msrb.mxu2 %v5885_v27  ;;  %v5828_v27 = vld [vmem:[%s9591_s7 + $0xd8] sm:$0xf] }
 0x210   :  { %v2620_v43 = vmax.f32 %v2364_v42, 0.0  ;;  %v1323_v45 = vpop.f32.mrf.mxu2  ;;  %v1412_v46 = vpop.f32.mrf.mxu3 }
 0x211   :  { %v2088_v52 = vmul.f32 %v8303_v58, %v1323_v45  ;;  %v2089_v54 = vmul.f32 %v8306_v61, %v1412_v46  ;;  %v888_v42 = vmax.f32 %v856_v11, 0.0  ;;  %v5852_v46 = vld [vmem:[%s9591_s7 + $0x110] sm:$0xf] }
 0x212   :  { %v2859_v63 = vmax.f32 %v2858_v30, %v2620_v43  ;;  %v5892_v30 = vld [vmem:[%s9591_s7 + $0x158] sm:$0xf]  ;;  %1741 = vmatpush.bf16.msrb.mxu3 %v5889_v33  ;;  %v5820_v11 = vld [vmem:[%s9591_s7 + $0xd0] sm:$0xf]  ;;  %v7037_v33 = vld [vmem:[%s9591_s7 + $0x19c] sm:$0xf] }
 0x213   :  { %v2362_v5 = vadd.f32 %v8309_v62, %v2088_v52  ;;  %v2363_v6 = vadd.f32 %v8317_v9, %v2089_v54  ;;  %v1503_v7 = vpop.f32.mrf.mxu0  ;;  %v5893_v40 = vor.u32 %v7033_v34, %v5892_v30  ;;  %v7020_v52 = vld [vmem:[%s9591_s7 + $0x114] sm:$0xf]  ;;  %v5926_v34 = vld [vmem:[%s9591_s7 + $0x1b8] sm:$0xf0] }
 0x214   :  { %v2098_v12 = vmul.f32 %v8289_v51, %v1503_v7  ;;  %v775_v13 = vpop.f32.mrf.mxu1  ;;  %v5854_v54 = vld [vmem:[%s9591_s7 + $0x130] sm:$0xf0]  ;;  %v5861_v7 = vor.u32 %v7025_v2, %v5860_v60 }
 0x215   :  { %v2618_v19 = vmax.f32 %v2362_v5, 0.0  ;;  %v2619_v21 = vmax.f32 %v2363_v6, 0.0  ;;  %v821_v24 = vmul.f32 %v8118_v1, %v775_v13  ;;  %1830 = vmatpush.bf16.msra.mxu0 %v5893_v40  ;;  %v5857_v57 = vor.u32 %v7020_v52, %v5854_v54  ;;  %v5796_v52 = vld [vmem:[%s9591_s7 + $0x98] sm:$0xf] }
 0x216   :  { %v2372_v32 = vadd.f32 %v8299_v55, %v2098_v12  ;;  %v7016_v12 = vld [vmem:[%s9591_s7 + $0xec] sm:$0xf0]  ;;  %v7009_v54 = vld [vmem:[%s9591_s7 + $0xb4] sm:$0xf0] }
 0x217   :  { %v2817_v35 = vmax.f32 %v2816_v25, %v2618_v19  ;;  %v2838_v36 = vmax.f32 %v2837_v26, %v2619_v21  ;;  %v857_v38 = vadd.f32 %v8128_v8, %v821_v24  ;;  %v5853_v26 = vor.u32 %v7024_v47, %v5852_v46  ;;  %1742 = vmatpush.bf16.msrb.mxu3 %v5857_v57  ;;  %v5822_v19 = vld [vmem:[%s9591_s7 + $0xf0] sm:$0xf0] }
 0x218   :  { %v2628_v43 = vmax.f32 %v2372_v32, 0.0  ;;  %v1325_v44 = vpop.f32.mrf.mxu2  ;;  %v1414_v45 = vpop.f32.mrf.mxu3  ;;  %v5821_v16 = vor.u32 %v7016_v12, %v5820_v11  ;;  %v5825_v24 = vor.u32 %v7012_v17, %v5822_v19  ;;  %v6996_v11 = vld [vmem:[%s9591_s7 + $0x54] sm:$0xf] }
 0x219   :  { %v889_v50 = vmax.f32 %v857_v38, 0.0  ;;  %v2096_v25 = vmul.f32 %v8303_v58, %v1325_v44  ;;  %v2097_v8 = vmul.f32 %v8306_v61, %v1414_v45  ;;  %1653 = vmatpush.bf16.msrb.mxu2 %v5853_v26  ;;  %1831 = vmatpush.bf16.msra.mxu0 %v5861_v7  ;;  %v5929_v44 = vor.u32 %v7037_v33, %v5926_v34  ;;  %v7008_v45 = vld [vmem:[%s9591_s7 + $0xac] sm:$0xf0]  ;;  %v5758_v19 = vld [vmem:[%s9591_s7 + $0x70] sm:$0xf0] }
 0x21a   :  { %v2860_v56 = vmax.f32 %v2859_v63, %v2628_v43 }
 0x21b   :  { %v8492_v3 = vpack.c.bf16 %v889_v50, %v888_v42  ;;  %v2370_v4 = vadd.f32 %v8309_v62, %v2096_v25  ;;  %v2371_v5 = vadd.f32 %v8317_v9, %v2097_v8  ;;  %v1506_v6 = vpop.f32.mrf.mxu0  ;;  %1743 = vmatpush.bf16.msrb.mxu3 %v5825_v24  ;;  %v5790_v25 = vld [vmem:[%s9591_s7 + $0xb0] sm:$0xf0]  ;;  %1918 = vmatpush.bf16.msra.mxu1 %v5929_v44 }
 0x21c   :  { %v2106_v63 = vmul.f32 %v8289_v51, %v1506_v6  ;;  %v778_v10 = vpop.f32.mrf.mxu1 }
 0x21d   :  { %v2626_v13 = vmax.f32 %v2370_v4, 0.0  ;;  %v2627_v15 = vmax.f32 %v2371_v5, 0.0  ;;  %1367 = vmatmul.bf16.gmra.mxu2 %v8492_v3  ;;  %1456 = vmatmul.bf16.gmra.mxu3 %v8492_v3  ;;  %v822_v40 = vmul.f32 %v8118_v1, %v778_v10  ;;  %v7004_v1 = vld [vmem:[%s9591_s7 + $0x94] sm:$0xf]  ;;  %v5797_v4 = vor.u32 %v7009_v54, %v5796_v52  ;;  %v8549_v5 = vld [vmem:[#allocation11] ss:$0 sm:$0xff] }
 0x21e   :  { %v2380_v21 = vadd.f32 %v8299_v55, %v2106_v63  ;;  %1545 = vmatmul.bf16.gmra.mxu0 %v8492_v3  ;;  %1654 = vmatpush.bf16.msrb.mxu2 %v5821_v16  ;;  %v5793_v26 = vor.u32 %v7004_v1, %v5790_v25  ;;  %v5756_v63 = vld [vmem:[%s9591_s7 + $0x50] sm:$0xf]  ;;  %v5726_v1 = vld [vmem:[%s9591_s7 + $0x30] sm:$0xf0]  ;;  %v5732_v52 = vld [vmem:[%s9591_s7 + $0x18] sm:$0xf] }
 0x21f   :  { %v2818_v30 = vmax.f32 %v2817_v35, %v2626_v13  ;;  %v2839_v32 = vmax.f32 %v2838_v36, %v2627_v15  ;;  %1599 = vmatmul.bf16.gmra.mxu1 %v8257_v22  ;;  %v5829_v35 = vor.u32 %v7017_v28, %v5828_v27  ;;  %v5788_v36 = vld [vmem:[%s9591_s7 + $0x90] sm:$0xf]  ;;  %v8562_v15 = vld [vmem:[#allocation9] ss:$0 sm:$0xff]  ;;  %v5761_v27 = vor.u32 %v6996_v11, %v5758_v19  ;;  %v7001_v28 = vld [vmem:[%s9591_s7 + $0x74] sm:$0xf0] }
 0x220   :  { %v2636_v38 = vmax.f32 %v2380_v21, 0.0  ;;  %v1328_v42 = vpop.f32.mrf.mxu2  ;;  %v1417_v43 = vpop.f32.mrf.mxu3  ;;  %v5789_v50 = vor.u32 %v7008_v45, %v5788_v36  ;;  %1744 = vmatpush.bf16.msrb.mxu3 %v5793_v26  ;;  %v7000_v10 = vld [vmem:[%s9591_s7 + $0x6c] sm:$0xf0]  ;;  %v5764_v21 = vld [vmem:[%s9591_s7 + $0x58] sm:$0xf] }
 0x221   :  { %v2104_v46 = vmul.f32 %v8303_v58, %v1328_v42  ;;  %v2105_v47 = vmul.f32 %v8306_v61, %v1417_v43  ;;  %1832 = vmatpush.bf16.msra.mxu0 %v5829_v35  ;;  %v5757_v17 = vor.u32 %v7000_v10, %v5756_v63  ;;  %v5724_v36 = vld [vmem:[%s9591_s7 + $0x10] sm:$0xf]  ;;  %v6993_v54 = vld [vmem:[%s9591_s7 + $0x34] sm:$0xf0] }
 0x222   :  { %v2861_v8 = vmax.f32 %v2860_v56, %v2636_v38  ;;  %v858_v56 = vadd.f32 %v8549_v5, %v822_v40  ;;  %1655 = vmatpush.bf16.msrb.mxu2 %v5789_v50  ;;  %v5765_v40 = vor.u32 %v7001_v28, %v5764_v21  ;;  %v6992_v45 = vld [vmem:[%s9591_s7 + $0x2c] sm:$0xf0]  ;;  %v6988_v50 = vld [vmem:[%s9591_s7 + $0x14] sm:$0xf] }
 0x223   :  { %v2378_v57 = vadd.f32 %v8309_v62, %v2104_v46  ;;  %v2379_v60 = vadd.f32 %v8317_v9, %v2105_v47  ;;  %v1508_v2 = vpop.f32.mrf.mxu0  ;;  %v5725_v47 = vor.u32 %v6992_v45, %v5724_v36  ;;  %v5729_v26 = vor.u32 %v6988_v50, %v5726_v1 }
 0x224   :  { %v2114_v6 = vmul.f32 %v8289_v51, %v1508_v2  ;;  %v781_v7 = vpop.f32.mrf.mxu1  ;;  %v890_v42 = vmax.f32 %v858_v56, 0.0  ;;  %1745 = vmatpush.bf16.msrb.mxu3 %v5761_v27  ;;  %v5733_v56 = vor.u32 %v6993_v54, %v5732_v52 }
 0x225   :  { %v2634_v12 = vmax.f32 %v2378_v57, 0.0  ;;  %v2635_v13 = vmax.f32 %v2379_v60, 0.0  ;;  %v823_v16 = vmul.f32 %v8562_v15, %v781_v7  ;;  %1833 = vmatpush.bf16.msra.mxu0 %v5797_v4 }
 0x226   :  { %v2388_v24 = vadd.f32 %v8299_v55, %v2114_v6  ;;  %1656 = vmatpush.bf16.msrb.mxu2 %v5757_v17 }
 0x227   :  { %v2819_v33 = vmax.f32 %v2818_v30, %v2634_v12  ;;  %v2840_v34 = vmax.f32 %v2839_v32, %v2635_v13  ;;  %v859_v38 = vadd.f32 %v8549_v5, %v823_v16 }
 0x228   :  { %v2644_v43 = vmax.f32 %v2388_v24, 0.0  ;;  %v1330_v44 = vpop.f32.mrf.mxu2  ;;  %v1419_v35 = vpop.f32.mrf.mxu3  ;;  %1746 = vmatpush.bf16.msrb.mxu3 %v5729_v26 }
 0x229   :  { %v891_v30 = vmax.f32 %v859_v38, 0.0  ;;  %v2112_v32 = vmul.f32 %v8303_v58, %v1330_v44  ;;  %v2113_v46 = vmul.f32 %v8306_v61, %v1419_v35  ;;  %1834 = vmatpush.bf16.msra.mxu0 %v5765_v40 }
 0x22a   :  { %v2862_v25 = vmax.f32 %v2861_v8, %v2644_v43  ;;  %1657 = vmatpush.bf16.msrb.mxu2 %v5725_v47 }
 0x22b   :  { %v8596_v57 = vpack.c.bf16 %v891_v30, %v890_v42  ;;  %v2386_v60 = vadd.f32 %v8309_v62, %v2112_v32  ;;  %v2387_v2 = vadd.f32 %v8317_v9, %v2113_v46  ;;  %v1511_v4 = vpop.f32.mrf.mxu0 }
 0x22c   :  { %v2122_v8 = vmul.f32 %v8289_v51, %v1511_v4  ;;  %v784_v6 = vpop.f32.mrf.mxu1 }
 0x22d   :  { %v2642_v7 = vmax.f32 %v2386_v60, 0.0  ;;  %v2643_v63 = vmax.f32 %v2387_v2, 0.0  ;;  %1372 = vmatmul.bf16.gmra.mxu2 %v8596_v57  ;;  %1461 = vmatmul.bf16.gmra.mxu3 %v8596_v57  ;;  %v824_v19 = vmul.f32 %v8562_v15, %v784_v6 }
 0x22e   :  { %v2396_v10 = vadd.f32 %v8299_v55, %v2122_v8  ;;  %1550 = vmatmul.bf16.gmra.mxu0 %v8596_v57 }
 0x22f   :  { %v2820_v11 = vmax.f32 %v2819_v33, %v2642_v7  ;;  %v2841_v12 = vmax.f32 %v2840_v34, %v2643_v63  ;;  %1604 = vmatmul.bf16.gmra.mxu1 %v8271_v41  ;;  %1835 = vmatpush.bf16.msra.mxu0 %v5733_v56  ;;  %v860_v42 = vadd.f32 %v8549_v5, %v824_v19  ;;  %v8624_v7 = vperm.slane %v8284_v48, 3  ;;  %v7029_v48 = vld [vmem:[%s9591_s7 + $0x15c] sm:$0xf] }
 0x230   :  { %v2652_v13 = vmax.f32 %v2396_v10, 0.0  ;;  %v1333_v16 = vpop.f32.mrf.mxu2  ;;  %v1422_v17 = vpop.f32.mrf.mxu3  ;;  %v5894_v19 = vld [vmem:[%s9591_s7 + $0x178] sm:$0xf0] }
 0x231   :  { %v2120_v21 = vmul.f32 %v8303_v58, %v1333_v16  ;;  %v2121_v24 = vmul.f32 %v8306_v61, %v1422_v17  ;;  %v892_v1 = vmax.f32 %v860_v42, 0.0 }
 0x232   :  { %v2863_v27 = vmax.f32 %v2862_v25, %v2652_v13  ;;  %v8632_v13 = vperm.slane %v8291_v53, 3 }
 0x233   :  { %v2394_v28 = vadd.f32 %v8309_v62, %v2120_v21  ;;  %v2395_v38 = vadd.f32 %v8317_v9, %v2121_v24  ;;  %v1513_v40 = vpop.f32.mrf.mxu0 }
 0x234   :  { %v2130_v33 = vmul.f32 %v8289_v51, %v1513_v40  ;;  %v787_v34 = vpop.f32.mrf.mxu1 }
 0x235   :  { %v2650_v43 = vmax.f32 %v2394_v28, 0.0  ;;  %v2651_v44 = vmax.f32 %v2395_v38, 0.0  ;;  %v825_v35 = vmul.f32 %v8562_v15, %v787_v34  ;;  %v5897_v28 = vor.u32 %v7029_v48, %v5894_v19 }
 0x236   :  { %v2404_v36 = vadd.f32 %v8299_v55, %v2130_v33 }
 0x237   :  { %v2821_v45 = vmax.f32 %v2820_v11, %v2650_v43  ;;  %v2842_v30 = vmax.f32 %v2841_v12, %v2651_v44  ;;  %v861_v32 = vadd.f32 %v8549_v5, %v825_v35  ;;  %1919 = vmatpush.bf16.msra.mxu1 %v5897_v28 }
 0x238   :  { %v2660_v46 = vmax.f32 %v2404_v36, 0.0  ;;  %v1335_v47 = vpop.f32.mrf.mxu2  ;;  %v1424_v50 = vpop.f32.mrf.mxu3 }
 0x239   :  { %v893_v25 = vmax.f32 %v861_v32, 0.0  ;;  %v2128_v26 = vmul.f32 %v8303_v58, %v1335_v47  ;;  %v2129_v52 = vmul.f32 %v8306_v61, %v1424_v50 }
 0x23a   :  { %v2864_v54 = vmax.f32 %v2863_v27, %v2660_v46 }
 0x23b   :  { %v8618_v60 = vpack.c.bf16 %v893_v25, %v892_v1  ;;  %v2402_v15 = vadd.f32 %v8309_v62, %v2128_v26  ;;  %v2403_v2 = vadd.f32 %v8317_v9, %v2129_v52  ;;  %v1516_v4 = vpop.f32.mrf.mxu0 }
 0x23c   :  { %v2138_v56 = vmul.f32 %v8289_v51, %v1516_v4  ;;  %v1570_v5 = vpop.f32.mrf.mxu1 }
 0x23d   :  { %v2658_v8 = vmax.f32 %v2402_v15, 0.0  ;;  %v2659_v6 = vmax.f32 %v2403_v2, 0.0  ;;  %1377 = vmatmul.bf16.gmra.mxu2 %v8618_v60  ;;  %1466 = vmatmul.bf16.gmra.mxu3 %v8618_v60  ;;  %v2027_v21 = vmul.f32 %v8624_v7, %v1570_v5 }
 0x23e   :  { %v2412_v63 = vadd.f32 %v8299_v55, %v2138_v56  ;;  %1555 = vmatmul.bf16.gmra.mxu0 %v8618_v60 }
 0x23f   :  { %v2822_v10 = vmax.f32 %v2821_v45, %v2658_v8  ;;  %v2843_v11 = vmax.f32 %v2842_v30, %v2659_v6  ;;  %1609 = vmatmul.bf16.gmra.mxu1 %v8286_v49  ;;  %v2301_v43 = vadd.f32 %v8632_v13, %v2027_v21 }
 0x240   :  { %v2668_v12 = vmax.f32 %v2412_v63, 0.0  ;;  %v1338_v16 = vpop.f32.mrf.mxu2  ;;  %v1427_v17 = vpop.f32.mrf.mxu3 }
 0x241   :  { %v2136_v24 = vmul.f32 %v8303_v58, %v1338_v16  ;;  %v2137_v27 = vmul.f32 %v8306_v61, %v1427_v17  ;;  %v2557_v25 = vmax.f32 %v2301_v43, 0.0 }
 0x242   :  { %v2865_v38 = vmax.f32 %v2864_v54, %v2668_v12 }
 0x243   :  { %v2410_v53 = vadd.f32 %v8309_v62, %v2136_v24  ;;  %v2411_v40 = vadd.f32 %v8317_v9, %v2137_v27  ;;  %v1518_v33 = vpop.f32.mrf.mxu0 }
 0x244   :  { %v2146_v34 = vmul.f32 %v8289_v51, %v1518_v33  ;;  %v1572_v42 = vpop.f32.mrf.mxu1 }
 0x245   :  { %v2666_v44 = vmax.f32 %v2410_v53, 0.0  ;;  %v2667_v35 = vmax.f32 %v2411_v40, 0.0  ;;  %v2035_v36 = vmul.f32 %v8624_v7, %v1572_v42 }
 0x246   :  { %v2420_v45 = vadd.f32 %v8299_v55, %v2146_v34 }
 0x247   :  { %v2823_v30 = vmax.f32 %v2822_v10, %v2666_v44  ;;  %v2844_v32 = vmax.f32 %v2843_v11, %v2667_v35  ;;  %v2309_v46 = vadd.f32 %v8632_v13, %v2035_v36 }
 0x248   :  { %v2676_v47 = vmax.f32 %v2420_v45, 0.0  ;;  %v1340_v50 = vpop.f32.mrf.mxu2  ;;  %v1429_v1 = vpop.f32.mrf.mxu3 }
 0x249   :  { %v2565_v26 = vmax.f32 %v2309_v46, 0.0  ;;  %v2144_v52 = vmul.f32 %v8303_v58, %v1340_v50  ;;  %v2145_v54 = vmul.f32 %v8306_v61, %v1429_v1 }
 0x24a   :  { %v8652_v15 = vmax.f32 %v2865_v38, %v2676_v47 }
 0x24b   :  { %v2873_v2 = vmax.f32 %v2557_v25, %v2565_v26  ;;  %v2418_v4 = vadd.f32 %v8309_v62, %v2144_v52  ;;  %v2419_v56 = vadd.f32 %v8317_v9, %v2145_v54  ;;  %v1521_v5 = vpop.f32.mrf.mxu0 }
 0x24c   :  { %v1575_v8 = vpop.f32.mrf.mxu1  ;;  %v2154_v17 = vmul.f32 %v8289_v51, %v1521_v5 }
 0x24d   :  { %v2674_v6 = vmax.f32 %v2418_v4, 0.0  ;;  %v2675_v63 = vmax.f32 %v2419_v56, 0.0  ;;  %v2043_v10 = vmul.f32 %v8624_v7, %v1575_v8  ;;  %1658 = vmatmul.bf16.vlgmr.msrb.gmra.mxu2 %v8137_v20  ;;  %1747 = vmatmul.bf16.vlgmr.msrb.gmra.mxu3 %v8137_v20 }
 0x24e   :  { %1836 = vmatmul.bf16.vlgmr.msra.gmra.mxu0 %v8137_v20  ;;  %v2428_v33 = vadd.f32 %v8299_v55, %v2154_v17 }
 0x24f   :  { %v2824_v11 = vmax.f32 %v2823_v30, %v2674_v6  ;;  %v2845_v12 = vmax.f32 %v2844_v32, %v2675_v63  ;;  %v2317_v16 = vadd.f32 %v8632_v13, %v2043_v10  ;;  %1614 = vmatmul.bf16.gmra.mxu1 %v8326_v29 }
 0x250   :  { %v1343_v48 = vpop.f32.mrf.mxu2  ;;  %v1432_v19 = vpop.f32.mrf.mxu3  ;;  %v2684_v50 = vmax.f32 %v2428_v33, 0.0 }
 0x251   :  { %v2825_v21 = vrot.slane %v2824_v11, 4  ;;  %v2846_v24 = vrot.slane %v2845_v12, 4  ;;  %v2573_v27 = vmax.f32 %v2317_v16, 0.0  ;;  %v2152_v34 = vmul.f32 %v8303_v58, %v1343_v48 }
 0x252   :  { %v2153_v45 = vmul.f32 %v8306_v61, %v1432_v19 }
 0x253   :  { %v2826_v28 = vmax.f32 %v2824_v11, %v2825_v21  ;;  %v2847_v38 = vmax.f32 %v2845_v12, %v2846_v24  ;;  %v2874_v53 = vmax.f32 %v2873_v2, %v2573_v27  ;;  %v1523_v40 = vpop.f32.mrf.mxu0  ;;  %v2426_v1 = vadd.f32 %v8309_v62, %v2152_v34 }
 0x254   :  { %v2162_v42 = vmul.f32 %v8289_v51, %v1523_v40  ;;  %v1577_v43 = vpop.f32.mrf.mxu1  ;;  %v2427_v5 = vadd.f32 %v8317_v9, %v2153_v45 }
 0x255   :  { %v2827_v44 = vrot.slane %v2826_v28, 2  ;;  %v2848_v35 = vrot.slane %v2847_v38, 2  ;;  %v2051_v36 = vmul.f32 %v8624_v7, %v1577_v43  ;;  %v2682_v16 = vmax.f32 %v2426_v1, 0.0  ;;  %v7021_v43 = vld [vmem:[%s9591_s7 + $0x11c] sm:$0xf] }
 0x256   :  { %v2436_v30 = vadd.f32 %v8299_v55, %v2162_v42 }
 0x257   :  { %v2828_v32 = vmax.f32 %v2826_v28, %v2827_v44  ;;  %v2849_v46 = vmax.f32 %v2847_v38, %v2848_v35  ;;  %v2325_v47 = vadd.f32 %v8632_v13, %v2051_v36  ;;  %v2683_v38 = vmax.f32 %v2427_v5, 0.0  ;;  %v5862_v44 = vld [vmem:[%s9591_s7 + $0x138] sm:$0xf0] }
 0x258   :  { %v2692_v25 = vmax.f32 %v2436_v30, 0.0  ;;  %v1345_v26 = vpop.f32.mrf.mxu2  ;;  %v1434_v52 = vpop.f32.mrf.mxu3 }
 0x259   :  { %v2829_v54 = vrot.slane %v2828_v32, 1  ;;  %v2850_v2 = vrot.slane %v2849_v46, 1  ;;  %v2581_v4 = vmax.f32 %v2325_v47, 0.0  ;;  %v2160_v56 = vmul.f32 %v8303_v58, %v1345_v26 }
 0x25a   :  { %v3020_v8 = vmax.f32 %v2684_v50, %v2692_v25  ;;  %v2161_v6 = vmul.f32 %v8306_v61, %v1434_v52 }
 0x25b   :  { %v2851_v63 = vmax.f32 %v2849_v46, %v2850_v2  ;;  %v2875_v10 = vmax.f32 %v2874_v53, %v2581_v4  ;;  %v2434_v11 = vadd.f32 %v8309_v62, %v2160_v56  ;;  %v1526_v12 = vpop.f32.mrf.mxu0  ;;  %v2830_v21 = vmax.f32 %v2828_v32, %v2829_v54 }
 0x25c   :  { %v2435_v17 = vadd.f32 %v8317_v9, %v2161_v6  ;;  %v2170_v48 = vmul.f32 %v8289_v51, %v1526_v12  ;;  %v1580_v19 = vpop.f32.mrf.mxu1  ;;  %v5865_v32 = vor.u32 %v7021_v43, %v5862_v44 }
 0x25d   :  { %v3164_v24 = vrot.slane %v2851_v63, 6  ;;  %v2690_v27 = vmax.f32 %v2434_v11, 0.0  ;;  %v2059_v28 = vmul.f32 %v8624_v7, %v1580_v19  ;;  %1663 = vmatmul.bf16.gmra.mxu2 %v8152_v39  ;;  %1752 = vmatmul.bf16.gmra.mxu3 %v8152_v39 }
 0x25e   :  { %v2691_v53 = vmax.f32 %v2435_v17, 0.0  ;;  %v2444_v40 = vadd.f32 %v8299_v55, %v2170_v48  ;;  %1841 = vmatmul.bf16.gmra.mxu0 %v8152_v39  ;;  %1920 = vmatpush.bf16.msra.mxu1 %v5865_v32 }
 0x25f   :  { %v8683_v33 = vsel %vm3176_vm3, %v2830_v21, %v3164_v24  ;;  %v2978_v34 = vmax.f32 %v2682_v16, %v2690_v27  ;;  %v2333_v42 = vadd.f32 %v8632_v13, %v2059_v28  ;;  %1619 = vmatmul.bf16.gmra.mxu1 %v8348_v23 }
 0x260   :  { %v2999_v35 = vmax.f32 %v2683_v38, %v2691_v53  ;;  %v2700_v36 = vmax.f32 %v2444_v40, 0.0  ;;  %v1348_v45 = vpop.f32.mrf.mxu2  ;;  %v1437_v30 = vpop.f32.mrf.mxu3 }
 0x261   :  { %v2589_v46 = vmax.f32 %v2333_v42, 0.0  ;;  %v2168_v47 = vmul.f32 %v8303_v58, %v1348_v45  ;;  %v2169_v50 = vmul.f32 %v8306_v61, %v1437_v30 }
 0x262   :  { %v3021_v1 = vmax.f32 %v3020_v8, %v2700_v36 }
 0x263   :  { %v2876_v25 = vmax.f32 %v2875_v10, %v2589_v46  ;;  %v2442_v26 = vadd.f32 %v8309_v62, %v2168_v47  ;;  %v2443_v52 = vadd.f32 %v8317_v9, %v2169_v50  ;;  %v1528_v54 = vpop.f32.mrf.mxu0 }
 0x264   :  { %v2178_v2 = vmul.f32 %v8289_v51, %v1528_v54  ;;  %v1582_v4 = vpop.f32.mrf.mxu1 }
 0x265   :  { %v2698_v56 = vmax.f32 %v2442_v26, 0.0  ;;  %v2699_v5 = vmax.f32 %v2443_v52, 0.0  ;;  %v2067_v6 = vmul.f32 %v8624_v7, %v1582_v4 }
 0x266   :  { %v2452_v63 = vadd.f32 %v8299_v55, %v2178_v2 }
 0x267   :  { %v2979_v11 = vmax.f32 %v2978_v34, %v2698_v56  ;;  %v3000_v12 = vmax.f32 %v2999_v35, %v2699_v5  ;;  %v2341_v8 = vadd.f32 %v8632_v13, %v2067_v6 }
 0x268   :  { %v2708_v16 = vmax.f32 %v2452_v63, 0.0  ;;  %v1350_v10 = vpop.f32.mrf.mxu2  ;;  %v1439_v17 = vpop.f32.mrf.mxu3 }
 0x269   :  { %v2597_v48 = vmax.f32 %v2341_v8, 0.0  ;;  %v2176_v19 = vmul.f32 %v8303_v58, %v1350_v10  ;;  %v2177_v21 = vmul.f32 %v8306_v61, %v1439_v17 }
 0x26a   :  { %v3022_v24 = vmax.f32 %v3021_v1, %v2708_v16 }
 0x26b   :  { %v2877_v27 = vmax.f32 %v2876_v25, %v2597_v48  ;;  %v2450_v28 = vadd.f32 %v8309_v62, %v2176_v19  ;;  %v2451_v38 = vadd.f32 %v8317_v9, %v2177_v21  ;;  %v1531_v53 = vpop.f32.mrf.mxu0 }
 0x26c   :  { %v2186_v40 = vmul.f32 %v8289_v51, %v1531_v53  ;;  %v1585_v34 = vpop.f32.mrf.mxu1 }
 0x26d   :  { %v2706_v42 = vmax.f32 %v2450_v28, 0.0  ;;  %v2707_v43 = vmax.f32 %v2451_v38, 0.0  ;;  %v2075_v44 = vmul.f32 %v8624_v7, %v1585_v34  ;;  %1668 = vmatmul.bf16.gmra.mxu2 %v8173_v59  ;;  %1757 = vmatmul.bf16.gmra.mxu3 %v8173_v59 }
 0x26e   :  { %v2460_v35 = vadd.f32 %v8299_v55, %v2186_v40  ;;  %1846 = vmatmul.bf16.gmra.mxu0 %v8173_v59 }
 0x26f   :  { %v2980_v36 = vmax.f32 %v2979_v11, %v2706_v42  ;;  %v3001_v45 = vmax.f32 %v3000_v12, %v2707_v43  ;;  %v2349_v30 = vadd.f32 %v8632_v13, %v2075_v44  ;;  %1624 = vmatmul.bf16.gmra.mxu1 %v8376_v18 }
 0x270   :  { %v2716_v32 = vmax.f32 %v2460_v35, 0.0  ;;  %v1353_v46 = vpop.f32.mrf.mxu2  ;;  %v1442_v47 = vpop.f32.mrf.mxu3 }
 0x271   :  { %v2605_v50 = vmax.f32 %v2349_v30, 0.0  ;;  %v2184_v1 = vmul.f32 %v8303_v58, %v1353_v46  ;;  %v2185_v25 = vmul.f32 %v8306_v61, %v1442_v47  ;;  %v7013_v47 = vld [vmem:[%s9591_s7 + $0xdc] sm:$0xf] }
 0x272   :  { %v3023_v26 = vmax.f32 %v3022_v24, %v2716_v32 }
 0x273   :  { %v2878_v52 = vmax.f32 %v2877_v27, %v2605_v50  ;;  %v2458_v54 = vadd.f32 %v8309_v62, %v2184_v1  ;;  %v2459_v2 = vadd.f32 %v8317_v9, %v2185_v25  ;;  %v1533_v4 = vpop.f32.mrf.mxu0  ;;  %v5830_v50 = vld [vmem:[%s9591_s7 + $0xf8] sm:$0xf0] }
 0x274   :  { %v2194_v56 = vmul.f32 %v8289_v51, %v1533_v4  ;;  %v1587_v5 = vpop.f32.mrf.mxu1 }
 0x275   :  { %v2714_v6 = vmax.f32 %v2458_v54, 0.0  ;;  %v2715_v63 = vmax.f32 %v2459_v2, 0.0  ;;  %v2083_v11 = vmul.f32 %v8624_v7, %v1587_v5 }
 0x276   :  { %v2468_v12 = vadd.f32 %v8299_v55, %v2194_v56 }
 0x277   :  { %v2981_v8 = vmax.f32 %v2980_v36, %v2714_v6  ;;  %v3002_v16 = vmax.f32 %v3001_v45, %v2715_v63  ;;  %v2357_v10 = vadd.f32 %v8632_v13, %v2083_v11 }
 0x278   :  { %v2724_v17 = vmax.f32 %v2468_v12, 0.0  ;;  %v1355_v48 = vpop.f32.mrf.mxu2  ;;  %v1444_v19 = vpop.f32.mrf.mxu3 }
 0x279   :  { %v2613_v21 = vmax.f32 %v2357_v10, 0.0  ;;  %v2192_v24 = vmul.f32 %v8303_v58, %v1355_v48  ;;  %v2193_v27 = vmul.f32 %v8306_v61, %v1444_v19 }
 0x27a   :  { %v3024_v28 = vmax.f32 %v3023_v26, %v2724_v17 }
 0x27b   :  { %v2879_v38 = vmax.f32 %v2878_v52, %v2613_v21  ;;  %v2466_v53 = vadd.f32 %v8309_v62, %v2192_v24  ;;  %v2467_v40 = vadd.f32 %v8317_v9, %v2193_v27  ;;  %v1536_v34 = vpop.f32.mrf.mxu0  ;;  %v5833_v52 = vor.u32 %v7013_v47, %v5830_v50 }
 0x27c   :  { %v2202_v42 = vmul.f32 %v8289_v51, %v1536_v34  ;;  %v1590_v43 = vpop.f32.mrf.mxu1 }
 0x27d   :  { %v2722_v44 = vmax.f32 %v2466_v53, 0.0  ;;  %v2723_v35 = vmax.f32 %v2467_v40, 0.0  ;;  %v2091_v36 = vmul.f32 %v8624_v7, %v1590_v43  ;;  %1673 = vmatmul.bf16.gmra.mxu2 %v8188_v14  ;;  %1762 = vmatmul.bf16.gmra.mxu3 %v8188_v14 }
 0x27e   :  { %v2476_v45 = vadd.f32 %v8299_v55, %v2202_v42  ;;  %1851 = vmatmul.bf16.gmra.mxu0 %v8188_v14  ;;  %1921 = vmatpush.bf16.msra.mxu1 %v5833_v52 }
 0x27f   :  { %v2982_v30 = vmax.f32 %v2981_v8, %v2722_v44  ;;  %v3003_v32 = vmax.f32 %v3002_v16, %v2723_v35  ;;  %v2365_v46 = vadd.f32 %v8632_v13, %v2091_v36  ;;  %1629 = vmatmul.bf16.gmra.mxu1 %v8416_v31 }
 0x280   :  { %v2732_v1 = vmax.f32 %v2476_v45, 0.0  ;;  %v1358_v25 = vpop.f32.mrf.mxu2  ;;  %v1447_v26 = vpop.f32.mrf.mxu3 }
 0x281   :  { %v2621_v54 = vmax.f32 %v2365_v46, 0.0  ;;  %v2200_v2 = vmul.f32 %v8303_v58, %v1358_v25  ;;  %v2201_v4 = vmul.f32 %v8306_v61, %v1447_v26 }
 0x282   :  { %v3025_v56 = vmax.f32 %v3024_v28, %v2732_v1 }
 0x283   :  { %v2880_v5 = vmax.f32 %v2879_v38, %v2621_v54  ;;  %v2474_v6 = vadd.f32 %v8309_v62, %v2200_v2  ;;  %v2475_v63 = vadd.f32 %v8317_v9, %v2201_v4  ;;  %v1538_v11 = vpop.f32.mrf.mxu0 }
 0x284   :  { %v2210_v12 = vmul.f32 %v8289_v51, %v1538_v11  ;;  %v1592_v8 = vpop.f32.mrf.mxu1  ;;  %v5798_v11 = vld [vmem:[%s9591_s7 + $0xb8] sm:$0xf0] }
 0x285   :  { %v2730_v16 = vmax.f32 %v2474_v6, 0.0  ;;  %v2731_v10 = vmax.f32 %v2475_v63, 0.0  ;;  %v2099_v17 = vmul.f32 %v8624_v7, %v1592_v8  ;;  %v7005_v63 = vld [vmem:[%s9591_s7 + $0x9c] sm:$0xf] }
 0x286   :  { %v2484_v48 = vadd.f32 %v8299_v55, %v2210_v12 }
 0x287   :  { %v2983_v19 = vmax.f32 %v2982_v30, %v2730_v16  ;;  %v3004_v21 = vmax.f32 %v3003_v32, %v2731_v10  ;;  %v2373_v24 = vadd.f32 %v8632_v13, %v2099_v17  ;;  %v5801_v17 = vor.u32 %v7005_v63, %v5798_v11 }
 0x288   :  { %v2740_v27 = vmax.f32 %v2484_v48, 0.0  ;;  %v1360_v28 = vpop.f32.mrf.mxu2  ;;  %v1449_v38 = vpop.f32.mrf.mxu3 }
 0x289   :  { %v2629_v53 = vmax.f32 %v2373_v24, 0.0  ;;  %v2208_v40 = vmul.f32 %v8303_v58, %v1360_v28  ;;  %v2209_v34 = vmul.f32 %v8306_v61, %v1449_v38  ;;  %1922 = vmatpush.bf16.msra.mxu1 %v5801_v17  ;;  %v6997_v38 = vld [vmem:[%s9591_s7 + $0x5c] sm:$0xf] }
 0x28a   :  { %v3026_v42 = vmax.f32 %v3025_v56, %v2740_v27 }
 0x28b   :  { %v2881_v43 = vmax.f32 %v2880_v5, %v2629_v53  ;;  %v2482_v44 = vadd.f32 %v8309_v62, %v2208_v40  ;;  %v2483_v35 = vadd.f32 %v8317_v9, %v2209_v34  ;;  %v1541_v36 = vpop.f32.mrf.mxu0  ;;  %v5766_v53 = vld [vmem:[%s9591_s7 + $0x78] sm:$0xf0] }
 0x28c   :  { %v2218_v45 = vmul.f32 %v8289_v51, %v1541_v36  ;;  %v1595_v30 = vpop.f32.mrf.mxu1 }
 0x28d   :  { %v2738_v32 = vmax.f32 %v2482_v44, 0.0  ;;  %v2739_v46 = vmax.f32 %v2483_v35, 0.0  ;;  %v2107_v47 = vmul.f32 %v8624_v7, %v1595_v30  ;;  %1678 = vmatmul.bf16.gmra.mxu2 %v8209_v37  ;;  %1767 = vmatmul.bf16.gmra.mxu3 %v8209_v37 }
 0x28e   :  { %v2492_v50 = vadd.f32 %v8299_v55, %v2218_v45  ;;  %1856 = vmatmul.bf16.gmra.mxu0 %v8209_v37 }
 0x28f   :  { %v2984_v1 = vmax.f32 %v2983_v19, %v2738_v32  ;;  %v3005_v25 = vmax.f32 %v3004_v21, %v2739_v46  ;;  %v2381_v26 = vadd.f32 %v8632_v13, %v2107_v47  ;;  %1634 = vmatmul.bf16.gmra.mxu1 %v8492_v3  ;;  %v6989_v47 = vld [vmem:[%s9591_s7 + $0x1c] sm:$0xf] }
 0x290   :  { %v2748_v52 = vmax.f32 %v2492_v50, 0.0  ;;  %v1363_v54 = vpop.f32.mrf.mxu2  ;;  %v1452_v2 = vpop.f32.mrf.mxu3  ;;  %v5734_v50 = vld [vmem:[%s9591_s7 + $0x38] sm:$0xf0] }
 0x291   :  { %v2637_v4 = vmax.f32 %v2381_v26, 0.0  ;;  %v2216_v56 = vmul.f32 %v8303_v58, %v1363_v54  ;;  %v2217_v5 = vmul.f32 %v8306_v61, %v1452_v2  ;;  %v5737_v54 = vor.u32 %v6989_v47, %v5734_v50 }
 0x292   :  { %v3027_v6 = vmax.f32 %v3026_v42, %v2748_v52 }
 0x293   :  { %v2882_v12 = vmax.f32 %v2881_v43, %v2637_v4  ;;  %v2490_v8 = vadd.f32 %v8309_v62, %v2216_v56  ;;  %v2491_v16 = vadd.f32 %v8317_v9, %v2217_v5  ;;  %v1543_v10 = vpop.f32.mrf.mxu0  ;;  %v5769_v43 = vor.u32 %v6997_v38, %v5766_v53 }
 0x294   :  { %v2226_v48 = vmul.f32 %v8289_v51, %v1543_v10  ;;  %v1597_v19 = vpop.f32.mrf.mxu1 }
 0x295   :  { %v2746_v21 = vmax.f32 %v2490_v8, 0.0  ;;  %v2747_v24 = vmax.f32 %v2491_v16, 0.0  ;;  %v2115_v27 = vmul.f32 %v8624_v7, %v1597_v19  ;;  %1923 = vmatpush.bf16.msra.mxu1 %v5769_v43 }
 0x296   :  { %v2500_v28 = vadd.f32 %v8299_v55, %v2226_v48 }
 0x297   :  { %v2985_v40 = vmax.f32 %v2984_v1, %v2746_v21  ;;  %v3006_v34 = vmax.f32 %v3005_v25, %v2747_v24  ;;  %v2389_v42 = vadd.f32 %v8632_v13, %v2115_v27 }
 0x298   :  { %v2756_v44 = vmax.f32 %v2500_v28, 0.0  ;;  %v1365_v35 = vpop.f32.mrf.mxu2  ;;  %v1454_v36 = vpop.f32.mrf.mxu3 }
 0x299   :  { %v2645_v45 = vmax.f32 %v2389_v42, 0.0  ;;  %v2224_v30 = vmul.f32 %v8303_v58, %v1365_v35  ;;  %v2225_v32 = vmul.f32 %v8306_v61, %v1454_v36  ;;  %1924 = vmatpush.bf16.msra.mxu1 %v5737_v54 }
 0x29a   :  { %v3028_v46 = vmax.f32 %v3027_v6, %v2756_v44 }
 0x29b   :  { %v2883_v1 = vmax.f32 %v2882_v12, %v2645_v45  ;;  %v2498_v25 = vadd.f32 %v8309_v62, %v2224_v30  ;;  %v2499_v26 = vadd.f32 %v8317_v9, %v2225_v32  ;;  %v1546_v52 = vpop.f32.mrf.mxu0 }
 0x29c   :  { %v2234_v2 = vmul.f32 %v8289_v51, %v1546_v52  ;;  %v1600_v4 = vpop.f32.mrf.mxu1 }
 0x29d   :  { %v2754_v56 = vmax.f32 %v2498_v25, 0.0  ;;  %v2755_v5 = vmax.f32 %v2499_v26, 0.0  ;;  %v2123_v6 = vmul.f32 %v8624_v7, %v1600_v4  ;;  %1683 = vmatmul.bf16.gmra.mxu2 %v8242_v0  ;;  %1772 = vmatmul.bf16.gmra.mxu3 %v8242_v0 }
 0x29e   :  { %v2508_v63 = vadd.f32 %v8299_v55, %v2234_v2  ;;  %1861 = vmatmul.bf16.gmra.mxu0 %v8242_v0 }
 0x29f   :  { %v2986_v11 = vmax.f32 %v2985_v40, %v2754_v56  ;;  %v3007_v12 = vmax.f32 %v3006_v34, %v2755_v5  ;;  %v2397_v8 = vadd.f32 %v8632_v13, %v2123_v6  ;;  %1639 = vmatmul.bf16.gmra.mxu1 %v8596_v57 }
 0x2a0   :  { %v2764_v16 = vmax.f32 %v2508_v63, 0.0  ;;  %v1368_v10 = vpop.f32.mrf.mxu2  ;;  %v1457_v17 = vpop.f32.mrf.mxu3 }
 0x2a1   :  { %v2653_v48 = vmax.f32 %v2397_v8, 0.0  ;;  %v2232_v19 = vmul.f32 %v8303_v58, %v1368_v10  ;;  %v2233_v21 = vmul.f32 %v8306_v61, %v1457_v17 }
 0x2a2   :  { %v3029_v24 = vmax.f32 %v3028_v46, %v2764_v16 }
 0x2a3   :  { %v2884_v27 = vmax.f32 %v2883_v1, %v2653_v48  ;;  %v2506_v28 = vadd.f32 %v8309_v62, %v2232_v19  ;;  %v2507_v38 = vadd.f32 %v8317_v9, %v2233_v21  ;;  %v1548_v53 = vpop.f32.mrf.mxu0 }
 0x2a4   :  { %v2242_v40 = vmul.f32 %v8289_v51, %v1548_v53  ;;  %v1602_v34 = vpop.f32.mrf.mxu1 }
 0x2a5   :  { %v2762_v42 = vmax.f32 %v2506_v28, 0.0  ;;  %v2763_v43 = vmax.f32 %v2507_v38, 0.0  ;;  %v2131_v44 = vmul.f32 %v8624_v7, %v1602_v34 }
 0x2a6   :  { %v2516_v35 = vadd.f32 %v8299_v55, %v2242_v40 }
 0x2a7   :  { %v2987_v36 = vmax.f32 %v2986_v11, %v2762_v42  ;;  %v3008_v45 = vmax.f32 %v3007_v12, %v2763_v43  ;;  %v2405_v30 = vadd.f32 %v8632_v13, %v2131_v44  ;;  %v2867_v12 = vrot.slane %v8652_v15, 4 }
 0x2a8   :  { %v2772_v32 = vmax.f32 %v2516_v35, 0.0  ;;  %v1370_v46 = vpop.f32.mrf.mxu2  ;;  %v1459_v47 = vpop.f32.mrf.mxu3 }
 0x2a9   :  { %v2661_v50 = vmax.f32 %v2405_v30, 0.0  ;;  %v2240_v1 = vmul.f32 %v8303_v58, %v1370_v46  ;;  %v2241_v25 = vmul.f32 %v8306_v61, %v1459_v47  ;;  %v2868_v38 = vmax.f32 %v8652_v15, %v2867_v12 }
 0x2aa   :  { %v3030_v26 = vmax.f32 %v3029_v24, %v2772_v32 }
 0x2ab   :  { %v2885_v52 = vmax.f32 %v2884_v27, %v2661_v50  ;;  %v2514_v54 = vadd.f32 %v8309_v62, %v2240_v1  ;;  %v2515_v2 = vadd.f32 %v8317_v9, %v2241_v25  ;;  %v1551_v4 = vpop.f32.mrf.mxu0  ;;  %v2869_v32 = vrot.slane %v2868_v38, 2 }
 0x2ac   :  { %v2250_v56 = vmul.f32 %v8289_v51, %v1551_v4  ;;  %v1605_v5 = vpop.f32.mrf.mxu1 }
 0x2ad   :  { %v2770_v6 = vmax.f32 %v2514_v54, 0.0  ;;  %v2771_v63 = vmax.f32 %v2515_v2, 0.0  ;;  %v2139_v11 = vmul.f32 %v8624_v7, %v1605_v5  ;;  %1688 = vmatmul.bf16.gmra.mxu2 %v8257_v22  ;;  %1777 = vmatmul.bf16.gmra.mxu3 %v8257_v22  ;;  %v2870_v4 = vmax.f32 %v2868_v38, %v2869_v32 }
 0x2ae   :  { %v2524_v8 = vadd.f32 %v8299_v55, %v2250_v56  ;;  %1866 = vmatmul.bf16.gmra.mxu0 %v8257_v22 }
 0x2af   :  { %v2988_v16 = vmax.f32 %v2987_v36, %v2770_v6  ;;  %v3009_v10 = vmax.f32 %v3008_v45, %v2771_v63  ;;  %v2413_v17 = vadd.f32 %v8632_v13, %v2139_v11  ;;  %1644 = vmatmul.bf16.gmra.mxu1 %v8618_v60 }
 0x2b0   :  { %v2780_v48 = vmax.f32 %v2524_v8, 0.0  ;;  %v1373_v19 = vpop.f32.mrf.mxu2  ;;  %v1462_v21 = vpop.f32.mrf.mxu3 }
 0x2b1   :  { %v2669_v24 = vmax.f32 %v2413_v17, 0.0  ;;  %v2248_v27 = vmul.f32 %v8303_v58, %v1373_v19  ;;  %v2249_v28 = vmul.f32 %v8306_v61, %v1462_v21 }
 0x2b2   :  { %v3031_v53 = vmax.f32 %v3030_v26, %v2780_v48  ;;  %v2871_v48 = vrot.slane %v2870_v4, 1 }
 0x2b3   :  { %v2886_v40 = vmax.f32 %v2885_v52, %v2669_v24  ;;  %v2522_v34 = vadd.f32 %v8309_v62, %v2248_v27  ;;  %v2523_v42 = vadd.f32 %v8317_v9, %v2249_v28  ;;  %v1553_v43 = vpop.f32.mrf.mxu0 }
 0x2b4   :  { %v2258_v44 = vmul.f32 %v8289_v51, %v1553_v43  ;;  %v1607_v35 = vpop.f32.mrf.mxu1 }
 0x2b5   :  { %v2778_v36 = vmax.f32 %v2522_v34, 0.0  ;;  %v2779_v45 = vmax.f32 %v2523_v42, 0.0  ;;  %v2147_v30 = vmul.f32 %v8624_v7, %v1607_v35 }
 0x2b6   :  { %v2532_v46 = vadd.f32 %v8299_v55, %v2258_v44  ;;  %v2872_v44 = vmax.f32 %v2870_v4, %v2871_v48 }
 0x2b7   :  { %v2989_v47 = vmax.f32 %v2988_v16, %v2778_v36  ;;  %v3010_v50 = vmax.f32 %v3009_v10, %v2779_v45  ;;  %v2421_v15 = vadd.f32 %v8632_v13, %v2147_v30 }
 0x2b8   :  { %v2788_v1 = vmax.f32 %v2532_v46, 0.0  ;;  %v1375_v25 = vpop.f32.mrf.mxu2  ;;  %v1464_v26 = vpop.f32.mrf.mxu3 }
 0x2b9   :  { %v2677_v52 = vmax.f32 %v2421_v15, 0.0  ;;  %v2256_v54 = vmul.f32 %v8303_v58, %v1375_v25  ;;  %v2257_v2 = vmul.f32 %v8306_v61, %v1464_v26  ;;  %v3165_v26 = vrot.slane %v2872_v44, 4 }
 0x2ba   :  { %v3032_v56 = vmax.f32 %v3031_v53, %v2788_v1 }
 0x2bb   :  { %v2887_v5 = vmax.f32 %v2886_v40, %v2677_v52  ;;  %v2530_v6 = vadd.f32 %v8309_v62, %v2256_v54  ;;  %v2531_v63 = vadd.f32 %v8317_v9, %v2257_v2  ;;  %v1556_v11 = vpop.f32.mrf.mxu0 }
 0x2bc   :  { %v2266_v12 = vmul.f32 %v8289_v51, %v1556_v11  ;;  %v1610_v8 = vpop.f32.mrf.mxu1 }
 0x2bd   :  { %v2888_v16 = vrot.slane %v2887_v5, 4  ;;  %v2786_v10 = vmax.f32 %v2530_v6, 0.0  ;;  %v2787_v17 = vmax.f32 %v2531_v63, 0.0  ;;  %1693 = vmatmul.bf16.gmra.mxu2 %v8271_v41  ;;  %1782 = vmatmul.bf16.gmra.mxu3 %v8271_v41  ;;  %v2155_v38 = vmul.f32 %v8624_v7, %v1610_v8 }
 0x2be   :  { %v2540_v19 = vadd.f32 %v8299_v55, %v2266_v12  ;;  %1871 = vmatmul.bf16.gmra.mxu0 %v8271_v41 }
 0x2bf   :  { %v2889_v21 = vmax.f32 %v2887_v5, %v2888_v16  ;;  %v2990_v24 = vmax.f32 %v2989_v47, %v2786_v10  ;;  %v3011_v27 = vmax.f32 %v3010_v50, %v2787_v17  ;;  %1925 = vmatmul.bf16.vlgmr.msra.gmra.mxu1 %v8137_v20  ;;  %v2429_v20 = vadd.f32 %v8632_v13, %v2155_v38 }
 0x2c0   :  { %v2796_v28 = vmax.f32 %v2540_v19, 0.0  ;;  %v1378_v53 = vpop.f32.mrf.mxu2  ;;  %v1467_v40 = vpop.f32.mrf.mxu3 }
 0x2c1   :  { %v2890_v34 = vrot.slane %v2889_v21, 2  ;;  %v2264_v42 = vmul.f32 %v8303_v58, %v1378_v53  ;;  %v2265_v43 = vmul.f32 %v8306_v61, %v1467_v40  ;;  %v2685_v5 = vmax.f32 %v2429_v20, 0.0 }
 0x2c2   :  { %v3033_v35 = vmax.f32 %v3032_v56, %v2796_v28 }
 0x2c3   :  { %v2891_v36 = vmax.f32 %v2889_v21, %v2890_v34  ;;  %v2538_v45 = vadd.f32 %v8309_v62, %v2264_v42  ;;  %v2539_v30 = vadd.f32 %v8317_v9, %v2265_v43  ;;  %v1558_v32 = vpop.f32.mrf.mxu0  ;;  %v8873_v34 = vld [vmem:[#allocation12] sm:$0xff] }
 0x2c4   :  { %v2274_v46 = vmul.f32 %v8289_v51, %v1558_v32  ;;  %v1612_v47 = vpop.f32.mrf.mxu1  ;;  %v8876_v42 = vperm.slane %v8873_v34, 6 }
 0x2c5   :  { %v2892_v50 = vrot.slane %v2891_v36, 1  ;;  %v2794_v15 = vmax.f32 %v2538_v45, 0.0  ;;  %v2795_v1 = vmax.f32 %v2539_v30, 0.0  ;;  %v2163_v25 = vmul.f32 %v8624_v7, %v1612_v47 }
 0x2c6   :  { %v2548_v52 = vadd.f32 %v8299_v55, %v2274_v46 }
 0x2c7   :  { %v2893_v54 = vmax.f32 %v2891_v36, %v2892_v50  ;;  %v2991_v2 = vmax.f32 %v2990_v24, %v2794_v15  ;;  %v3012_v4 = vmax.f32 %v3011_v27, %v2795_v1  ;;  %v2437_v56 = vadd.f32 %v8632_v13, %v2163_v25 }
 0x2c8   :  { %v2804_v6 = vmax.f32 %v2548_v52, 0.0  ;;  %v1380_v63 = vpop.f32.mrf.mxu2  ;;  %v1469_v51 = vpop.f32.mrf.mxu3  ;;  %v8887_v1 = vperm.slane %v8873_v34, 4 }
 0x2c9   :  { %v3166_v11 = vrot.slane %v2893_v54, 2  ;;  %v2693_v12 = vmax.f32 %v2437_v56, 0.0  ;;  %v2272_v8 = vmul.f32 %v8303_v58, %v1380_v63  ;;  %v2273_v16 = vmul.f32 %v8306_v61, %v1469_v51  ;;  %v8861_v58 = vld [vmem:[%s9592_s8] sm:$0xff] }
 0x2ca   :  { %v8849_v10 = vmax.f32 %v3033_v35, %v2804_v6  ;;  %v8864_v61 = vperm.slane %v8861_v58, 6  ;;  %v8879_v44 = vperm.slane %v8861_v58, 4  ;;  %v8882_v32 = vperm.slane %v8861_v58, 5 }
 0x2cb   :  { %v3179_v55 = vsel %vm3178_vm4, %v3165_v26, %v3166_v11  ;;  %v3041_v17 = vmax.f32 %v2685_v5, %v2693_v12  ;;  %v2546_v48 = vadd.f32 %v8309_v62, %v2272_v8  ;;  %v2547_v19 = vadd.f32 %v8317_v9, %v2273_v16  ;;  %v1837_v21 = vpop.f32.mrf.mxu0 }
 0x2cc   :  { %v8856_v24 = vsel %vm3180_vm5, %v8683_v33, %v3179_v55  ;;  %v1615_v27 = vpop.f32.mrf.mxu1  ;;  %v2030_v40 = vmul.f32 %v8864_v61, %v1837_v21  ;;  %v8893_v56 = vperm.slane %v8873_v34, 5 }
 0x2cd   :  { %v2802_v28 = vmax.f32 %v2546_v48, 0.0  ;;  %v2803_v38 = vmax.f32 %v2547_v19, 0.0  ;;  %v2171_v62 = vmul.f32 %v8624_v7, %v1615_v27  ;;  %1698 = vmatmul.bf16.gmra.mxu2 %v8286_v49  ;;  %1787 = vmatmul.bf16.gmra.mxu3 %v8286_v49 }
 0x2ce   :  { %1876 = vmatmul.bf16.gmra.mxu0 %v8286_v49  ;;  %v2304_v50 = vadd.f32 %v8876_v42, %v2030_v40 }
 0x2cf   :  { %v2992_v9 = vmax.f32 %v2991_v2, %v2802_v28  ;;  %v3013_v33 = vmax.f32 %v3012_v4, %v2803_v38  ;;  %v2445_v53 = vadd.f32 %v8632_v13, %v2171_v62  ;;  %1930 = vmatmul.bf16.gmra.mxu1 %v8152_v39 }
 0x2d0   :  { %v1659_v43 = vpop.f32.mrf.mxu2  ;;  %v1748_v35 = vpop.f32.mrf.mxu3  ;;  %v2560_v11 = vmax.f32 %v2304_v50, 0.0 }
 0x2d1   :  { %v2993_v36 = vrot.slane %v2992_v9, 4  ;;  %v3014_v45 = vrot.slane %v3013_v33, 4  ;;  %v2701_v30 = vmax.f32 %v2445_v53, 0.0  ;;  %v2028_v15 = vmul.f32 %v8879_v44, %v1659_v43 }
 0x2d2   :  { %v2029_v4 = vmul.f32 %v8882_v32, %v1748_v35 }
 0x2d3   :  { %v2994_v20 = vmax.f32 %v2992_v9, %v2993_v36  ;;  %v3015_v39 = vmax.f32 %v3013_v33, %v3014_v45  ;;  %v3042_v46 = vmax.f32 %v3041_v17, %v2701_v30  ;;  %v1839_v47 = vpop.f32.mrf.mxu0  ;;  %v2302_v12 = vadd.f32 %v8887_v1, %v2028_v15 }
 0x2d4   :  { %v2038_v25 = vmul.f32 %v8864_v61, %v1839_v47  ;;  %v1617_v26 = vpop.f32.mrf.mxu1  ;;  %v2303_v27 = vadd.f32 %v8893_v56, %v2029_v4 }
 0x2d5   :  { %v2995_v52 = vrot.slane %v2994_v20, 2  ;;  %v3016_v54 = vrot.slane %v3015_v39, 2  ;;  %v2179_v2 = vmul.f32 %v8624_v7, %v1617_v26  ;;  %v2558_v40 = vmax.f32 %v2302_v12, 0.0 }
 0x2d6   :  { %v2312_v5 = vadd.f32 %v8876_v42, %v2038_v25  ;;  %v2559_v47 = vmax.f32 %v2303_v27, 0.0 }
 0x2d7   :  { %v2996_v6 = vmax.f32 %v2994_v20, %v2995_v52  ;;  %v3017_v63 = vmax.f32 %v3015_v39, %v3016_v54  ;;  %v2453_v51 = vadd.f32 %v8632_v13, %v2179_v2 }
 0x2d8   :  { %v2568_v8 = vmax.f32 %v2312_v5, 0.0  ;;  %v1661_v16 = vpop.f32.mrf.mxu2  ;;  %v1750_v55 = vpop.f32.mrf.mxu3 }
 0x2d9   :  { %v2997_v17 = vrot.slane %v2996_v6, 1  ;;  %v3018_v48 = vrot.slane %v3017_v63, 1  ;;  %v2709_v19 = vmax.f32 %v2453_v51, 0.0  ;;  %v2036_v21 = vmul.f32 %v8879_v44, %v1661_v16 }
 0x2da   :  { %v2936_v28 = vmax.f32 %v2560_v11, %v2568_v8  ;;  %v2037_v38 = vmul.f32 %v8882_v32, %v1750_v55 }
 0x2db   :  { %v3019_v62 = vmax.f32 %v3017_v63, %v3018_v48  ;;  %v3043_v9 = vmax.f32 %v3042_v46, %v2709_v19  ;;  %v2310_v33 = vadd.f32 %v8887_v1, %v2036_v21  ;;  %v1842_v53 = vpop.f32.mrf.mxu0  ;;  %v2998_v45 = vmax.f32 %v2996_v6, %v2997_v17 }
 0x2dc   :  { %v2311_v43 = vadd.f32 %v8893_v56, %v2037_v38  ;;  %v2046_v35 = vmul.f32 %v8864_v61, %v1842_v53  ;;  %v1620_v36 = vpop.f32.mrf.mxu1 }
 0x2dd   :  { %v3170_v30 = vrot.slane %v3019_v62, 6  ;;  %v2566_v20 = vmax.f32 %v2310_v33, 0.0  ;;  %v2187_v39 = vmul.f32 %v8624_v7, %v1620_v36  ;;  %1703 = vmatmul.bf16.gmra.mxu2 %v8326_v29  ;;  %1792 = vmatmul.bf16.gmra.mxu3 %v8326_v29 }
 0x2de   :  { %v2567_v46 = vmax.f32 %v2311_v43, 0.0  ;;  %v2320_v50 = vadd.f32 %v8876_v42, %v2046_v35  ;;  %1881 = vmatmul.bf16.gmra.mxu0 %v8326_v29 }
 0x2df   :  { %v8910_v15 = vsel %vm3176_vm3, %v2998_v45, %v3170_v30  ;;  %v2894_v25 = vmax.f32 %v2558_v40, %v2566_v20  ;;  %v2461_v26 = vadd.f32 %v8632_v13, %v2187_v39  ;;  %1935 = vmatmul.bf16.gmra.mxu1 %v8173_v59 }
 0x2e0   :  { %v2915_v52 = vmax.f32 %v2559_v47, %v2567_v46  ;;  %v2576_v54 = vmax.f32 %v2320_v50, 0.0  ;;  %v1664_v2 = vpop.f32.mrf.mxu2  ;;  %v1753_v4 = vpop.f32.mrf.mxu3 }
 0x2e1   :  { %v2717_v5 = vmax.f32 %v2461_v26, 0.0  ;;  %v2044_v6 = vmul.f32 %v8879_v44, %v1664_v2  ;;  %v2045_v63 = vmul.f32 %v8882_v32, %v1753_v4 }
 0x2e2   :  { %v2937_v51 = vmax.f32 %v2936_v28, %v2576_v54 }
 0x2e3   :  { %v8916_v11 = vmax.f32 %v3043_v9, %v2717_v5  ;;  %v2318_v12 = vadd.f32 %v8887_v1, %v2044_v6  ;;  %v2319_v8 = vadd.f32 %v8893_v56, %v2045_v63  ;;  %v1844_v16 = vpop.f32.mrf.mxu0 }
 0x2e4   :  { %v2054_v55 = vmul.f32 %v8864_v61, %v1844_v16  ;;  %v8921_v59 = vpop.f32.mrf.mxu1 }
 0x2e5   :  { %v2574_v17 = vmax.f32 %v2318_v12, 0.0  ;;  %v2575_v48 = vmax.f32 %v2319_v8, 0.0 }
 0x2e6   :  { %v2328_v19 = vadd.f32 %v8876_v42, %v2054_v55 }
 0x2e7   :  { %v2895_v21 = vmax.f32 %v2894_v25, %v2574_v17  ;;  %v2916_v27 = vmax.f32 %v2915_v52, %v2575_v48 }
 0x2e8   :  { %v2584_v38 = vmax.f32 %v2328_v19, 0.0  ;;  %v1666_v62 = vpop.f32.mrf.mxu2  ;;  %v1755_v28 = vpop.f32.mrf.mxu3 }
 0x2e9   :  { %v2052_v9 = vmul.f32 %v8879_v44, %v1666_v62  ;;  %v2053_v33 = vmul.f32 %v8882_v32, %v1755_v28 }
 0x2ea   :  { %v2938_v53 = vmax.f32 %v2937_v51, %v2584_v38 }
 0x2eb   :  { %v2326_v40 = vadd.f32 %v8887_v1, %v2052_v9  ;;  %v2327_v43 = vadd.f32 %v8893_v56, %v2053_v33  ;;  %v1847_v35 = vpop.f32.mrf.mxu0 }
 0x2ec   :  { %v2062_v36 = vmul.f32 %v8864_v61, %v1847_v35  ;;  %v8929_v45 = vpop.f32.mrf.mxu1 }
 0x2ed   :  { %v2582_v30 = vmax.f32 %v2326_v40, 0.0  ;;  %v2583_v20 = vmax.f32 %v2327_v43, 0.0  ;;  %1708 = vmatmul.bf16.gmra.mxu2 %v8348_v23  ;;  %1797 = vmatmul.bf16.gmra.mxu3 %v8348_v23 }
 0x2ee   :  { %v2336_v39 = vadd.f32 %v8876_v42, %v2062_v36  ;;  %1886 = vmatmul.bf16.gmra.mxu0 %v8348_v23 }
 0x2ef   :  { %v2896_v47 = vmax.f32 %v2895_v21, %v2582_v30  ;;  %v2917_v46 = vmax.f32 %v2916_v27, %v2583_v20  ;;  %1940 = vmatmul.bf16.gmra.mxu1 %v8188_v14 }
 0x2f0   :  { %v2592_v50 = vmax.f32 %v2336_v39, 0.0  ;;  %v1669_v25 = vpop.f32.mrf.mxu2  ;;  %v1758_v26 = vpop.f32.mrf.mxu3 }
 0x2f1   :  { %v2060_v52 = vmul.f32 %v8879_v44, %v1669_v25  ;;  %v2061_v54 = vmul.f32 %v8882_v32, %v1758_v26 }
 0x2f2   :  { %v2939_v2 = vmax.f32 %v2938_v53, %v2592_v50 }
 0x2f3   :  { %v2334_v4 = vadd.f32 %v8887_v1, %v2060_v52  ;;  %v2335_v5 = vadd.f32 %v8893_v56, %v2061_v54  ;;  %v1849_v6 = vpop.f32.mrf.mxu0 }
 0x2f4   :  { %v2070_v63 = vmul.f32 %v8864_v61, %v1849_v6  ;;  %v8941_v51 = vpop.f32.mrf.mxu1 }
 0x2f5   :  { %v2590_v12 = vmax.f32 %v2334_v4, 0.0  ;;  %v2591_v8 = vmax.f32 %v2335_v5, 0.0 }
 0x2f6   :  { %v2344_v14 = vadd.f32 %v8876_v42, %v2070_v63 }
 0x2f7   :  { %v2897_v16 = vmax.f32 %v2896_v47, %v2590_v12  ;;  %v2918_v55 = vmax.f32 %v2917_v46, %v2591_v8 }
 0x2f8   :  { %v2600_v17 = vmax.f32 %v2344_v14, 0.0  ;;  %v1671_v48 = vpop.f32.mrf.mxu2  ;;  %v1760_v19 = vpop.f32.mrf.mxu3 }
 0x2f9   :  { %v2068_v21 = vmul.f32 %v8879_v44, %v1671_v48  ;;  %v2069_v27 = vmul.f32 %v8882_v32, %v1760_v19 }
 0x2fa   :  { %v2940_v38 = vmax.f32 %v2939_v2, %v2600_v17 }
 0x2fb   :  { %v2342_v62 = vadd.f32 %v8887_v1, %v2068_v21  ;;  %v2343_v28 = vadd.f32 %v8893_v56, %v2069_v27  ;;  %v1852_v9 = vpop.f32.mrf.mxu0 }
 0x2fc   :  { %v2078_v33 = vmul.f32 %v8864_v61, %v1852_v9  ;;  %v8949_v53 = vpop.f32.mrf.mxu1 }
 0x2fd   :  { %v2598_v40 = vmax.f32 %v2342_v62, 0.0  ;;  %v2599_v43 = vmax.f32 %v2343_v28, 0.0  ;;  %1713 = vmatmul.bf16.gmra.mxu2 %v8376_v18  ;;  %1802 = vmatmul.bf16.gmra.mxu3 %v8376_v18 }
 0x2fe   :  { %v2352_v35 = vadd.f32 %v8876_v42, %v2078_v33  ;;  %1891 = vmatmul.bf16.gmra.mxu0 %v8376_v18 }
 0x2ff   :  { %v2898_v36 = vmax.f32 %v2897_v16, %v2598_v40  ;;  %v2919_v30 = vmax.f32 %v2918_v55, %v2599_v43  ;;  %1945 = vmatmul.bf16.gmra.mxu1 %v8209_v37 }
 0x300   :  { %v2608_v20 = vmax.f32 %v2352_v35, 0.0  ;;  %v1674_v39 = vpop.f32.mrf.mxu2  ;;  %v1763_v47 = vpop.f32.mrf.mxu3  ;;  %v6076_v35 = vld [vmem:[#allocation14 + $0xe0] sm:$0xf] }
 0x301   :  { %v2076_v46 = vmul.f32 %v8879_v44, %v1674_v39  ;;  %v2077_v50 = vmul.f32 %v8882_v32, %v1763_v47 }
 0x302   :  { %v2941_v25 = vmax.f32 %v2940_v38, %v2608_v20 }
 0x303   :  { %v2350_v26 = vadd.f32 %v8887_v1, %v2076_v46  ;;  %v2351_v52 = vadd.f32 %v8893_v56, %v2077_v50  ;;  %v1854_v54 = vpop.f32.mrf.mxu0  ;;  %v7112_v50 = vld [vmem:[#allocation14 + $0x1ec] sm:$0xf0] }
 0x304   :  { %v2086_v2 = vmul.f32 %v8864_v61, %v1854_v54  ;;  %v8961_v4 = vpop.f32.mrf.mxu1  ;;  %v2195_v54 = vmul.f32 %v8624_v7, %v8921_v59 }
 0x305   :  { %v2606_v5 = vmax.f32 %v2350_v26, 0.0  ;;  %v2607_v6 = vmax.f32 %v2351_v52, 0.0 }
 0x306   :  { %v2360_v37 = vadd.f32 %v8876_v42, %v2086_v2 }
 0x307   :  { %v2899_v63 = vmax.f32 %v2898_v36, %v2606_v5  ;;  %v2920_v12 = vmax.f32 %v2919_v30, %v2607_v6  ;;  %v7080_v36 = vld [vmem:[#allocation14 + $0xec] sm:$0xf0]  ;;  %v6204_v30 = vld [vmem:[#allocation14 + $0x1e0] sm:$0xf] }
 0x308   :  { %v2616_v8 = vmax.f32 %v2360_v37, 0.0  ;;  %v1676_v14 = vpop.f32.mrf.mxu2  ;;  %v1765_v16 = vpop.f32.mrf.mxu3  ;;  %v6077_v46 = vor.u32 %v7080_v36, %v6076_v35  ;;  %v6205_v52 = vor.u32 %v7112_v50, %v6204_v30  ;;  %v6060_v37 = vld [vmem:[#allocation14 + $0xc0] sm:$0xf]  ;;  %v3035_v50 = vrot.slane %v8849_v10, 4 }
 0x309   :  { %v2084_v55 = vmul.f32 %v8879_v44, %v1676_v14  ;;  %v2085_v17 = vmul.f32 %v8882_v32, %v1765_v16 }
 0x30a   :  { %v2942_v48 = vmax.f32 %v2941_v25, %v2616_v8  ;;  %4787 = vmatpush.bf16.msra.mxu2 %v6077_v46  ;;  %4800 = vmatpush.bf16.msra.mxu3 %v6205_v52  ;;  %v2203_v8 = vmul.f32 %v8624_v7, %v8929_v45  ;;  %v6044_v45 = vld [vmem:[#allocation14 + $0xa0] sm:$0xf] }
 0x30b   :  { %v2358_v19 = vadd.f32 %v8887_v1, %v2084_v55  ;;  %v2359_v21 = vadd.f32 %v8893_v56, %v2085_v17  ;;  %v1857_v27 = vpop.f32.mrf.mxu0  ;;  %v7108_v55 = vld [vmem:[#allocation14 + $0x1cc] sm:$0xf0] }
 0x30c   :  { %v2094_v38 = vmul.f32 %v8864_v61, %v1857_v27  ;;  %v8969_v62 = vpop.f32.mrf.mxu1  ;;  %v2211_v27 = vmul.f32 %v8624_v7, %v8941_v51  ;;  %v8997_v35 = vadd.f32 %v8632_v13, %v2203_v8  ;;  %v2219_v51 = vmul.f32 %v8624_v7, %v8949_v53  ;;  %v7100_v8 = vld [vmem:[#allocation14 + $0x18c] sm:$0xf0] }
 0x30d   :  { %v2614_v28 = vmax.f32 %v2358_v19, 0.0  ;;  %v2615_v9 = vmax.f32 %v2359_v21, 0.0  ;;  %1718 = vmatmul.bf16.gmra.mxu2 %v8416_v31  ;;  %1807 = vmatmul.bf16.gmra.mxu3 %v8416_v31  ;;  %v2469_v21 = vadd.f32 %v8632_v13, %v2195_v54  ;;  %v6028_v54 = vld [vmem:[#allocation14 + $0x80] sm:$0xf] }
 0x30e   :  { %v2368_v33 = vadd.f32 %v8876_v42, %v2094_v38  ;;  %1896 = vmatmul.bf16.gmra.mxu0 %v8416_v31 }
 0x30f   :  { %v2900_v40 = vmax.f32 %v2899_v63, %v2614_v28  ;;  %v2921_v43 = vmax.f32 %v2920_v12, %v2615_v9  ;;  %1950 = vmatmul.bf16.gmra.mxu1 %v8242_v0  ;;  %v7076_v63 = vld [vmem:[#allocation14 + $0xcc] sm:$0xf0]  ;;  %v6188_v12 = vld [vmem:[#allocation14 + $0x1c0] sm:$0xf] }
 0x310   :  { %v2624_v20 = vmax.f32 %v2368_v33, 0.0  ;;  %v1679_v39 = vpop.f32.mrf.mxu2  ;;  %v1768_v47 = vpop.f32.mrf.mxu3  ;;  %v6061_v59 = vor.u32 %v7076_v63, %v6060_v37  ;;  %v6189_v19 = vor.u32 %v7108_v55, %v6188_v12  ;;  %v7072_v9 = vld [vmem:[#allocation14 + $0xac] sm:$0xf0]  ;;  %v6172_v33 = vld [vmem:[#allocation14 + $0x1a0] sm:$0xf]  ;;  %v9014_v55 = vadd.f32 %v8632_v13, %v2219_v51 }
 0x311   :  { %v2092_v25 = vmul.f32 %v8879_v44, %v1679_v39  ;;  %v2093_v26 = vmul.f32 %v8882_v32, %v1768_v47  ;;  %v6045_v39 = vor.u32 %v7072_v9, %v6044_v45  ;;  %v7104_v47 = vld [vmem:[#allocation14 + $0x1ac] sm:$0xf0] }
 0x312   :  { %v8980_v2 = vmax.f32 %v2942_v48, %v2624_v20  ;;  %4788 = vmatpush.bf16.msra.mxu2 %v6061_v59  ;;  %4801 = vmatpush.bf16.msra.mxu3 %v6189_v19  ;;  %v6173_v46 = vor.u32 %v7104_v47, %v6172_v33  ;;  %v2733_v59 = vmax.f32 %v8997_v35, 0.0  ;;  %v7081_v19 = vld [vmem:[#allocation14 + $0xf4] sm:$0xf0]  ;;  %v2235_v35 = vmul.f32 %v8624_v7, %v8969_v62 }
 0x313   :  { %v2366_v0 = vadd.f32 %v8887_v1, %v2092_v25  ;;  %v2367_v5 = vadd.f32 %v8893_v56, %v2093_v26  ;;  %v1859_v6 = vpop.f32.mrf.mxu0  ;;  %v2725_v25 = vmax.f32 %v2469_v21, 0.0  ;;  %v9006_v26 = vadd.f32 %v8632_v13, %v2211_v27 }
 0x314   :  { %v2102_v14 = vmul.f32 %v8864_v61, %v1859_v6  ;;  %v8987_v16 = vpop.f32.mrf.mxu1  ;;  %v2227_v27 = vmul.f32 %v8624_v7, %v8961_v4 }
 0x315   :  { %v2622_v17 = vmax.f32 %v2366_v0, 0.0  ;;  %v2623_v48 = vmax.f32 %v2367_v5, 0.0  ;;  %v7068_v0 = vld [vmem:[#allocation14 + $0x8c] sm:$0xf0]  ;;  %v6156_v5 = vld [vmem:[#allocation14 + $0x180] sm:$0xf]  ;;  %v3045_v33 = vmax.f32 %v8916_v11, %v2725_v25 }
 0x316   :  { %v2376_v36 = vadd.f32 %v8876_v42, %v2102_v14  ;;  %4789 = vmatpush.bf16.msra.mxu2 %v6045_v39  ;;  %4802 = vmatpush.bf16.msra.mxu3 %v6173_v46  ;;  %v6029_v12 = vor.u32 %v7068_v0, %v6028_v54  ;;  %v6084_v14 = vld [vmem:[#allocation14 + $0xe8] sm:$0xf]  ;;  %v2741_v21 = vmax.f32 %v9006_v26, 0.0  ;;  %v7096_v46 = vld [vmem:[#allocation14 + $0x16c] sm:$0xf0]  ;;  %v2749_v54 = vmax.f32 %v9014_v55, 0.0 }
 0x317   :  { %v8992_v38 = vmax.f32 %v2900_v40, %v2622_v17  ;;  %v8994_v28 = vmax.f32 %v2921_v43, %v2623_v48  ;;  %v6157_v48 = vor.u32 %v7100_v8, %v6156_v5  ;;  %v6085_v9 = vor.u32 %v7081_v19, %v6084_v14  ;;  %v6068_v26 = vld [vmem:[#allocation14 + $0xc8] sm:$0xf]  ;;  %v5996_v14 = vld [vmem:[#allocation14 + $0x40] sm:$0xf] }
 0x318   :  { %v1681_v30 = vpop.f32.mrf.mxu2  ;;  %v1770_v20 = vpop.f32.mrf.mxu3  ;;  %v2632_v6 = vmax.f32 %v2376_v36, 0.0  ;;  %v6012_v36 = vld [vmem:[#allocation14 + $0x60] sm:$0xf]  ;;  %v2501_v0 = vadd.f32 %v8632_v13, %v2227_v27  ;;  %v2243_v55 = vmul.f32 %v8624_v7, %v8987_v16 }
 0x319   :  { %v2100_v40 = vmul.f32 %v8879_v44, %v1681_v30  ;;  %v2101_v43 = vmul.f32 %v8882_v32, %v1770_v20  ;;  %v7064_v30 = vld [vmem:[#allocation14 + $0x6c] sm:$0xf0]  ;;  %v6140_v20 = vld [vmem:[#allocation14 + $0x160] sm:$0xf]  ;;  %4995 = vmatpush.bf16.msrb.mxu0 %v6085_v9 }
 0x31a   :  { %4790 = vmatpush.bf16.msra.mxu2 %v6029_v12  ;;  %4803 = vmatpush.bf16.msra.mxu3 %v6157_v48  ;;  %v2944_v39 = vmax.f32 %v8980_v2, %v2632_v6  ;;  %v3046_v6 = vmax.f32 %v3045_v33, %v2733_v59  ;;  %v6124_v48 = vld [vmem:[#allocation14 + $0x140] sm:$0xf]  ;;  %v7092_v9 = vld [vmem:[#allocation14 + $0x14c] sm:$0xf0]  ;;  %v6052_v33 = vld [vmem:[#allocation14 + $0xa8] sm:$0xf] }
 0x31b   :  { %v1862_v52 = vpop.f32.mrf.mxu0  ;;  %v2374_v53 = vadd.f32 %v8887_v1, %v2100_v40  ;;  %v2375_v17 = vadd.f32 %v8893_v56, %v2101_v43  ;;  %v6013_v43 = vor.u32 %v7064_v30, %v6012_v36 }
 0x31c   :  { %v2110_v37 = vmul.f32 %v8864_v61, %v1862_v52  ;;  %v9010_v63 = vpop.f32.mrf.mxu1  ;;  %v7077_v52 = vld [vmem:[#allocation14 + $0xd4] sm:$0xf0] }
 0x31d   :  { %1723 = vmatmul.bf16.gmra.mxu2 %v8492_v3  ;;  %1812 = vmatmul.bf16.gmra.mxu3 %v8492_v3  ;;  %v2630_v4 = vmax.f32 %v2374_v53, 0.0  ;;  %v2631_v11 = vmax.f32 %v2375_v17, 0.0  ;;  %v6069_v5 = vor.u32 %v7077_v52, %v6068_v26  ;;  %v9036_v53 = vadd.f32 %v8632_v13, %v2235_v35  ;;  %v7060_v17 = vld [vmem:[#allocation14 + $0x4c] sm:$0xf0]  ;;  %v7073_v35 = vld [vmem:[#allocation14 + $0xb4] sm:$0xf0] }
 0x31e   :  { %v2384_v45 = vadd.f32 %v8876_v42, %v2110_v37  ;;  %1901 = vmatmul.bf16.gmra.mxu0 %v8492_v3  ;;  %4791 = vmatpush.bf16.msra.mxu2 %v6013_v43  ;;  %v6053_v16 = vor.u32 %v7073_v35, %v6052_v33  ;;  %v7056_v26 = vld [vmem:[#allocation14 + $0x2c] sm:$0xf0] }
 0x31f   :  { %1955 = vmatmul.bf16.gmra.mxu1 %v8257_v22  ;;  %v6141_v22 = vor.u32 %v7096_v46, %v6140_v20  ;;  %v2902_v19 = vmax.f32 %v8992_v38, %v2630_v4  ;;  %4996 = vmatpush.bf16.msrb.mxu0 %v6069_v5  ;;  %v2923_v36 = vmax.f32 %v8994_v28, %v2631_v11  ;;  %v5980_v46 = vld [vmem:[#allocation14 + $0x20] sm:$0xf] }
 0x320   :  { %v2640_v47 = vmax.f32 %v2384_v45, 0.0  ;;  %v1684_v51 = vpop.f32.mrf.mxu2  ;;  %v1773_v40 = vpop.f32.mrf.mxu3  ;;  %v5997_v45 = vor.u32 %v7060_v17, %v5996_v14  ;;  %v2251_v38 = vmul.f32 %v8624_v7, %v9010_v63  ;;  %v6108_v28 = vld [vmem:[#allocation14 + $0x120] sm:$0xf]  ;;  %v5981_v52 = vor.u32 %v7056_v26, %v5980_v46  ;;  %v6036_v63 = vld [vmem:[#allocation14 + $0x88] sm:$0xf] }
 0x321   :  { %v2108_v25 = vmul.f32 %v8879_v44, %v1684_v51  ;;  %v2109_v62 = vmul.f32 %v8882_v32, %v1773_v40  ;;  %4804 = vmatpush.bf16.msra.mxu3 %v6141_v22  ;;  %v2757_v51 = vmax.f32 %v2501_v0, 0.0  ;;  %v7088_v0 = vld [vmem:[#allocation14 + $0x12c] sm:$0xf0] }
 0x322   :  { %v9033_v2 = vmax.f32 %v2944_v39, %v2640_v47  ;;  %v6125_v39 = vor.u32 %v7092_v9, %v6124_v48  ;;  %v3047_v47 = vmax.f32 %v3046_v6, %v2741_v21  ;;  %4792 = vmatpush.bf16.msra.mxu2 %v5997_v45  ;;  %v9054_v21 = vadd.f32 %v8632_v13, %v2243_v55  ;;  %v7176_v26 = vld [vmem:[#allocation14 + $0x3ec] sm:$0xf0] }
 0x323   :  { %v2382_v37 = vadd.f32 %v8887_v1, %v2108_v25  ;;  %v2383_v12 = vadd.f32 %v8893_v56, %v2109_v62  ;;  %v1864_v8 = vpop.f32.mrf.mxu0  ;;  %v2765_v25 = vmax.f32 %v9036_v53, 0.0  ;;  %4997 = vmatpush.bf16.msrb.mxu0 %v6053_v16  ;;  %v9060_v17 = vadd.f32 %v8632_v13, %v2251_v38 }
 0x324   :  { %v2118_v27 = vmul.f32 %v8864_v61, %v1864_v8  ;;  %v1642_v59 = vpop.f32.mrf.mxu1  ;;  %v3048_v11 = vmax.f32 %v3047_v47, %v2749_v54  ;;  %v7069_v8 = vld [vmem:[#allocation14 + $0x94] sm:$0xf0]  ;;  %v9068_v45 = vmax.f32 %v8849_v10, %v3035_v50  ;;  %v6460_v10 = vld [vmem:[#allocation14 + $0x3e0] sm:$0xf] }
 0x325   :  { %v2638_v30 = vmax.f32 %v2382_v37, 0.0  ;;  %v2639_v20 = vmax.f32 %v2383_v12, 0.0  ;;  %4805 = vmatpush.bf16.msra.mxu3 %v6125_v39  ;;  %v2259_v5 = vmul.f32 %v8624_v7, %v1642_v59  ;;  %v6109_v12 = vor.u32 %v7088_v0, %v6108_v28  ;;  %v6092_v59 = vld [vmem:[#allocation14 + $0x100] sm:$0xf]  ;;  %v7144_v39 = vld [vmem:[#allocation14 + $0x2ec] sm:$0xf0] }
 0x326   :  { %v2392_v40 = vadd.f32 %v8876_v42, %v2118_v27  ;;  %4793 = vmatpush.bf16.msra.mxu2 %v5981_v52  ;;  %v6037_v53 = vor.u32 %v7069_v8, %v6036_v63  ;;  %v3049_v14 = vmax.f32 %v3048_v11, %v2757_v51  ;;  %v7052_v27 = vld [vmem:[#allocation14 + $0xc] sm:$0xf0]  ;;  %v2773_v51 = vmax.f32 %v9054_v21, 0.0  ;;  %v6020_v28 = vld [vmem:[#allocation14 + $0x68] sm:$0xf] }
 0x327   :  { %v9048_v4 = vmax.f32 %v2902_v19, %v2638_v30  ;;  %v9050_v43 = vmax.f32 %v2923_v36, %v2639_v20  ;;  %v5964_v19 = vld [vmem:[#allocation14] sm:$0xf]  ;;  %v7084_v30 = vld [vmem:[#allocation14 + $0x10c] sm:$0xf0]  ;;  %v7065_v11 = vld [vmem:[#allocation14 + $0x74] sm:$0xf0] }
 0x328   :  { %v1686_v62 = vpop.f32.mrf.mxu2  ;;  %v1775_v22 = vpop.f32.mrf.mxu3  ;;  %v2648_v54 = vmax.f32 %v2392_v40, 0.0  ;;  %4998 = vmatpush.bf16.msrb.mxu0 %v6037_v53  ;;  %v5965_v36 = vor.u32 %v7052_v27, %v5964_v19  ;;  %v6332_v20 = vld [vmem:[#allocation14 + $0x2e0] sm:$0xf]  ;;  %v3050_v47 = vmax.f32 %v3049_v14, %v2765_v25  ;;  %v9074_v40 = vadd.f32 %v8632_v13, %v2259_v5  ;;  %v7140_v8 = vld [vmem:[#allocation14 + $0x2cc] sm:$0xf0] }
 0x329   :  { %v2116_v6 = vmul.f32 %v8879_v44, %v1686_v62  ;;  %v2117_v37 = vmul.f32 %v8882_v32, %v1775_v22  ;;  %4806 = vmatpush.bf16.msra.mxu3 %v6109_v12  ;;  %v6093_v38 = vor.u32 %v7084_v30, %v6092_v59  ;;  %v6333_v46 = vor.u32 %v7144_v39, %v6332_v20  ;;  %v6316_v12 = vld [vmem:[#allocation14 + $0x2c0] sm:$0xf]  ;;  %v6004_v59 = vld [vmem:[#allocation14 + $0x48] sm:$0xf] }
 0x32a   :  { %4794 = vmatpush.bf16.msra.mxu2 %v5965_v36  ;;  %v2781_v25 = vmax.f32 %v9060_v17, 0.0  ;;  %v2946_v21 = vmax.f32 %v9033_v2, %v2648_v54  ;;  %v3037_v53 = vrot.slane %v9068_v45, 2  ;;  %v3051_v14 = vmax.f32 %v3050_v47, %v2773_v51  ;;  %v6444_v17 = vld [vmem:[#allocation14 + $0x3c0] sm:$0xf] }
 0x32b   :  { %v9063_v48 = vadd.f32 %v8887_v1, %v2116_v6  ;;  %v1867_v55 = vpop.f32.mrf.mxu0  ;;  %v2391_v9 = vadd.f32 %v8893_v56, %v2117_v37  ;;  %v6461_v6 = vor.u32 %v7176_v26, %v6460_v10  ;;  %v6021_v37 = vor.u32 %v7065_v11, %v6020_v28  ;;  %v6300_v10 = vld [vmem:[#allocation14 + $0x2a0] sm:$0xf] }
 0x32c   :  { %v2126_v33 = vmul.f32 %v8864_v61, %v1867_v55  ;;  %v1645_v35 = vpop.f32.mrf.mxu1  ;;  %v6317_v19 = vor.u32 %v7140_v8, %v6316_v12  ;;  %v3052_v39 = vmax.f32 %v3051_v14, %v2781_v25  ;;  %v6284_v8 = vld [vmem:[#allocation14 + $0x280] sm:$0xf]  ;;  %v7132_v14 = vld [vmem:[#allocation14 + $0x28c] sm:$0xf0] }
 0x32d   :  { %v2267_v16 = vmul.f32 %v8624_v7, %v1645_v35  ;;  %1728 = vmatmul.bf16.gmra.mxu2 %v8596_v57  ;;  %1817 = vmatmul.bf16.gmra.mxu3 %v8596_v57  ;;  %v2646_v62 = vmax.f32 %v9063_v48, 0.0  ;;  %v2647_v52 = vmax.f32 %v2391_v9, 0.0  ;;  %v7172_v48 = vld [vmem:[#allocation14 + $0x3cc] sm:$0xf0]  ;;  %v7061_v9 = vld [vmem:[#allocation14 + $0x54] sm:$0xf0] }
 0x32e   :  { %v2400_v50 = vadd.f32 %v8876_v42, %v2126_v33  ;;  %1906 = vmatmul.bf16.gmra.mxu0 %v8596_v57  ;;  %4807 = vmatpush.bf16.msra.mxu3 %v6093_v38  ;;  %v6445_v27 = vor.u32 %v7172_v48, %v6444_v17  ;;  %v6005_v20 = vor.u32 %v7061_v9, %v6004_v59  ;;  %v6428_v38 = vld [vmem:[#allocation14 + $0x3a0] sm:$0xf] }
 0x32f   :  { %v2541_v22 = vadd.f32 %v8632_v13, %v2267_v16  ;;  %1960 = vmatmul.bf16.gmra.mxu1 %v8271_v41  ;;  %4813 = vmatpush.bf16.msrb.mxu2 %v6333_v46  ;;  %v2789_v41 = vmax.f32 %v9074_v40, 0.0  ;;  %v2904_v47 = vmax.f32 %v9048_v4, %v2646_v62  ;;  %v2925_v51 = vmax.f32 %v9050_v43, %v2647_v52  ;;  %v7057_v43 = vld [vmem:[#allocation14 + $0x34] sm:$0xf0] }
 0x330   :  { %v2656_v0 = vmax.f32 %v2400_v50, 0.0  ;;  %v1689_v63 = vpop.f32.mrf.mxu2  ;;  %v1778_v5 = vpop.f32.mrf.mxu3  ;;  %4999 = vmatpush.bf16.msrb.mxu0 %v6021_v37  ;;  %v7136_v50 = vld [vmem:[#allocation14 + $0x2ac] sm:$0xf0]  ;;  %v6285_v48 = vor.u32 %v7132_v14, %v6284_v8 }
 0x331   :  { %v2124_v2 = vmul.f32 %v8879_v44, %v1689_v63  ;;  %v2125_v54 = vmul.f32 %v8882_v32, %v1778_v5  ;;  %v2797_v33 = vmax.f32 %v2541_v22, 0.0  ;;  %v6301_v11 = vor.u32 %v7136_v50, %v6300_v10  ;;  %v5988_v22 = vld [vmem:[#allocation14 + $0x28] sm:$0xf]  ;;  %v6396_v50 = vld [vmem:[#allocation14 + $0x360] sm:$0xf] }
 0x332   :  { %v9090_v55 = vmax.f32 %v2946_v21, %v2656_v0  ;;  %4826 = vmatpush.bf16.msrb.mxu3 %v6461_v6  ;;  %v7168_v21 = vld [vmem:[#allocation14 + $0x3ac] sm:$0xf0]  ;;  %v3053_v0 = vmax.f32 %v3052_v39, %v2789_v41  ;;  %v5989_v5 = vor.u32 %v7057_v43, %v5988_v22  ;;  %v9105_v6 = vmax.f32 %v9068_v45, %v3037_v53  ;;  %v6412_v41 = vld [vmem:[#allocation14 + $0x380] sm:$0xf]  ;;  %v7053_v45 = vld [vmem:[#allocation14 + $0x14] sm:$0xf0] }
 0x333   :  { %v2398_v35 = vadd.f32 %v8887_v1, %v2124_v2  ;;  %v2399_v36 = vadd.f32 %v8893_v56, %v2125_v54  ;;  %v1869_v30 = vpop.f32.mrf.mxu0  ;;  %4814 = vmatpush.bf16.msrb.mxu2 %v6317_v19  ;;  %v6429_v4 = vor.u32 %v7168_v21, %v6428_v38  ;;  %v7164_v19 = vld [vmem:[#allocation14 + $0x38c] sm:$0xf0] }
 0x334   :  { %v2134_v40 = vmul.f32 %v8864_v61, %v1869_v30  ;;  %v1647_v16 = vpop.f32.mrf.mxu1  ;;  %5000 = vmatpush.bf16.msrb.mxu0 %v6005_v20  ;;  %v9113_v20 = vperm.slane %v8861_v58, 7  ;;  %v7128_v58 = vld [vmem:[#allocation14 + $0x26c] sm:$0xf0] }
 0x335   :  { %v2654_v46 = vmax.f32 %v2398_v35, 0.0  ;;  %v2655_v26 = vmax.f32 %v2399_v36, 0.0  ;;  %v2275_v28 = vmul.f32 %v8624_v7, %v1647_v16  ;;  %v3054_v7 = vmax.f32 %v3053_v0, %v2797_v33  ;;  %v6268_v16 = vld [vmem:[#allocation14 + $0x260] sm:$0xf]  ;;  %v7160_v38 = vld [vmem:[#allocation14 + $0x36c] sm:$0xf0] }
 0x336   :  { %v2408_v25 = vadd.f32 %v8876_v42, %v2134_v40  ;;  %4827 = vmatpush.bf16.msrb.mxu3 %v6445_v27  ;;  %v5972_v27 = vld [vmem:[#allocation14 + $0x8] sm:$0xf]  ;;  %v9117_v40 = vperm.slane %v8873_v34, 7  ;;  %v7156_v8 = vld [vmem:[#allocation14 + $0x34c] sm:$0xf0] }
 0x337   :  { %v9099_v62 = vmax.f32 %v2904_v47, %v2654_v46  ;;  %v9101_v52 = vmax.f32 %v2925_v51, %v2655_v26  ;;  %v2549_v63 = vadd.f32 %v8632_v13, %v2275_v28  ;;  %4815 = vmatpush.bf16.msrb.mxu2 %v6301_v11  ;;  %v6413_v13 = vor.u32 %v7164_v19, %v6412_v41 }
 0x338   :  { %v1691_v37 = vpop.f32.mrf.mxu2  ;;  %v1780_v12 = vpop.f32.mrf.mxu3  ;;  %5001 = vmatpush.bf16.msrb.mxu0 %v5989_v5  ;;  %v2664_v53 = vmax.f32 %v2408_v25, 0.0  ;;  %v5973_v39 = vor.u32 %v7053_v45, %v5972_v27  ;;  %v3039_v47 = vrot.slane %v9105_v6, 1  ;;  %v6269_v25 = vor.u32 %v7128_v58, %v6268_v16 }
 0x339   :  { %v2805_v2 = vmax.f32 %v2549_v63, 0.0  ;;  %v2132_v54 = vmul.f32 %v8879_v44, %v1691_v37  ;;  %v2133_v17 = vmul.f32 %v8882_v32, %v1780_v12  ;;  %v6380_v12 = vld [vmem:[#allocation14 + $0x340] sm:$0xf] }
 0x33a   :  { %4828 = vmatpush.bf16.msrb.mxu3 %v6429_v4  ;;  %v2948_v46 = vmax.f32 %v9090_v55, %v2664_v53  ;;  %v6397_v4 = vor.u32 %v7160_v38, %v6396_v50  ;;  %v7124_v55 = vld [vmem:[#allocation14 + $0x24c] sm:$0xf0]  ;;  %v3040_v41 = vmax.f32 %v9105_v6, %v3039_v47 }
 0x33b   :  { %v3055_v59 = vmax.f32 %v3054_v7, %v2805_v2  ;;  %v2406_v9 = vadd.f32 %v8887_v1, %v2132_v54  ;;  %v2407_v33 = vadd.f32 %v8893_v56, %v2133_v17  ;;  %v1872_v35 = vpop.f32.mrf.mxu0  ;;  %4816 = vmatpush.bf16.msrb.mxu2 %v6285_v48  ;;  %v6252_v7 = vld [vmem:[#allocation14 + $0x240] sm:$0xf]  ;;  %v6381_v48 = vor.u32 %v7156_v8, %v6380_v12 }
 0x33c   :  { %v2142_v36 = vmul.f32 %v8864_v61, %v1872_v35  ;;  %v1926_v30 = vpop.f32.mrf.mxu1  ;;  %5002 = vmatpush.bf16.msrb.mxu0 %v5973_v39  ;;  %v6236_v35 = vld [vmem:[#allocation14 + $0x220] sm:$0xf]  ;;  %v7152_v39 = vld [vmem:[#allocation14 + $0x32c] sm:$0xf0] }
 0x33d   :  { %v3056_v51 = vrot.slane %v3055_v59, 4  ;;  %1733 = vmatmul.bf16.gmra.mxu2 %v8618_v60  ;;  %1822 = vmatmul.bf16.gmra.mxu3 %v8618_v60  ;;  %v2662_v28 = vmax.f32 %v2406_v9, 0.0  ;;  %v2663_v11 = vmax.f32 %v2407_v33, 0.0  ;;  %v2031_v21 = vmul.f32 %v9113_v20, %v1926_v30  ;;  %v6364_v30 = vld [vmem:[#allocation14 + $0x320] sm:$0xf] }
 0x33e   :  { %v2416_v10 = vadd.f32 %v8876_v42, %v2142_v36  ;;  %1911 = vmatmul.bf16.gmra.mxu0 %v8618_v60  ;;  %4829 = vmatpush.bf16.msrb.mxu3 %v6413_v13  ;;  %v7120_v36 = vld [vmem:[#allocation14 + $0x22c] sm:$0xf0]  ;;  %v6365_v38 = vor.u32 %v7152_v39, %v6364_v30 }
 0x33f   :  { %v3057_v26 = vmax.f32 %v3055_v59, %v3056_v51  ;;  %1965 = vmatmul.bf16.gmra.mxu1 %v8286_v49  ;;  %4817 = vmatpush.bf16.msrb.mxu2 %v6269_v25  ;;  %v6253_v49 = vor.u32 %v7124_v55, %v6252_v7  ;;  %v2906_v19 = vmax.f32 %v9099_v62, %v2662_v28  ;;  %v7148_v25 = vld [vmem:[#allocation14 + $0x30c] sm:$0xf0] }
 0x340   :  { %v2672_v34 = vmax.f32 %v2416_v10, 0.0  ;;  %v1694_v22 = vpop.f32.mrf.mxu2  ;;  %v1783_v0 = vpop.f32.mrf.mxu3  ;;  %v2927_v13 = vmax.f32 %v9101_v52, %v2663_v11  ;;  %v2305_v27 = vadd.f32 %v9117_v40, %v2031_v21  ;;  %v3171_v52 = vrot.slane %v3040_v41, 4  ;;  %v7116_v21 = vld [vmem:[#allocation14 + $0x20c] sm:$0xf0] }
 0x341   :  { %v3058_v43 = vrot.slane %v3057_v26, 2  ;;  %v2140_v63 = vmul.f32 %v8879_v44, %v1694_v22  ;;  %v2141_v5 = vmul.f32 %v8882_v32, %v1783_v0  ;;  %v6237_v50 = vor.u32 %v7120_v36, %v6236_v35  ;;  %v6348_v0 = vld [vmem:[#allocation14 + $0x300] sm:$0xf] }
 0x342   :  { %v9128_v37 = vmax.f32 %v2948_v46, %v2672_v34  ;;  %4830 = vmatpush.bf16.msrb.mxu3 %v6397_v4  ;;  %v2561_v16 = vmax.f32 %v2305_v27, 0.0  ;;  %v6220_v34 = vld [vmem:[#allocation14 + $0x200] sm:$0xf]  ;;  %v6349_v12 = vor.u32 %v7148_v25, %v6348_v0 }
 0x343   :  { %v3059_v14 = vmax.f32 %v3057_v26, %v3058_v43  ;;  %v2414_v2 = vadd.f32 %v8887_v1, %v2140_v63  ;;  %v2415_v54 = vadd.f32 %v8893_v56, %v2141_v5  ;;  %v9132_v17 = vpop.f32.mrf.mxu0  ;;  %4818 = vmatpush.bf16.msrb.mxu2 %v6253_v49  ;;  %v6221_v22 = vor.u32 %v7116_v21, %v6220_v34 }
 0x344   :  { %v1928_v45 = vpop.f32.mrf.mxu1 }
 0x345   :  { %v3060_v53 = vrot.slane %v3059_v14, 1  ;;  %v2670_v59 = vmax.f32 %v2414_v2, 0.0  ;;  %v2671_v9 = vmax.f32 %v2415_v54, 0.0  ;;  %v2039_v33 = vmul.f32 %v9113_v20, %v1928_v45 }
 0x346   :  { %4831 = vmatpush.bf16.msrb.mxu3 %v6381_v48 }
 0x347   :  { %v3061_v51 = vmax.f32 %v3059_v14, %v3060_v53  ;;  %v2907_v6 = vmax.f32 %v2906_v19, %v2670_v59  ;;  %v2928_v47 = vmax.f32 %v2927_v13, %v2671_v9  ;;  %v2313_v62 = vadd.f32 %v9117_v40, %v2039_v33  ;;  %4819 = vmatpush.bf16.msrb.mxu2 %v6237_v50 }
 0x348   :  { %v1696_v10 = vpop.f32.mrf.mxu2  ;;  %v1785_v58 = vpop.f32.mrf.mxu3 }
 0x349   :  { %v3172_v46 = vrot.slane %v3061_v51, 2  ;;  %v2569_v26 = vmax.f32 %v2313_v62, 0.0  ;;  %v2148_v28 = vmul.f32 %v8879_v44, %v1696_v10  ;;  %v2149_v11 = vmul.f32 %v8882_v32, %v1785_v58 }
 0x34a   :  { %4832 = vmatpush.bf16.msrb.mxu3 %v6365_v38 }
 0x34b   :  { %v3186_v4 = vsel %vm3178_vm4, %v3171_v52, %v3172_v46  ;;  %v2957_v43 = vmax.f32 %v2561_v16, %v2569_v26  ;;  %v2422_v63 = vadd.f32 %v8887_v1, %v2148_v28  ;;  %v2423_v5 = vadd.f32 %v8893_v56, %v2149_v11  ;;  %v9145_v7 = vpop.f32.mrf.mxu0  ;;  %4820 = vmatpush.bf16.msrb.mxu2 %v6221_v22 }
 0x34c   :  { %v3187_v55 = vsel %vm3180_vm5, %v8910_v15, %v3186_v4  ;;  %v1931_v49 = vpop.f32.mrf.mxu1 }
 0x34d   :  { %v3195_v8 = vrot.slane %v3187_v55, 7  ;;  %v2678_v14 = vmax.f32 %v2422_v63, 0.0  ;;  %v2679_v2 = vmax.f32 %v2423_v5, 0.0  ;;  %v2047_v54 = vmul.f32 %v9113_v20, %v1931_v49 }
 0x34e   :  { %4833 = vmatpush.bf16.msrb.mxu3 %v6349_v12 }
 0x34f   :  { %v3197_v48 = vsel %vm3196_vm6, %v3195_v8, %v8856_v24  ;;  %v2908_v41 = vmax.f32 %v2907_v6, %v2678_v14  ;;  %v2929_v19 = vmax.f32 %v2928_v47, %v2679_v2  ;;  %v2321_v15 = vadd.f32 %v9117_v40, %v2047_v54  ;;  %1970 = vmatmul.bf16.gmra.mxu1 %v8326_v29 }
 0x350   :  { %v3199_v13 = vsel %vm3198_vm7, %v3195_v8, %v3197_v48  ;;  %v1699_v27 = vpop.f32.mrf.mxu2  ;;  %v1788_v45 = vpop.f32.mrf.mxu3 }
 0x351   :  { %v3201_v53 = vsel %vm3200_vm8, %v3195_v8, %v3199_v13  ;;  %v2909_v59 = vrot.slane %v2908_v41, 4  ;;  %v2930_v9 = vrot.slane %v2929_v19, 4  ;;  %v2577_v33 = vmax.f32 %v2321_v15, 0.0 }
 0x352   :  { %v3203_v35 = vsel %vm3202_vm9, %v3195_v8, %v3201_v53  ;;  %v2156_v28 = vmul.f32 %v8879_v44, %v1699_v27  ;;  %v2157_v11 = vmul.f32 %v8882_v32, %v1788_v45  ;;  %v2158_v15 = vmul.f32 %v8864_v61, %v9145_v7 }
 0x353   :  { %3224 = vst [vmem:[#allocation1] ss:$4 sm:$0xff] %v3203_v35  ;;  %v2910_v36 = vmax.f32 %v2908_v41, %v2909_v59  ;;  %v2931_v24 = vmax.f32 %v2929_v19, %v2930_v9  ;;  %v2958_v30 = vmax.f32 %v2957_v43, %v2577_v33  ;;  %v1879_v39 = vpop.f32.mrf.mxu0 }
 0x354   :  { %v1933_v51 = vpop.f32.mrf.mxu1  ;;  %v2430_v2 = vadd.f32 %v8887_v1, %v2156_v28  ;;  %v2431_v54 = vadd.f32 %v8893_v56, %v2157_v11  ;;  %v2166_v41 = vmul.f32 %v8864_v61, %v1879_v39 }
 0x355   :  { %v2911_v6 = vrot.slane %v2910_v36, 2  ;;  %v2932_v47 = vrot.slane %v2931_v24, 2  ;;  %v2055_v29 = vmul.f32 %v9113_v20, %v1933_v51 }
 0x356   :  { %v2686_v35 = vmax.f32 %v2430_v2, 0.0 }
 0x357   :  { %v2912_v62 = vmax.f32 %v2910_v36, %v2911_v6  ;;  %v2933_v52 = vmax.f32 %v2931_v24, %v2932_v47  ;;  %v2329_v16 = vadd.f32 %v9117_v40, %v2055_v29  ;;  %v2687_v36 = vmax.f32 %v2431_v54, 0.0 }
 0x358   :  { %v1701_v10 = vpop.f32.mrf.mxu2  ;;  %v1790_v58 = vpop.f32.mrf.mxu3  ;;  %v2432_v6 = vadd.f32 %v8876_v42, %v2158_v15 }
 0x359   :  { %v2913_v50 = vrot.slane %v2912_v62, 1  ;;  %v2934_v38 = vrot.slane %v2933_v52, 1  ;;  %v2585_v46 = vmax.f32 %v2329_v16, 0.0  ;;  %v2164_v26 = vmul.f32 %v8879_v44, %v1701_v10 }
 0x35a   :  { %v2165_v34 = vmul.f32 %v8882_v32, %v1790_v58  ;;  %v3227_v21 = vld.sshfl [vmem:[#allocation1] sm:$0xff pattern:$0x73625140]  ;;  %v3228_v22 = vld.sshfl [vmem:[#allocation1 + $0x8] sm:$0xff pattern:$0x73625140] }
 0x35b   :  { %v2935_v0 = vmax.f32 %v2933_v52, %v2934_v38  ;;  %v2959_v25 = vmax.f32 %v2958_v30, %v2585_v46  ;;  %v1882_v4 = vpop.f32.mrf.mxu0  ;;  %v2438_v43 = vadd.f32 %v8887_v1, %v2164_v26  ;;  %v9164_v5 = vpack.c.bf16 %v3227_v21, %v3227_v21 }
 0x35c   :  { %v1936_v63 = vpop.f32.mrf.mxu1  ;;  %v9166_v55 = vpack.c.bf16 %v3228_v22, %v3228_v22  ;;  %v2914_v49 = vmax.f32 %v2912_v62, %v2913_v50  ;;  %v2439_v8 = vadd.f32 %v8893_v56, %v2165_v34  ;;  %v2174_v24 = vmul.f32 %v8864_v61, %v1882_v4  ;;  %v3229_v22 = vld.sshfl [vmem:[#allocation1 + $0x10] sm:$0xff pattern:$0x73625140] }
 0x35d   :  { %v3167_v12 = vrot.slane %v2935_v0, 6  ;;  %v2063_v14 = vmul.f32 %v9113_v20, %v1936_v63  ;;  %4795 = vmatmul.bf16.vlgmr.msra.gmra.mxu2 %v9164_v5  ;;  %5003 = vmatmul.bf16.vlgmr.msrb.gmra.mxu0 %v9164_v5  ;;  %v2694_v13 = vmax.f32 %v2438_v43, 0.0  ;;  %v2440_v30 = vadd.f32 %v8876_v42, %v2166_v41  ;;  %v3230_v63 = vld.sshfl [vmem:[#allocation1 + $0x18] sm:$0xff pattern:$0x73625140] }
 0x35e   :  { %4808 = vmatmul.bf16.vlgmr.msra.gmra.mxu3 %v9166_v55  ;;  %v2695_v53 = vmax.f32 %v2439_v8, 0.0  ;;  %v2448_v50 = vadd.f32 %v8876_v42, %v2174_v24  ;;  %v2688_v0 = vmax.f32 %v2432_v6, 0.0  ;;  %v9197_v2 = vpack.c.bf16 %v3229_v22, %v3229_v22 }
 0x35f   :  { %v9175_v48 = vsel %vm3176_vm3, %v2914_v49, %v3167_v12  ;;  %v2337_v19 = vadd.f32 %v9117_v40, %v2063_v14  ;;  %1975 = vmatmul.bf16.gmra.mxu1 %v8348_v23  ;;  %v3062_v47 = vmax.f32 %v2686_v35, %v2694_v13  ;;  %v2696_v38 = vmax.f32 %v2440_v30, 0.0 }
 0x360   :  { %v1704_v27 = vpop.f32.mrf.mxu2  ;;  %v1793_v45 = vpop.f32.mrf.mxu3  ;;  %v3083_v52 = vmax.f32 %v2687_v36, %v2695_v53  ;;  %v2704_v49 = vmax.f32 %v2448_v50, 0.0  ;;  %v9201_v13 = vpack.c.bf16 %v3230_v63, %v3230_v63 }
 0x361   :  { %v2593_v59 = vmax.f32 %v2337_v19, 0.0  ;;  %v2172_v9 = vmul.f32 %v8879_v44, %v1704_v27  ;;  %v2173_v33 = vmul.f32 %v8882_v32, %v1793_v45  ;;  %v3104_v12 = vmax.f32 %v2688_v0, %v2696_v38 }
 0x363   :  { %v2960_v39 = vmax.f32 %v2959_v25, %v2593_v59  ;;  %v2446_v23 = vadd.f32 %v8887_v1, %v2172_v9  ;;  %v2447_v7 = vadd.f32 %v8893_v56, %v2173_v33  ;;  %v1884_v51 = vpop.f32.mrf.mxu0  ;;  %v3105_v53 = vmax.f32 %v3104_v12, %v2704_v49 }
 0x364   :  { %v2182_v29 = vmul.f32 %v8864_v61, %v1884_v51  ;;  %v1938_v62 = vpop.f32.mrf.mxu1 }
 0x365   :  { %v2702_v16 = vmax.f32 %v2446_v23, 0.0  ;;  %v2703_v10 = vmax.f32 %v2447_v7, 0.0  ;;  %v2071_v58 = vmul.f32 %v9113_v20, %v1938_v62 }
 0x366   :  { %v2456_v11 = vadd.f32 %v8876_v42, %v2182_v29 }
 0x367   :  { %v3063_v46 = vmax.f32 %v3062_v47, %v2702_v16  ;;  %v3084_v26 = vmax.f32 %v3083_v52, %v2703_v10  ;;  %v2345_v28 = vadd.f32 %v9117_v40, %v2071_v58 }
 0x368   :  { %v1706_v34 = vpop.f32.mrf.mxu2  ;;  %v1795_v21 = vpop.f32.mrf.mxu3  ;;  %v2712_v54 = vmax.f32 %v2456_v11, 0.0 }
 0x369   :  { %v2601_v25 = vmax.f32 %v2345_v28, 0.0  ;;  %v2180_v4 = vmul.f32 %v8879_v44, %v1706_v34  ;;  %v2181_v43 = vmul.f32 %v8882_v32, %v1795_v21 }
 0x36a   :  { %v3106_v33 = vmax.f32 %v3105_v53, %v2712_v54 }
 0x36b   :  { %v2961_v8 = vmax.f32 %v2960_v39, %v2601_v25  ;;  %v1887_v14 = vpop.f32.mrf.mxu0  ;;  %v2454_v41 = vadd.f32 %v8887_v1, %v2180_v4  ;;  %v2455_v27 = vadd.f32 %v8893_v56, %v2181_v43 }
 0x36c   :  { %v2190_v19 = vmul.f32 %v8864_v61, %v1887_v14  ;;  %v1941_v15 = vpop.f32.mrf.mxu1 }
 0x36d   :  { %v2079_v45 = vmul.f32 %v9113_v20, %v1941_v15  ;;  %4821 = vmatmul.bf16.vlgmr.msrb.gmra.mxu2 %v9197_v2  ;;  %v2710_v35 = vmax.f32 %v2454_v41, 0.0  ;;  %v2711_v39 = vmax.f32 %v2455_v27, 0.0 }
 0x36e   :  { %v2464_v59 = vadd.f32 %v8876_v42, %v2190_v19  ;;  %4834 = vmatmul.bf16.vlgmr.msrb.gmra.mxu3 %v9201_v13 }
 0x36f   :  { %v2353_v9 = vadd.f32 %v9117_v40, %v2079_v45  ;;  %1980 = vmatmul.bf16.gmra.mxu1 %v8376_v18  ;;  %v3064_v16 = vmax.f32 %v3063_v46, %v2710_v35  ;;  %v3085_v58 = vmax.f32 %v3084_v26, %v2711_v39  ;;  %v6212_v35 = vld [vmem:[#allocation14 + $0x1e8] sm:$0xf] }
 0x370   :  { %v2720_v36 = vmax.f32 %v2464_v59, 0.0  ;;  %v1709_v24 = vpop.f32.mrf.mxu2  ;;  %v1798_v30 = vpop.f32.mrf.mxu3 }
 0x371   :  { %v2609_v23 = vmax.f32 %v2353_v9, 0.0  ;;  %v2188_v7 = vmul.f32 %v8879_v44, %v1709_v24  ;;  %v2189_v51 = vmul.f32 %v8882_v32, %v1798_v30 }
 0x372   :  { %v3107_v6 = vmax.f32 %v3106_v33, %v2720_v36  ;;  %v7113_v36 = vld [vmem:[#allocation14 + $0x1f4] sm:$0xf0] }
 0x373   :  { %v2962_v47 = vmax.f32 %v2961_v8, %v2609_v23  ;;  %v2462_v29 = vadd.f32 %v8887_v1, %v2188_v7  ;;  %v2463_v62 = vadd.f32 %v8893_v56, %v2189_v51  ;;  %v1889_v52 = vpop.f32.mrf.mxu0  ;;  %v6213_v23 = vor.u32 %v7113_v36, %v6212_v35 }
 0x374   :  { %v2198_v18 = vmul.f32 %v8864_v61, %v1889_v52  ;;  %v1943_v10 = vpop.f32.mrf.mxu1 }
 0x375   :  { %v2718_v50 = vmax.f32 %v2462_v29, 0.0  ;;  %v2719_v38 = vmax.f32 %v2463_v62, 0.0  ;;  %v2087_v28 = vmul.f32 %v9113_v20, %v1943_v10  ;;  %5008 = vmatpush.bf16.msrb.mxu1 %v6213_v23  ;;  %v7109_v10 = vld [vmem:[#allocation14 + $0x1d4] sm:$0xf0] }
 0x376   :  { %v2472_v11 = vadd.f32 %v8876_v42, %v2198_v18  ;;  %v6196_v18 = vld [vmem:[#allocation14 + $0x1c8] sm:$0xf] }
 0x377   :  { %v3065_v34 = vmax.f32 %v3064_v16, %v2718_v50  ;;  %v3086_v21 = vmax.f32 %v3085_v58, %v2719_v38  ;;  %v2361_v22 = vadd.f32 %v9117_v40, %v2087_v28  ;;  %v6197_v28 = vor.u32 %v7109_v10, %v6196_v18 }
 0x378   :  { %v2728_v0 = vmax.f32 %v2472_v11, 0.0  ;;  %v1711_v25 = vpop.f32.mrf.mxu2  ;;  %v1800_v4 = vpop.f32.mrf.mxu3 }
 0x379   :  { %v2617_v43 = vmax.f32 %v2361_v22, 0.0  ;;  %v2196_v46 = vmul.f32 %v8879_v44, %v1711_v25  ;;  %v2197_v63 = vmul.f32 %v8882_v32, %v1800_v4  ;;  %5009 = vmatpush.bf16.msrb.mxu1 %v6197_v28  ;;  %v6132_v28 = vld [vmem:[#allocation14 + $0x148] sm:$0xf] }
 0x37a   :  { %v3108_v49 = vmax.f32 %v3107_v6, %v2728_v0 }
 0x37b   :  { %v2963_v26 = vmax.f32 %v2962_v47, %v2617_v43  ;;  %v2470_v12 = vadd.f32 %v8887_v1, %v2196_v46  ;;  %v1892_v8 = vpop.f32.mrf.mxu0  ;;  %v2471_v14 = vadd.f32 %v8893_v56, %v2197_v63  ;;  %v6180_v43 = vld [vmem:[#allocation14 + $0x1a8] sm:$0xf]  ;;  %v7105_v46 = vld [vmem:[#allocation14 + $0x1b4] sm:$0xf0] }
 0x37c   :  { %v2206_v54 = vmul.f32 %v8864_v61, %v1892_v8  ;;  %v1946_v41 = vpop.f32.mrf.mxu1 }
 0x37d   :  { %v2095_v19 = vmul.f32 %v9113_v20, %v1946_v41  ;;  %v2726_v27 = vmax.f32 %v2470_v12, 0.0  ;;  %v2727_v53 = vmax.f32 %v2471_v14, 0.0  ;;  %v6181_v12 = vor.u32 %v7105_v46, %v6180_v43 }
 0x37e   :  { %v2480_v15 = vadd.f32 %v8876_v42, %v2206_v54 }
 0x37f   :  { %v2369_v45 = vadd.f32 %v9117_v40, %v2095_v19  ;;  %1985 = vmatmul.bf16.gmra.mxu1 %v8416_v31  ;;  %v3066_v31 = vmax.f32 %v3065_v34, %v2726_v27  ;;  %v3087_v62 = vmax.f32 %v3086_v21, %v2727_v53  ;;  %v7101_v53 = vld [vmem:[#allocation14 + $0x194] sm:$0xf0] }
 0x380   :  { %v2736_v59 = vmax.f32 %v2480_v15, 0.0  ;;  %v1714_v9 = vpop.f32.mrf.mxu2  ;;  %v1803_v33 = vpop.f32.mrf.mxu3  ;;  %5010 = vmatpush.bf16.msrb.mxu1 %v6181_v12  ;;  %v6116_v12 = vld [vmem:[#allocation14 + $0x128] sm:$0xf] }
 0x381   :  { %v2625_v24 = vmax.f32 %v2369_v45, 0.0  ;;  %v2204_v30 = vmul.f32 %v8879_v44, %v1714_v9  ;;  %v2205_v39 = vmul.f32 %v8882_v32, %v1803_v33  ;;  %v6164_v45 = vld [vmem:[#allocation14 + $0x188] sm:$0xf] }
 0x382   :  { %v3109_v7 = vmax.f32 %v3108_v49, %v2736_v59  ;;  %v6165_v9 = vor.u32 %v7101_v53, %v6164_v45 }
 0x383   :  { %v2964_v51 = vmax.f32 %v2963_v26, %v2625_v24  ;;  %v2478_v6 = vadd.f32 %v8887_v1, %v2204_v30  ;;  %v2479_v47 = vadd.f32 %v8893_v56, %v2205_v39  ;;  %v1894_v29 = vpop.f32.mrf.mxu0 }
 0x384   :  { %v2214_v52 = vmul.f32 %v8864_v61, %v1894_v29  ;;  %v1948_v16 = vpop.f32.mrf.mxu1  ;;  %5011 = vmatpush.bf16.msrb.mxu1 %v6165_v9  ;;  %v6100_v9 = vld [vmem:[#allocation14 + $0x108] sm:$0xf] }
 0x385   :  { %v2734_v58 = vmax.f32 %v2478_v6, 0.0  ;;  %v2735_v50 = vmax.f32 %v2479_v47, 0.0  ;;  %v2103_v38 = vmul.f32 %v9113_v20, %v1948_v16 }
 0x386   :  { %v2488_v11 = vadd.f32 %v8876_v42, %v2214_v52 }
 0x387   :  { %v3067_v22 = vmax.f32 %v3066_v31, %v2734_v58  ;;  %v3088_v0 = vmax.f32 %v3087_v62, %v2735_v50  ;;  %v2377_v25 = vadd.f32 %v9117_v40, %v2103_v38 }
 0x388   :  { %v2744_v4 = vmax.f32 %v2488_v11, 0.0  ;;  %v1716_v34 = vpop.f32.mrf.mxu2  ;;  %v1805_v21 = vpop.f32.mrf.mxu3  ;;  %v7093_v11 = vld [vmem:[#allocation14 + $0x154] sm:$0xf0] }
 0x389   :  { %v2633_v63 = vmax.f32 %v2377_v25, 0.0  ;;  %v2212_v49 = vmul.f32 %v8879_v44, %v1716_v34  ;;  %v2213_v26 = vmul.f32 %v8882_v32, %v1805_v21  ;;  %v6133_v21 = vor.u32 %v7093_v11, %v6132_v28 }
 0x38a   :  { %v3110_v8 = vmax.f32 %v3109_v7, %v2744_v4  ;;  %v6148_v7 = vld [vmem:[#allocation14 + $0x168] sm:$0xf] }
 0x38b   :  { %v2965_v14 = vmax.f32 %v2964_v51, %v2633_v63  ;;  %v2486_v54 = vadd.f32 %v8887_v1, %v2212_v49  ;;  %v1897_v41 = vpop.f32.mrf.mxu0  ;;  %v2487_v19 = vadd.f32 %v8893_v56, %v2213_v26  ;;  %v7097_v51 = vld [vmem:[#allocation14 + $0x174] sm:$0xf0] }
 0x38c   :  { %v2222_v15 = vmul.f32 %v8864_v61, %v1897_v41  ;;  %v1951_v27 = vpop.f32.mrf.mxu1  ;;  %v6149_v31 = vor.u32 %v7097_v51, %v6148_v7 }
 0x38d   :  { %v2111_v59 = vmul.f32 %v9113_v20, %v1951_v27  ;;  %v2742_v35 = vmax.f32 %v2486_v54, 0.0  ;;  %v2743_v24 = vmax.f32 %v2487_v19, 0.0 }
 0x38e   :  { %v2496_v33 = vadd.f32 %v8876_v42, %v2222_v15  ;;  %5012 = vmatpush.bf16.msrb.mxu1 %v6149_v31 }
 0x38f   :  { %v2385_v36 = vadd.f32 %v9117_v40, %v2111_v59  ;;  %1990 = vmatmul.bf16.gmra.mxu1 %v8492_v3  ;;  %v3068_v10 = vmax.f32 %v3067_v22, %v2742_v35  ;;  %v3089_v58 = vmax.f32 %v3088_v0, %v2743_v24 }
 0x390   :  { %v2752_v30 = vmax.f32 %v2496_v33, 0.0  ;;  %v1719_v39 = vpop.f32.mrf.mxu2  ;;  %v1808_v23 = vpop.f32.mrf.mxu3  ;;  %v7085_v33 = vld [vmem:[#allocation14 + $0x114] sm:$0xf0] }
 0x391   :  { %v2641_v6 = vmax.f32 %v2385_v36, 0.0  ;;  %v2220_v47 = vmul.f32 %v8879_v44, %v1719_v39  ;;  %v2221_v29 = vmul.f32 %v8882_v32, %v1808_v23  ;;  %v6101_v24 = vor.u32 %v7085_v33, %v6100_v9 }
 0x392   :  { %v3111_v62 = vmax.f32 %v3110_v8, %v2752_v30  ;;  %5013 = vmatpush.bf16.msrb.mxu1 %v6133_v21  ;;  %v7089_v8 = vld [vmem:[#allocation14 + $0x134] sm:$0xf0]  ;;  %v2150_v23 = vmul.f32 %v8864_v61, %v9132_v17 }
 0x393   :  { %v2966_v52 = vmax.f32 %v2965_v14, %v2641_v6  ;;  %v2494_v16 = vadd.f32 %v8887_v1, %v2220_v47  ;;  %v2495_v18 = vadd.f32 %v8893_v56, %v2221_v29  ;;  %v1899_v3 = vpop.f32.mrf.mxu0  ;;  %v6117_v41 = vor.u32 %v7089_v8, %v6116_v12 }
 0x394   :  { %v2230_v50 = vmul.f32 %v8864_v61, %v1899_v3  ;;  %v1953_v38 = vpop.f32.mrf.mxu1  ;;  %v2424_v17 = vadd.f32 %v8876_v42, %v2150_v23 }
 0x395   :  { %v2750_v25 = vmax.f32 %v2494_v16, 0.0  ;;  %v2751_v4 = vmax.f32 %v2495_v18, 0.0  ;;  %v2119_v34 = vmul.f32 %v9113_v20, %v1953_v38 }
 0x396   :  { %v2504_v43 = vadd.f32 %v8876_v42, %v2230_v50  ;;  %5014 = vmatpush.bf16.msrb.mxu1 %v6117_v41 }
 0x397   :  { %v3069_v46 = vmax.f32 %v3068_v10, %v2750_v25  ;;  %v3090_v63 = vmax.f32 %v3089_v58, %v2751_v4  ;;  %v2393_v26 = vadd.f32 %v9117_v40, %v2119_v34 }
 0x398   :  { %v2760_v49 = vmax.f32 %v2504_v43, 0.0  ;;  %v1721_v22 = vpop.f32.mrf.mxu2  ;;  %v1810_v0 = vpop.f32.mrf.mxu3 }
 0x399   :  { %v2228_v14 = vmul.f32 %v8879_v44, %v1721_v22  ;;  %v2229_v54 = vmul.f32 %v8882_v32, %v1810_v0  ;;  %v2649_v27 = vmax.f32 %v2393_v26, 0.0  ;;  %v2680_v26 = vmax.f32 %v2424_v17, 0.0 }
 0x39a   :  { %v3112_v19 = vmax.f32 %v3111_v62, %v2760_v49  ;;  %5015 = vmatpush.bf16.msrb.mxu1 %v6101_v24 }
 0x39b   :  { %v1902_v15 = vpop.f32.mrf.mxu0  ;;  %v2502_v45 = vadd.f32 %v8887_v1, %v2228_v14  ;;  %v2503_v35 = vadd.f32 %v8893_v56, %v2229_v54  ;;  %v2967_v7 = vmax.f32 %v2966_v52, %v2649_v27  ;;  %v2950_v41 = vmax.f32 %v9128_v37, %v2680_v26 }
 0x39c   :  { %v2238_v53 = vmul.f32 %v8864_v61, %v1902_v15  ;;  %v1956_v59 = vpop.f32.mrf.mxu1 }
 0x39d   :  { %v2127_v36 = vmul.f32 %v9113_v20, %v1956_v59  ;;  %v2758_v51 = vmax.f32 %v2502_v45, 0.0  ;;  %v2759_v31 = vmax.f32 %v2503_v35, 0.0  ;;  %v2951_v35 = vrot.slane %v2950_v41, 4 }
 0x39e   :  { %v2512_v30 = vadd.f32 %v8876_v42, %v2238_v53 }
 0x39f   :  { %v2401_v39 = vadd.f32 %v9117_v40, %v2127_v36  ;;  %1995 = vmatmul.bf16.gmra.mxu1 %v8596_v57  ;;  %v3070_v52 = vmax.f32 %v3069_v46, %v2758_v51  ;;  %v3091_v11 = vmax.f32 %v3090_v63, %v2759_v31 }
 0x3a0   :  { %v2768_v6 = vmax.f32 %v2512_v30, 0.0  ;;  %v1724_v47 = vpop.f32.mrf.mxu2  ;;  %v1813_v29 = vpop.f32.mrf.mxu3 }
 0x3a1   :  { %v2657_v62 = vmax.f32 %v2401_v39, 0.0  ;;  %v2236_v16 = vmul.f32 %v8879_v44, %v1724_v47  ;;  %v2237_v18 = vmul.f32 %v8882_v32, %v1813_v29 }
 0x3a2   :  { %v3113_v3 = vmax.f32 %v3112_v19, %v2768_v6 }
 0x3a3   :  { %v2968_v10 = vmax.f32 %v2967_v7, %v2657_v62  ;;  %v2510_v58 = vadd.f32 %v8887_v1, %v2236_v16  ;;  %v2511_v57 = vadd.f32 %v8893_v56, %v2237_v18  ;;  %v1904_v50 = vpop.f32.mrf.mxu0 }
 0x3a4   :  { %v2246_v38 = vmul.f32 %v8864_v61, %v1904_v50  ;;  %v1958_v28 = vpop.f32.mrf.mxu1 }
 0x3a5   :  { %v2766_v25 = vmax.f32 %v2510_v58, 0.0  ;;  %v2767_v4 = vmax.f32 %v2511_v57, 0.0  ;;  %v2135_v34 = vmul.f32 %v9113_v20, %v1958_v28 }
 0x3a6   :  { %v2520_v21 = vadd.f32 %v8876_v42, %v2246_v38 }
 0x3a7   :  { %v3071_v43 = vmax.f32 %v3070_v52, %v2766_v25  ;;  %v3092_v49 = vmax.f32 %v3091_v11, %v2767_v4  ;;  %v2409_v0 = vadd.f32 %v9117_v40, %v2135_v34 }
 0x3a8   :  { %v2776_v22 = vmax.f32 %v2520_v21, 0.0  ;;  %v1726_v12 = vpop.f32.mrf.mxu2  ;;  %v1815_v8 = vpop.f32.mrf.mxu3 }
 0x3a9   :  { %v2244_v46 = vmul.f32 %v8879_v44, %v1726_v12  ;;  %v2245_v14 = vmul.f32 %v8882_v32, %v1815_v8  ;;  %v2665_v19 = vmax.f32 %v2409_v0, 0.0 }
 0x3aa   :  { %v3114_v54 = vmax.f32 %v3113_v3, %v2776_v22 }
 0x3ab   :  { %v1907_v63 = vpop.f32.mrf.mxu0  ;;  %v2518_v15 = vadd.f32 %v8887_v1, %v2244_v46  ;;  %v2519_v53 = vadd.f32 %v8893_v56, %v2245_v14  ;;  %v2969_v36 = vmax.f32 %v2968_v10, %v2665_v19 }
 0x3ac   :  { %v2254_v27 = vmul.f32 %v8864_v61, %v1907_v63  ;;  %v1961_v45 = vpop.f32.mrf.mxu1 }
 0x3ad   :  { %v2143_v59 = vmul.f32 %v9113_v20, %v1961_v45  ;;  %v2774_v24 = vmax.f32 %v2518_v15, 0.0  ;;  %v2775_v23 = vmax.f32 %v2519_v53, 0.0 }
 0x3ae   :  { %v2528_v9 = vadd.f32 %v8876_v42, %v2254_v27 }
 0x3af   :  { %v2417_v33 = vadd.f32 %v9117_v40, %v2143_v59  ;;  %2000 = vmatmul.bf16.gmra.mxu1 %v8618_v60  ;;  %v2952_v60 = vmax.f32 %v2950_v41, %v2951_v35  ;;  %v3072_v18 = vmax.f32 %v3071_v43, %v2774_v24  ;;  %v3093_v58 = vmax.f32 %v3092_v49, %v2775_v23 }
 0x3b0   :  { %v2784_v37 = vmax.f32 %v2528_v9, 0.0  ;;  %v1729_v30 = vpop.f32.mrf.mxu2  ;;  %v1818_v39 = vpop.f32.mrf.mxu3 }
 0x3b1   :  { %v2673_v7 = vmax.f32 %v2417_v33, 0.0  ;;  %v2252_v51 = vmul.f32 %v8879_v44, %v1729_v30  ;;  %v2253_v6 = vmul.f32 %v8882_v32, %v1818_v39  ;;  %v2953_v25 = vrot.slane %v2952_v60, 2 }
 0x3b2   :  { %v3115_v47 = vmax.f32 %v3114_v54, %v2784_v37 }
 0x3b3   :  { %v2970_v29 = vmax.f32 %v2969_v36, %v2673_v7  ;;  %v2526_v31 = vadd.f32 %v8887_v1, %v2252_v51  ;;  %v2527_v62 = vadd.f32 %v8893_v56, %v2253_v6  ;;  %v1909_v16 = vpop.f32.mrf.mxu0  ;;  %v2954_v8 = vmax.f32 %v2952_v60, %v2953_v25 }
 0x3b4   :  { %v2262_v3 = vmul.f32 %v8864_v61, %v1909_v16  ;;  %v1963_v10 = vpop.f32.mrf.mxu1 }
 0x3b5   :  { %v2782_v57 = vmax.f32 %v2526_v31, 0.0  ;;  %v2783_v50 = vmax.f32 %v2527_v62, 0.0  ;;  %v2151_v17 = vmul.f32 %v9113_v20, %v1963_v10  ;;  %v2955_v27 = vrot.slane %v2954_v8, 1 }
 0x3b6   :  { %v2536_v52 = vadd.f32 %v8876_v42, %v2262_v3 }
 0x3b7   :  { %v3073_v38 = vmax.f32 %v3072_v18, %v2782_v57  ;;  %v3094_v28 = vmax.f32 %v3093_v58, %v2783_v50  ;;  %v2425_v11 = vadd.f32 %v9117_v40, %v2151_v17  ;;  %v2956_v51 = vmax.f32 %v2954_v8, %v2955_v27 }
 0x3b8   :  { %v2792_v4 = vmax.f32 %v2536_v52, 0.0  ;;  %v1731_v34 = vpop.f32.mrf.mxu2  ;;  %v1820_v21 = vpop.f32.mrf.mxu3 }
 0x3b9   :  { %v2681_v26 = vmax.f32 %v2425_v11, 0.0  ;;  %v2260_v43 = vmul.f32 %v8879_v44, %v1731_v34  ;;  %v2261_v22 = vmul.f32 %v8882_v32, %v1820_v21  ;;  %v3168_v52 = vrot.slane %v2956_v51, 4 }
 0x3ba   :  { %v3116_v49 = vmax.f32 %v3115_v47, %v2792_v4 }
 0x3bb   :  { %v2971_v0 = vmax.f32 %v2970_v29, %v2681_v26  ;;  %v1912_v12 = vpop.f32.mrf.mxu0  ;;  %v2534_v46 = vadd.f32 %v8887_v1, %v2260_v43  ;;  %v2535_v41 = vadd.f32 %v8893_v56, %v2261_v22 }
 0x3bc   :  { %v2270_v14 = vmul.f32 %v8864_v61, %v1912_v12  ;;  %v1966_v54 = vpop.f32.mrf.mxu1 }
 0x3bd   :  { %v2972_v63 = vrot.slane %v2971_v0, 4  ;;  %v2790_v45 = vmax.f32 %v2534_v46, 0.0  ;;  %v2791_v35 = vmax.f32 %v2535_v41, 0.0  ;;  %v2159_v12 = vmul.f32 %v9113_v20, %v1966_v54 }
 0x3be   :  { %v2544_v19 = vadd.f32 %v8876_v42, %v2270_v14 }
 0x3bf   :  { %v2973_v15 = vmax.f32 %v2971_v0, %v2972_v63  ;;  %5016 = vmatmul.bf16.vlgmr.msrb.gmra.mxu1 %v9166_v55  ;;  %v3074_v6 = vmax.f32 %v3073_v38, %v2790_v45  ;;  %v3095_v62 = vmax.f32 %v3094_v28, %v2791_v35 }
 0x3c0   :  { %v2800_v53 = vmax.f32 %v2544_v19, 0.0  ;;  %v1734_v59 = vpop.f32.mrf.mxu2  ;;  %v1823_v9 = vpop.f32.mrf.mxu3  ;;  %v2433_v19 = vadd.f32 %v9117_v40, %v2159_v12  ;;  %v7209_v12 = vld [vmem:[#allocation14 + $0x4f4] sm:$0xf0] }
 0x3c1   :  { %v2974_v33 = vrot.slane %v2973_v15, 2  ;;  %v2268_v36 = vmul.f32 %v8879_v44, %v1734_v59  ;;  %v2269_v24 = vmul.f32 %v8882_v32, %v1823_v9 }
 0x3c2   :  { %v3117_v37 = vmax.f32 %v3116_v49, %v2800_v53 }
 0x3c3   :  { %v2975_v30 = vmax.f32 %v2973_v15, %v2974_v33  ;;  %v2542_v39 = vadd.f32 %v8887_v1, %v2268_v36  ;;  %v2543_v23 = vadd.f32 %v8893_v56, %v2269_v24  ;;  %v1914_v7 = vpop.f32.mrf.mxu0  ;;  %v2689_v33 = vmax.f32 %v2433_v19, 0.0 }
 0x3c4   :  { %v2278_v47 = vmul.f32 %v8864_v61, %v1914_v7  ;;  %v1968_v29 = vpop.f32.mrf.mxu1 }
 0x3c5   :  { %v2976_v31 = vrot.slane %v2975_v30, 1  ;;  %v2798_v16 = vmax.f32 %v2542_v39, 0.0  ;;  %v2799_v60 = vmax.f32 %v2543_v23, 0.0 }
 0x3c6   :  { %v2552_v18 = vadd.f32 %v8876_v42, %v2278_v47 }
 0x3c7   :  { %v2977_v3 = vmax.f32 %v2975_v30, %v2976_v31  ;;  %v3075_v10 = vmax.f32 %v3074_v6, %v2798_v16  ;;  %v3096_v58 = vmax.f32 %v3095_v62, %v2799_v60 }
 0x3c8   :  { %v2808_v57 = vmax.f32 %v2552_v18, 0.0  ;;  %v1736_v50 = vpop.f32.mrf.mxu2  ;;  %v1825_v17 = vpop.f32.mrf.mxu3 }
 0x3c9   :  { %v3169_v11 = vrot.slane %v2977_v3, 2  ;;  %v2276_v25 = vmul.f32 %v8879_v44, %v1736_v50  ;;  %v2277_v38 = vmul.f32 %v8882_v32, %v1825_v17  ;;  %v2167_v44 = vmul.f32 %v9113_v20, %v1968_v29 }
 0x3ca   :  { %v9305_v61 = vmax.f32 %v3117_v37, %v2808_v57 }
 0x3cb   :  { %v3183_v28 = vsel %vm3178_vm4, %v3168_v52, %v3169_v11  ;;  %v2550_v4 = vadd.f32 %v8887_v1, %v2276_v25  ;;  %v2551_v42 = vadd.f32 %v8893_v56, %v2277_v38  ;;  %v2441_v56 = vadd.f32 %v9117_v40, %v2167_v44 }
 0x3cc   :  { %v9312_v34 = vsel %vm3180_vm5, %v9175_v48, %v3183_v28  ;;  %v1971_v21 = vpop.f32.mrf.mxu1 }
 0x3cd   :  { %v2806_v26 = vmax.f32 %v2550_v4, 0.0  ;;  %v2807_v43 = vmax.f32 %v2551_v42, 0.0  ;;  %v2175_v1 = vmul.f32 %v9113_v20, %v1971_v21  ;;  %v2697_v53 = vmax.f32 %v2441_v56, 0.0  ;;  %v7241_v56 = vld [vmem:[#allocation14 + $0x5f4] sm:$0xf0] }
 0x3cf   :  { %v3076_v22 = vmax.f32 %v3075_v10, %v2806_v26  ;;  %v3097_v49 = vmax.f32 %v3096_v58, %v2807_v43  ;;  %v2449_v45 = vadd.f32 %v9117_v40, %v2175_v1  ;;  %v3125_v24 = vmax.f32 %v2689_v33, %v2697_v53  ;;  %v6588_v26 = vld [vmem:[#allocation14 + $0x4e0] sm:$0xf]  ;;  %v7208_v43 = vld [vmem:[#allocation14 + $0x4ec] sm:$0xf0]  ;;  %v6724_v1 = vld [vmem:[#allocation14 + $0x5e8] sm:$0xf] }
 0x3d0   :  { %v6589_v44 = vor.u32 %v7208_v43, %v6588_v26  ;;  %v7229_v26 = vld [vmem:[#allocation14 + $0x594] sm:$0xf0] }
 0x3d1   :  { %v3077_v32 = vrot.slane %v3076_v22, 4  ;;  %v3098_v0 = vrot.slane %v3097_v49, 4  ;;  %v2705_v36 = vmax.f32 %v2449_v45, 0.0  ;;  %v7205_v45 = vld [vmem:[#allocation14 + $0x4d4] sm:$0xf0] }
 0x3d2   :  { %4839 = vmatpush.bf16.msra.mxu2 %v6589_v44  ;;  %v7192_v44 = vld [vmem:[#allocation14 + $0x46c] sm:$0xf0] }
 0x3d3   :  { %v3078_v8 = vmax.f32 %v3076_v22, %v3077_v32  ;;  %v3099_v46 = vmax.f32 %v3097_v49, %v3098_v0  ;;  %v3126_v47 = vmax.f32 %v3125_v24, %v2705_v36  ;;  %v6716_v22 = vld [vmem:[#allocation14 + $0x5e0] sm:$0xf]  ;;  %v7240_v32 = vld [vmem:[#allocation14 + $0x5ec] sm:$0xf0]  ;;  %v6596_v0 = vld [vmem:[#allocation14 + $0x4e8] sm:$0xf] }
 0x3d4   :  { %v1973_v14 = vpop.f32.mrf.mxu1  ;;  %v7200_v36 = vld [vmem:[#allocation14 + $0x4ac] sm:$0xf0]  ;;  %v6684_v24 = vld [vmem:[#allocation14 + $0x5a0] sm:$0xf] }
 0x3d5   :  { %v3079_v48 = vrot.slane %v3078_v8, 2  ;;  %v3100_v63 = vrot.slane %v3099_v46, 2  ;;  %v2183_v41 = vmul.f32 %v9113_v20, %v1973_v14  ;;  %v6725_v14 = vor.u32 %v7241_v56, %v6724_v1  ;;  %v7193_v1 = vld [vmem:[#allocation14 + $0x474] sm:$0xf0] }
 0x3d7   :  { %v3080_v15 = vmax.f32 %v3078_v8, %v3079_v48  ;;  %v3101_v27 = vmax.f32 %v3099_v46, %v3100_v63  ;;  %v2457_v9 = vadd.f32 %v9117_v40, %v2183_v41  ;;  %v6717_v8 = vor.u32 %v7240_v32, %v6716_v22  ;;  %v6572_v48 = vld [vmem:[#allocation14 + $0x4c0] sm:$0xf]  ;;  %v7204_v63 = vld [vmem:[#allocation14 + $0x4cc] sm:$0xf0]  ;;  %5060 = vmatpush.bf16.msra.mxu1 %v6725_v14 }
 0x3d8   :  { %v6597_v46 = vor.u32 %v7209_v12, %v6596_v0  ;;  %v6700_v41 = vld [vmem:[#allocation14 + $0x5c0] sm:$0xf]  ;;  %v6573_v19 = vor.u32 %v7204_v63, %v6572_v48  ;;  %v6660_v48 = vld [vmem:[#allocation14 + $0x568] sm:$0xf]  ;;  %v7225_v63 = vld [vmem:[#allocation14 + $0x574] sm:$0xf0] }
 0x3d9   :  { %v3081_v59 = vrot.slane %v3080_v15, 1  ;;  %v3102_v54 = vrot.slane %v3101_v27, 1  ;;  %v2713_v7 = vmax.f32 %v2457_v9, 0.0  ;;  %4852 = vmatpush.bf16.msra.mxu3 %v6717_v8  ;;  %v7237_v9 = vld [vmem:[#allocation14 + $0x5d4] sm:$0xf0] }
 0x3da   :  { %v9322_v37 = vpop.f32.mrf.mxu0  ;;  %5047 = vmatpush.bf16.msra.mxu0 %v6597_v46  ;;  %4840 = vmatpush.bf16.msra.mxu2 %v6573_v19  ;;  %v6524_v22 = vld [vmem:[#allocation14 + $0x460] sm:$0xf]  ;;  %v7224_v8 = vld [vmem:[#allocation14 + $0x56c] sm:$0xf0]  ;;  %v6532_v46 = vld [vmem:[#allocation14 + $0x468] sm:$0xf] }
 0x3db   :  { %v3103_v35 = vmax.f32 %v3101_v27, %v3102_v54  ;;  %v3082_v39 = vmax.f32 %v3080_v15, %v3081_v59  ;;  %v3127_v31 = vmax.f32 %v3126_v47, %v2713_v7  ;;  %v7236_v15 = vld [vmem:[#allocation14 + $0x5cc] sm:$0xf0]  ;;  %v6580_v27 = vld [vmem:[#allocation14 + $0x4c8] sm:$0xf]  ;;  %v6652_v32 = vld [vmem:[#allocation14 + $0x560] sm:$0xf]  ;;  %v6525_v12 = vor.u32 %v7192_v44, %v6524_v22 }
 0x3dc   :  { %v1976_v30 = vpop.f32.mrf.mxu1  ;;  %v6701_v53 = vor.u32 %v7236_v15, %v6700_v41  ;;  %v6581_v59 = vor.u32 %v7205_v45, %v6580_v27  ;;  %v6708_v54 = vld [vmem:[#allocation14 + $0x5c8] sm:$0xf]  ;;  %v6653_v56 = vor.u32 %v7224_v8, %v6652_v32  ;;  %v6533_v14 = vor.u32 %v7193_v1, %v6532_v46  ;;  %v6508_v45 = vld [vmem:[#allocation14 + $0x440] sm:$0xf]  ;;  %v7180_v22 = vld [vmem:[#allocation14 + $0x40c] sm:$0xf0] }
 0x3dd   :  { %v3173_v23 = vrot.slane %v3103_v35, 6  ;;  %v2191_v51 = vmul.f32 %v9113_v20, %v1976_v30  ;;  %v6709_v33 = vor.u32 %v7237_v9, %v6708_v54  ;;  %v6556_v35 = vld [vmem:[#allocation14 + $0x4a0] sm:$0xf]  ;;  %v6564_v7 = vld [vmem:[#allocation14 + $0x4a8] sm:$0xf]  ;;  %v6661_v27 = vor.u32 %v7225_v63, %v6660_v48 }
 0x3de   :  { %4853 = vmatpush.bf16.msra.mxu3 %v6701_v53  ;;  %5048 = vmatpush.bf16.msra.mxu0 %v6581_v59  ;;  %v7188_v53 = vld [vmem:[#allocation14 + $0x44c] sm:$0xf0]  ;;  %v6636_v59 = vld [vmem:[#allocation14 + $0x540] sm:$0xf] }
 0x3df   :  { %v9326_v6 = vsel %vm3176_vm3, %v3082_v39, %v3173_v23  ;;  %v2465_v29 = vadd.f32 %v9117_v40, %v2191_v51  ;;  %5061 = vmatpush.bf16.msra.mxu1 %v6709_v33  ;;  %v6557_v39 = vor.u32 %v7200_v36, %v6556_v35  ;;  %v7232_v23 = vld [vmem:[#allocation14 + $0x5ac] sm:$0xf0]  ;;  %v7201_v51 = vld [vmem:[#allocation14 + $0x4b4] sm:$0xf0]  ;;  %v6509_v54 = vor.u32 %v7188_v53, %v6508_v45  ;;  %v6516_v33 = vld [vmem:[#allocation14 + $0x448] sm:$0xf] }
 0x3e0   :  { %v4796_v16 = vpop.f32.mrf.mxu2  ;;  %v6685_v47 = vor.u32 %v7232_v23, %v6684_v24  ;;  %v7220_v9 = vld [vmem:[#allocation14 + $0x54c] sm:$0xf0]  ;;  %v7189_v35 = vld [vmem:[#allocation14 + $0x454] sm:$0xf0]  ;;  %v6644_v24 = vld [vmem:[#allocation14 + $0x548] sm:$0xf] }
 0x3e1   :  { %v2721_v62 = vmax.f32 %v2465_v29, 0.0  ;;  %v4809_v60 = vpop.f32.mrf.mxu3  ;;  %v6565_v29 = vor.u32 %v7201_v51, %v6564_v7  ;;  %4841 = vmatpush.bf16.msra.mxu2 %v6557_v39  ;;  %v6637_v36 = vor.u32 %v7220_v9, %v6636_v59  ;;  %v7221_v39 = vld [vmem:[#allocation14 + $0x554] sm:$0xf0]  ;;  %v6492_v51 = vld [vmem:[#allocation14 + $0x420] sm:$0xf] }
 0x3e2   :  { %v5006_v3 = vpop.f32.mrf.mxu0  ;;  %v4810_v17 = vadd.f32 %v4809_v60, %v4796_v16  ;;  %4854 = vmatpush.bf16.msra.mxu3 %v6685_v47  ;;  %v6540_v60 = vld [vmem:[#allocation14 + $0x480] sm:$0xf]  ;;  %v6645_v7 = vor.u32 %v7221_v39, %v6644_v24  ;;  %v7184_v47 = vld [vmem:[#allocation14 + $0x42c] sm:$0xf0]  ;;  %v7213_v59 = vld [vmem:[#allocation14 + $0x514] sm:$0xf0] }
 0x3e3   :  { %v9329_v18 = vmax.f32 %v3127_v31, %v2721_v62  ;;  %v6692_v31 = vld [vmem:[#allocation14 + $0x5a8] sm:$0xf]  ;;  %v7233_v62 = vld [vmem:[#allocation14 + $0x5b4] sm:$0xf0]  ;;  %5049 = vmatpush.bf16.msra.mxu0 %v6565_v29  ;;  %v7196_v3 = vld [vmem:[#allocation14 + $0x48c] sm:$0xf0] }
 0x3e4   :  { %v9331_v10 = vpop.f32.mrf.mxu1  ;;  %v6693_v16 = vor.u32 %v7233_v62, %v6692_v31  ;;  %v6620_v29 = vld [vmem:[#allocation14 + $0x520] sm:$0xf]  ;;  %v6493_v62 = vor.u32 %v7184_v47, %v6492_v51  ;;  %v7272_v46 = vld [vmem:[#allocation14 + $0x6ec] sm:$0xf0] }
 0x3e5   :  { %v2199_v41 = vmul.f32 %v9113_v20, %v9331_v10  ;;  %v6517_v10 = vor.u32 %v7189_v35, %v6516_v33  ;;  %v6604_v44 = vld [vmem:[#allocation14 + $0x500] sm:$0xf]  ;;  %v7111_v35 = vld [vmem:[#allocation14 + $0x1ec] sm:$0xf]  ;;  %v7300_v51 = vld [vmem:[#allocation14 + $0x7cc] sm:$0xf0] }
 0x3e6   :  { %5062 = vmatpush.bf16.msra.mxu1 %v6693_v16  ;;  %v7216_v16 = vld [vmem:[#allocation14 + $0x52c] sm:$0xf0]  ;;  %v6844_v8 = vld [vmem:[#allocation14 + $0x6e0] sm:$0xf] }
 0x3e7   :  { %v6845_v48 = vor.u32 %v7272_v46, %v6844_v8  ;;  %v6972_v63 = vld [vmem:[#allocation14 + $0x7e0] sm:$0xf]  ;;  %v7071_v46 = vld [vmem:[#allocation14 + $0xac] sm:$0xf] }
 0x3e8   :  { %v4798_v58 = vpop.f32.mrf.mxu2 }
 0x3e9   :  { %v4811_v57 = vpop.f32.mrf.mxu3  ;;  %v6668_v58 = vld [vmem:[#allocation14 + $0x580] sm:$0xf] }
 0x3ea   :  { %v6541_v57 = vor.u32 %v7196_v3, %v6540_v60  ;;  %v6500_v60 = vld [vmem:[#allocation14 + $0x428] sm:$0xf]  ;;  %v7185_v3 = vld [vmem:[#allocation14 + $0x434] sm:$0xf0] }
 0x3ec   :  { %v9333_v50 = vpop.f32.mrf.mxu1  ;;  %4842 = vmatpush.bf16.msra.mxu2 %v6541_v57  ;;  %v6501_v57 = vor.u32 %v7185_v3, %v6500_v60  ;;  %v6070_v60 = vld [vmem:[#allocation14 + $0xd8] sm:$0xf0]  ;;  %v7107_v3 = vld [vmem:[#allocation14 + $0x1cc] sm:$0xf] }
 0x3ed   :  { %v2207_v19 = vmul.f32 %v9113_v20, %v9333_v50  ;;  %v9354_v50 = vadd.f32 %v9117_v40, %v2199_v41 }
 0x3f0   :  { %v4822_v52 = vpop.f32.mrf.mxu2  ;;  %4843 = vmatpush.bf16.msra.mxu2 %v6525_v12  ;;  %v7212_v12 = vld [vmem:[#allocation14 + $0x50c] sm:$0xf0] }
 0x3f1   :  { %v4835_v11 = vpop.f32.mrf.mxu3  ;;  %v4823_v25 = vadd.f32 %v4822_v52, %v4810_v17  ;;  %v7228_v17 = vld [vmem:[#allocation14 + $0x58c] sm:$0xf0]  ;;  %v6548_v52 = vld [vmem:[#allocation14 + $0x488] sm:$0xf] }
 0x3f3   :  { %v9335_v38 = vadd.f32 %v4835_v11, %v4823_v25  ;;  %v7197_v11 = vld [vmem:[#allocation14 + $0x494] sm:$0xf0]  ;;  %v6669_v25 = vor.u32 %v7228_v17, %v6668_v58  ;;  %v6621_v58 = vor.u32 %v7216_v16, %v6620_v29  ;;  %v6628_v17 = vld [vmem:[#allocation14 + $0x528] sm:$0xf]  ;;  %v7075_v16 = vld [vmem:[#allocation14 + $0xcc] sm:$0xf] }
 0x3f4   :  { %v9337_v28 = vpop.f32.mrf.mxu1  ;;  %4844 = vmatpush.bf16.msra.mxu2 %v6509_v54  ;;  %v7079_v54 = vld [vmem:[#allocation14 + $0xec] sm:$0xf] }
 0x3f5   :  { %4855 = vmatpush.bf16.msra.mxu3 %v6669_v25  ;;  %v2215_v15 = vmul.f32 %v9113_v20, %v9337_v28  ;;  %v9357_v28 = vadd.f32 %v9117_v40, %v2207_v19  ;;  %v6484_v19 = vld [vmem:[#allocation14 + $0x408] sm:$0xf] }
 0x3f7   :  { %v9360_v23 = vadd.f32 %v9117_v40, %v2215_v15  ;;  %v2737_v25 = vmax.f32 %v9357_v28, 0.0  ;;  %v7181_v15 = vld [vmem:[#allocation14 + $0x414] sm:$0xf0]  ;;  %v7268_v28 = vld [vmem:[#allocation14 + $0x6cc] sm:$0xf0] }
 0x3f8   :  { %v4824_v4 = vpop.f32.mrf.mxu2  ;;  %4845 = vmatpush.bf16.msra.mxu2 %v6493_v62  ;;  %v6485_v53 = vor.u32 %v7181_v15, %v6484_v19 }
 0x3f9   :  { %v4837_v42 = vpop.f32.mrf.mxu3  ;;  %v6549_v4 = vor.u32 %v7197_v11, %v6548_v52  ;;  %4856 = vmatpush.bf16.msra.mxu3 %v6653_v56  ;;  %v7217_v52 = vld [vmem:[#allocation14 + $0x534] sm:$0xf0]  ;;  %v2729_v11 = vmax.f32 %v9354_v50, 0.0 }
 0x3fa   :  { %v6676_v42 = vld [vmem:[#allocation14 + $0x588] sm:$0xf] }
 0x3fb   :  { %v6677_v43 = vor.u32 %v7229_v26, %v6676_v42  ;;  %5050 = vmatpush.bf16.msra.mxu0 %v6549_v4  ;;  %v2745_v4 = vmax.f32 %v9360_v23, 0.0  ;;  %v6629_v42 = vor.u32 %v7217_v52, %v6628_v17  ;;  %v3129_v47 = vmax.f32 %v9329_v18, %v2729_v11  ;;  %v6812_v11 = vld [vmem:[#allocation14 + $0x6a0] sm:$0xf] }
 0x3fc   :  { %v9339_v21 = vpop.f32.mrf.mxu1  ;;  %v6073_v52 = vor.u32 %v7075_v16, %v6070_v60  ;;  %v6924_v23 = vld [vmem:[#allocation14 + $0x780] sm:$0xf] }
 0x3fd   :  { %5063 = vmatpush.bf16.msra.mxu1 %v6677_v43  ;;  %4857 = vmatpush.bf16.msra.mxu3 %v6637_v36  ;;  %v2223_v26 = vmul.f32 %v9113_v20, %v9339_v21  ;;  %v6476_v43 = vld [vmem:[#allocation14 + $0x400] sm:$0xf]  ;;  %v7304_v21 = vld [vmem:[#allocation14 + $0x7ec] sm:$0xf0]  ;;  %v6214_v36 = vld [vmem:[#allocation14 + $0x1f8] sm:$0xf0] }
 0x3fe   :  { %v6477_v32 = vor.u32 %v7180_v22, %v6476_v43  ;;  %v6973_v41 = vor.u32 %v7304_v21, %v6972_v63  ;;  %v6217_v50 = vor.u32 %v7111_v35, %v6214_v36  ;;  %v7264_v43 = vld [vmem:[#allocation14 + $0x6ac] sm:$0xf0]  ;;  %v6940_v22 = vld [vmem:[#allocation14 + $0x7a0] sm:$0xf] }
 0x3ff   :  { %5051 = vmatpush.bf16.msra.mxu0 %v6533_v14  ;;  %v6605_v14 = vor.u32 %v7212_v12, %v6604_v44  ;;  %v2497_v45 = vadd.f32 %v9117_v40, %v2223_v26  ;;  %v3130_v26 = vmax.f32 %v3129_v47, %v2737_v25  ;;  %v6813_v8 = vor.u32 %v7264_v43, %v6812_v11  ;;  %v6054_v25 = vld [vmem:[#allocation14 + $0xb8] sm:$0xf0]  ;;  %v7256_v47 = vld [vmem:[#allocation14 + $0x66c] sm:$0xf0] }
 0x400   :  { %4846 = vmatpush.bf16.msra.mxu2 %v6477_v32  ;;  %v6057_v21 = vor.u32 %v7071_v46, %v6054_v25  ;;  %v7059_v46 = vld [vmem:[#allocation14 + $0x4c] sm:$0xf] }
 0x401   :  { %5064 = vmatpush.bf16.msra.mxu1 %v6661_v27  ;;  %4858 = vmatpush.bf16.msra.mxu3 %v6621_v58  ;;  %v6612_v27 = vld [vmem:[#allocation14 + $0x508] sm:$0xf]  ;;  %v2753_v58 = vmax.f32 %v2497_v45, 0.0  ;;  %v7260_v45 = vld [vmem:[#allocation14 + $0x68c] sm:$0xf0] }
 0x403   :  { %5052 = vmatpush.bf16.msra.mxu0 %v6517_v10  ;;  %v6828_v10 = vld [vmem:[#allocation14 + $0x6c0] sm:$0xf] }
 0x404   :  { %v9341_v49 = vpop.f32.mrf.mxu1  ;;  %4865 = vmatpush.bf16.msrb.mxu2 %v6845_v48  ;;  %v6829_v29 = vor.u32 %v7268_v28, %v6828_v10  ;;  %v7099_v10 = vld [vmem:[#allocation14 + $0x18c] sm:$0xf] }
 0x405   :  { %5065 = vmatpush.bf16.msra.mxu1 %v6645_v7  ;;  %v2231_v1 = vmul.f32 %v9113_v20, %v9341_v49  ;;  %4859 = vmatpush.bf16.msra.mxu3 %v6605_v14  ;;  %v6086_v49 = vld [vmem:[#allocation14 + $0xf8] sm:$0xf0]  ;;  %v6956_v7 = vld [vmem:[#allocation14 + $0x7c0] sm:$0xf] }
 0x406   :  { %v6089_v33 = vor.u32 %v7079_v54, %v6086_v49  ;;  %v6957_v62 = vor.u32 %v7300_v51, %v6956_v7  ;;  %v6182_v14 = vld [vmem:[#allocation14 + $0x1b8] sm:$0xf0]  ;;  %v7292_v54 = vld [vmem:[#allocation14 + $0x78c] sm:$0xf0]  ;;  %v7067_v49 = vld [vmem:[#allocation14 + $0x8c] sm:$0xf] }
 0x407   :  { %5053 = vmatpush.bf16.msra.mxu0 %v6501_v57  ;;  %v2505_v24 = vadd.f32 %v9117_v40, %v2231_v1  ;;  %v6925_v35 = vor.u32 %v7292_v54, %v6924_v23  ;;  %v6780_v51 = vld [vmem:[#allocation14 + $0x660] sm:$0xf] }
 0x408   :  { %4866 = vmatpush.bf16.msrb.mxu2 %v6829_v29  ;;  %v6908_v29 = vld [vmem:[#allocation14 + $0x760] sm:$0xf] }
 0x409   :  { %5066 = vmatpush.bf16.msra.mxu1 %v6629_v42  ;;  %4878 = vmatpush.bf16.msrb.mxu3 %v6973_v41  ;;  %v6198_v42 = vld [vmem:[#allocation14 + $0x1d8] sm:$0xf0]  ;;  %v2761_v44 = vmax.f32 %v2505_v24, 0.0 }
 0x40a   :  { %v6201_v18 = vor.u32 %v7107_v3, %v6198_v42  ;;  %v6166_v24 = vld [vmem:[#allocation14 + $0x198] sm:$0xf0]  ;;  %v6781_v3 = vor.u32 %v7256_v47, %v6780_v51  ;;  %v7095_v42 = vld [vmem:[#allocation14 + $0x16c] sm:$0xf] }
 0x40b   :  { %5054 = vmatpush.bf16.msra.mxu0 %v6485_v53  ;;  %v6169_v7 = vor.u32 %v7099_v10, %v6166_v24  ;;  %v6860_v10 = vld [vmem:[#allocation14 + $0x700] sm:$0xf]  ;;  %v7276_v24 = vld [vmem:[#allocation14 + $0x70c] sm:$0xf0] }
 0x40c   :  { %v9343_v30 = vpop.f32.mrf.mxu1  ;;  %4867 = vmatpush.bf16.msrb.mxu2 %v6813_v8  ;;  %v6861_v51 = vor.u32 %v7276_v24, %v6860_v10  ;;  %v7070_v24 = vld [vmem:[#allocation14 + $0xa4] sm:$0xf] }
 0x40d   :  { %v2239_v56 = vmul.f32 %v9113_v20, %v9343_v30  ;;  %v6613_v30 = vor.u32 %v7213_v59, %v6612_v27  ;;  %4879 = vmatpush.bf16.msrb.mxu3 %v6957_v62  ;;  %v6796_v27 = vld [vmem:[#allocation14 + $0x680] sm:$0xf] }
 0x40e   :  { %v6797_v59 = vor.u32 %v7260_v45, %v6796_v27  ;;  %v7280_v27 = vld [vmem:[#allocation14 + $0x72c] sm:$0xf0] }
 0x40f   :  { %v9376_v39 = vadd.f32 %v9117_v40, %v2239_v56  ;;  %5067 = vmatpush.bf16.msra.mxu1 %v6613_v30  ;;  %5099 = vmatpush.bf16.msrb.mxu0 %v6089_v33  ;;  %v7103_v56 = vld [vmem:[#allocation14 + $0x1ac] sm:$0xf]  ;;  %v3119_v30 = vrot.slane %v9305_v61, 4 }
 0x410   :  { %v6185_v41 = vor.u32 %v7103_v56, %v6182_v14  ;;  %4868 = vmatpush.bf16.msrb.mxu2 %v6797_v59  ;;  %v5990_v59 = vld [vmem:[#allocation14 + $0x38] sm:$0xf0] }
 0x411   :  { %v2769_v32 = vmax.f32 %v9376_v39, 0.0 }
 0x413   :  { %5112 = vmatpush.bf16.msrb.mxu1 %v6217_v50  ;;  %5100 = vmatpush.bf16.msrb.mxu0 %v6073_v52  ;;  %v6022_v52 = vld [vmem:[#allocation14 + $0x78] sm:$0xf0] }
 0x414   :  { %v9345_v0 = vpop.f32.mrf.mxu1  ;;  %4869 = vmatpush.bf16.msrb.mxu2 %v6781_v3  ;;  %v7083_v3 = vld [vmem:[#allocation14 + $0x10c] sm:$0xf] }
 0x415   :  { %v2247_v57 = vmul.f32 %v9113_v20, %v9345_v0  ;;  %v7296_v0 = vld [vmem:[#allocation14 + $0x7ac] sm:$0xf0] }
 0x416   :  { %v6941_v1 = vor.u32 %v7296_v0, %v6940_v22  ;;  %v6764_v22 = vld [vmem:[#allocation14 + $0x640] sm:$0xf]  ;;  %v7284_v0 = vld [vmem:[#allocation14 + $0x74c] sm:$0xf0] }
 0x417   :  { %v2521_v48 = vadd.f32 %v9117_v40, %v2247_v57  ;;  %5113 = vmatpush.bf16.msrb.mxu1 %v6201_v18  ;;  %5101 = vmatpush.bf16.msrb.mxu0 %v6057_v21  ;;  %v7063_v57 = vld [vmem:[#allocation14 + $0x6c] sm:$0xf]  ;;  %v6748_v21 = vld [vmem:[#allocation14 + $0x620] sm:$0xf] }
 0x418   :  { %4880 = vmatpush.bf16.msrb.mxu3 %v6941_v1  ;;  %v6025_v11 = vor.u32 %v7063_v57, %v6022_v52  ;;  %v3120_v1 = vmax.f32 %v9305_v61, %v3119_v30  ;;  %v7087_v61 = vld [vmem:[#allocation14 + $0x12c] sm:$0xf]  ;;  %v7244_v30 = vld [vmem:[#allocation14 + $0x60c] sm:$0xf0] }
 0x419   :  { %v2777_v39 = vmax.f32 %v2521_v48, 0.0  ;;  %v7091_v48 = vld [vmem:[#allocation14 + $0x14c] sm:$0xf] }
 0x41b   :  { %5114 = vmatpush.bf16.msrb.mxu1 %v6185_v41 }
 0x41c   :  { %v9362_v31 = vpop.f32.mrf.mxu1  ;;  %4881 = vmatpush.bf16.msrb.mxu3 %v6925_v35 }
 0x41d   :  { %v2255_v17 = vmul.f32 %v9113_v20, %v9362_v31  ;;  %v3131_v31 = vmax.f32 %v3130_v26, %v2745_v4  ;;  %v6150_v26 = vld [vmem:[#allocation14 + $0x178] sm:$0xf0] }
 0x41e   :  { %v6153_v43 = vor.u32 %v7095_v42, %v6150_v26 }
 0x41f   :  { %v2529_v63 = vadd.f32 %v9117_v40, %v2255_v17  ;;  %v3132_v19 = vmax.f32 %v3131_v31, %v2753_v58  ;;  %v7288_v58 = vld [vmem:[#allocation14 + $0x76c] sm:$0xf0]  ;;  %5115 = vmatpush.bf16.msrb.mxu1 %v6169_v7  ;;  %v6006_v31 = vld [vmem:[#allocation14 + $0x58] sm:$0xf0] }
 0x420   :  { %v6909_v17 = vor.u32 %v7288_v58, %v6908_v29  ;;  %v6009_v41 = vor.u32 %v7059_v46, %v6006_v31  ;;  %v6102_v58 = vld [vmem:[#allocation14 + $0x118] sm:$0xf0] }
 0x421   :  { %v3133_v33 = vmax.f32 %v3132_v19, %v2761_v44  ;;  %v2785_v50 = vmax.f32 %v2529_v63, 0.0  ;;  %v7252_v44 = vld [vmem:[#allocation14 + $0x64c] sm:$0xf0]  ;;  %v6134_v63 = vld [vmem:[#allocation14 + $0x158] sm:$0xf0] }
 0x422   :  { %4882 = vmatpush.bf16.msrb.mxu3 %v6909_v17  ;;  %v7248_v19 = vld [vmem:[#allocation14 + $0x62c] sm:$0xf0]  ;;  %v6105_v17 = vor.u32 %v7083_v3, %v6102_v58  ;;  %v7066_v58 = vld [vmem:[#allocation14 + $0x84] sm:$0xf] }
 0x423   :  { %v3134_v62 = vmax.f32 %v3133_v33, %v2769_v32  ;;  %v6765_v32 = vor.u32 %v7252_v44, %v6764_v22  ;;  %5116 = vmatpush.bf16.msrb.mxu1 %v6153_v43  ;;  %v3121_v33 = vrot.slane %v3120_v1, 2 }
 0x424   :  { %v1998_v9 = vpop.f32.mrf.mxu1 }
 0x425   :  { %v2263_v12 = vmul.f32 %v9113_v20, %v1998_v9  ;;  %v6038_v9 = vld [vmem:[#allocation14 + $0x98] sm:$0xf0]  ;;  %v3135_v18 = vmax.f32 %v3134_v62, %v2777_v39  ;;  %4870 = vmatpush.bf16.msrb.mxu2 %v6765_v32  ;;  %v3122_v47 = vmax.f32 %v3120_v1, %v3121_v33  ;;  %v7051_v62 = vld [vmem:[#allocation14 + $0xc] sm:$0xf] }
 0x426   :  { %v6041_v36 = vor.u32 %v7067_v49, %v6038_v9  ;;  %v6118_v49 = vld [vmem:[#allocation14 + $0x138] sm:$0xf0]  ;;  %v6732_v9 = vld [vmem:[#allocation14 + $0x600] sm:$0xf]  ;;  %v7235_v33 = vld [vmem:[#allocation14 + $0x5cc] sm:$0xf] }
 0x427   :  { %v2537_v4 = vadd.f32 %v9117_v40, %v2263_v12  ;;  %v6892_v12 = vld [vmem:[#allocation14 + $0x740] sm:$0xf]  ;;  %v3136_v25 = vmax.f32 %v3135_v18, %v2785_v50  ;;  %v6121_v50 = vor.u32 %v7087_v61, %v6118_v49  ;;  %v6733_v7 = vor.u32 %v7244_v30, %v6732_v9  ;;  %v7106_v61 = vld [vmem:[#allocation14 + $0x1c4] sm:$0xf]  ;;  %v7203_v9 = vld [vmem:[#allocation14 + $0x4cc] sm:$0xf] }
 0x428   :  { %5102 = vmatpush.bf16.msrb.mxu0 %v6041_v36  ;;  %v6893_v14 = vor.u32 %v7284_v0, %v6892_v12  ;;  %v3123_v52 = vrot.slane %v3122_v47, 1  ;;  %v6582_v30 = vld [vmem:[#allocation14 + $0x4d8] sm:$0xf0] }
 0x429   :  { %v2793_v16 = vmax.f32 %v2537_v4, 0.0  ;;  %v6137_v4 = vor.u32 %v7091_v48, %v6134_v63  ;;  %v7110_v48 = vld [vmem:[#allocation14 + $0x1e4] sm:$0xf]  ;;  %v6206_v63 = vld [vmem:[#allocation14 + $0x1f0] sm:$0xf0] }
 0x42a   :  { %4883 = vmatpush.bf16.msrb.mxu3 %v6893_v14  ;;  %v6078_v14 = vld [vmem:[#allocation14 + $0xf0] sm:$0xf0] }
 0x42b   :  { %v3137_v45 = vmax.f32 %v3136_v25, %v2793_v16  ;;  %5117 = vmatpush.bf16.msrb.mxu1 %v6137_v4 }
 0x42c   :  { %v2001_v15 = vpop.f32.mrf.mxu1  ;;  %5103 = vmatpush.bf16.msrb.mxu0 %v6025_v11  ;;  %v3124_v11 = vmax.f32 %v3122_v47, %v3123_v52  ;;  %v7199_v47 = vld [vmem:[#allocation14 + $0x4ac] sm:$0xf]  ;;  %v6158_v52 = vld [vmem:[#allocation14 + $0x190] sm:$0xf0] }
 0x42d   :  { %v2271_v53 = vmul.f32 %v9113_v20, %v2001_v15  ;;  %v6876_v15 = vld [vmem:[#allocation14 + $0x720] sm:$0xf] }
 0x42e   :  { %v6877_v54 = vor.u32 %v7280_v27, %v6876_v15  ;;  %v3174_v44 = vrot.slane %v3124_v11, 4  ;;  %v6726_v15 = vld [vmem:[#allocation14 + $0x5f8] sm:$0xf0] }
 0x42f   :  { %v2545_v28 = vadd.f32 %v9117_v40, %v2271_v53  ;;  %v7055_v53 = vld [vmem:[#allocation14 + $0x2c] sm:$0xf]  ;;  %5118 = vmatpush.bf16.msrb.mxu1 %v6121_v50  ;;  %v6174_v50 = vld [vmem:[#allocation14 + $0x1b0] sm:$0xf0]  ;;  %v6550_v11 = vld [vmem:[#allocation14 + $0x498] sm:$0xf0] }
 0x430   :  { %5104 = vmatpush.bf16.msrb.mxu0 %v6009_v41  ;;  %v5993_v39 = vor.u32 %v7055_v53, %v5990_v59  ;;  %4884 = vmatpush.bf16.msrb.mxu3 %v6877_v54  ;;  %v6598_v41 = vld [vmem:[#allocation14 + $0x4f8] sm:$0xf0]  ;;  %v6062_v59 = vld [vmem:[#allocation14 + $0xd0] sm:$0xf0] }
 0x431   :  { %v2801_v60 = vmax.f32 %v2545_v28, 0.0 }
 0x433   :  { %v3138_v35 = vmax.f32 %v3137_v45, %v2801_v60  ;;  %v5974_v60 = vld [vmem:[#allocation14 + $0x18] sm:$0xf0]  ;;  %5119 = vmatpush.bf16.msrb.mxu1 %v6105_v17  ;;  %v7098_v17 = vld [vmem:[#allocation14 + $0x184] sm:$0xf] }
 0x434   :  { %v2003_v8 = vpop.f32.mrf.mxu1  ;;  %5105 = vmatpush.bf16.msrb.mxu0 %v5993_v39  ;;  %4885 = vmatpush.bf16.msrb.mxu3 %v6861_v51  ;;  %v5977_v57 = vor.u32 %v7051_v62, %v5974_v60  ;;  %v6046_v39 = vld [vmem:[#allocation14 + $0xb0] sm:$0xf0]  ;;  %v7231_v62 = vld [vmem:[#allocation14 + $0x5ac] sm:$0xf] }
 0x435   :  { %v2279_v56 = vmul.f32 %v9113_v20, %v2003_v8  ;;  %v6749_v20 = vor.u32 %v7248_v19, %v6748_v21  ;;  %v7207_v21 = vld [vmem:[#allocation14 + $0x4ec] sm:$0xf]  ;;  %v6049_v60 = vor.u32 %v7070_v24, %v6046_v39  ;;  %v6110_v24 = vld [vmem:[#allocation14 + $0x130] sm:$0xf0] }
 0x436   :  { %v7239_v19 = vld [vmem:[#allocation14 + $0x5ec] sm:$0xf]  ;;  %v6601_v54 = vor.u32 %v7207_v21, %v6598_v41  ;;  %v6662_v21 = vld [vmem:[#allocation14 + $0x578] sm:$0xf0] }
 0x437   :  { %v2553_v23 = vadd.f32 %v9117_v40, %v2279_v56  ;;  %4871 = vmatpush.bf16.msrb.mxu2 %v6749_v20  ;;  %v7078_v56 = vld [vmem:[#allocation14 + $0xe4] sm:$0xf]  ;;  %v6190_v20 = vld [vmem:[#allocation14 + $0x1d0] sm:$0xf0]  ;;  %v6729_v49 = vor.u32 %v7239_v19, %v6726_v15 }
 0x438   :  { %5106 = vmatpush.bf16.msrb.mxu0 %v5977_v57  ;;  %v6193_v10 = vor.u32 %v7106_v61, %v6190_v20  ;;  %v6030_v57 = vld [vmem:[#allocation14 + $0x90] sm:$0xf0]  ;;  %v7058_v15 = vld [vmem:[#allocation14 + $0x44] sm:$0xf]  ;;  %v7187_v20 = vld [vmem:[#allocation14 + $0x44c] sm:$0xf] }
 0x439   :  { %v2809_v36 = vmax.f32 %v2553_v23, 0.0  ;;  %v6081_v23 = vor.u32 %v7078_v56, %v6078_v14 }
 0x43b   :  { %v3139_v40 = vmax.f32 %v3138_v35, %v2809_v36  ;;  %4872 = vmatpush.bf16.msrb.mxu2 %v6733_v7  ;;  %v6710_v35 = vld [vmem:[#allocation14 + $0x5d8] sm:$0xf0]  ;;  %v6585_v7 = vor.u32 %v7203_v9, %v6582_v30 }
 0x43c   :  { %v9396_v28 = vpop.f32.mrf.mxu1  ;;  %v6713_v51 = vor.u32 %v7235_v33, %v6710_v35  ;;  %v6646_v9 = vld [vmem:[#allocation14 + $0x558] sm:$0xf0]  ;;  %v7054_v35 = vld [vmem:[#allocation14 + $0x24] sm:$0xf] }
 0x43d   :  { %v3140_v29 = vrot.slane %v3139_v40, 4 }
 0x43f   :  { %v3141_v16 = vmax.f32 %v3139_v40, %v3140_v29  ;;  %v7102_v40 = vld [vmem:[#allocation14 + $0x1a4] sm:$0xf]  ;;  %v6566_v29 = vld [vmem:[#allocation14 + $0x4b8] sm:$0xf0] }
 0x440   :  { %v6177_v3 = vor.u32 %v7102_v40, %v6174_v50  ;;  %v7183_v50 = vld [vmem:[#allocation14 + $0x42c] sm:$0xf] }
 0x441   :  { %v3142_v42 = vrot.slane %v3141_v16, 2 }
 0x443   :  { %v3143_v26 = vmax.f32 %v3141_v16, %v3142_v42  ;;  %v6694_v16 = vld [vmem:[#allocation14 + $0x5b8] sm:$0xf0]  ;;  %v6569_v42 = vor.u32 %v7199_v47, %v6566_v29 }
 0x444   :  { %v5019_v18 = vpop.f32.mrf.mxu1  ;;  %v6630_v47 = vld [vmem:[#allocation14 + $0x538] sm:$0xf0] }
 0x445   :  { %v3144_v43 = vrot.slane %v3143_v26, 1  ;;  %v7195_v18 = vld [vmem:[#allocation14 + $0x48c] sm:$0xf] }
 0x447   :  { %v3145_v22 = vmax.f32 %v3143_v26, %v3144_v43  ;;  %v6697_v26 = vor.u32 %v7231_v62, %v6694_v16  ;;  %v7227_v43 = vld [vmem:[#allocation14 + $0x58c] sm:$0xf]  ;;  %v7050_v16 = vld [vmem:[#allocation14 + $0x4] sm:$0xf] }
 0x449   :  { %v3175_v12 = vrot.slane %v3145_v22, 2  ;;  %v6678_v22 = vld [vmem:[#allocation14 + $0x598] sm:$0xf0] }
 0x44b   :  { %v3189_v8 = vsel %vm3178_vm4, %v3174_v44, %v3175_v12  ;;  %v6033_v44 = vor.u32 %v7066_v58, %v6030_v57  ;;  %v6161_v12 = vor.u32 %v7098_v17, %v6158_v52  ;;  %v6094_v58 = vld [vmem:[#allocation14 + $0x110] sm:$0xf0]  ;;  %v7142_v57 = vld [vmem:[#allocation14 + $0x2e4] sm:$0xf] }
 0x44c   :  { %v3190_v32 = vsel %vm3180_vm5, %v9326_v6, %v3189_v8  ;;  %v7074_v6 = vld [vmem:[#allocation14 + $0xc4] sm:$0xf]  ;;  %v6334_v17 = vld [vmem:[#allocation14 + $0x2f0] sm:$0xf0] }
 0x44d   :  { %v3206_v0 = vrot.slane %v3190_v32, 7  ;;  %v6065_v36 = vor.u32 %v7074_v6, %v6062_v59  ;;  %v7062_v8 = vld [vmem:[#allocation14 + $0x64] sm:$0xf]  ;;  %v6014_v32 = vld [vmem:[#allocation14 + $0x70] sm:$0xf0] }
 0x44e   :  { %v6017_v41 = vor.u32 %v7062_v8, %v6014_v32  ;;  %v6337_v32 = vor.u32 %v7142_v57, %v6334_v17  ;;  %v6350_v57 = vld [vmem:[#allocation14 + $0x310] sm:$0xf0]  ;;  %v7206_v17 = vld [vmem:[#allocation14 + $0x4e4] sm:$0xf] }
 0x44f   :  { %v3207_v46 = vsel %vm3196_vm6, %v3206_v0, %v9312_v34  ;;  %v6209_v34 = vor.u32 %v7110_v48, %v6206_v63  ;;  %v6534_v48 = vld [vmem:[#allocation14 + $0x478] sm:$0xf0]  ;;  %v7223_v63 = vld [vmem:[#allocation14 + $0x56c] sm:$0xf] }
 0x450   :  { %v3208_v31 = vsel %vm3198_vm7, %v3206_v0, %v3207_v46  ;;  %v6142_v46 = vld [vmem:[#allocation14 + $0x170] sm:$0xf0]  ;;  %v6665_v61 = vor.u32 %v7223_v63, %v6662_v21  ;;  %v7134_v21 = vld [vmem:[#allocation14 + $0x2a4] sm:$0xf] }
 0x451   :  { %v3209_v1 = vsel %vm3200_vm8, %v3206_v0, %v3208_v31  ;;  %v7191_v31 = vld [vmem:[#allocation14 + $0x46c] sm:$0xf] }
 0x452   :  { %v3210_v25 = vsel %vm3202_vm9, %v3206_v0, %v3209_v1  ;;  %v7094_v0 = vld [vmem:[#allocation14 + $0x164] sm:$0xf]  ;;  %v6553_v1 = vor.u32 %v7195_v18, %v6550_v11  ;;  %v6537_v59 = vor.u32 %v7191_v31, %v6534_v48  ;;  %v6462_v18 = vld [vmem:[#allocation14 + $0x3f0] sm:$0xf0]  ;;  %v7179_v11 = vld [vmem:[#allocation14 + $0x40c] sm:$0xf] }
 0x453   :  { %3226 = vst [vmem:[#allocation1 + $0x20] ss:$4 sm:$0xff] %v3210_v25  ;;  %v6681_v25 = vor.u32 %v7227_v43, %v6678_v22  ;;  %v6145_v19 = vor.u32 %v7094_v0, %v6142_v46  ;;  %v6486_v43 = vld [vmem:[#allocation14 + $0x418] sm:$0xf0]  ;;  %v7211_v22 = vld [vmem:[#allocation14 + $0x50c] sm:$0xf] }
 0x454   :  { %v6489_v46 = vor.u32 %v7179_v11, %v6486_v43 }
 0x45a   :  { %v3231_v27 = vld.sshfl [vmem:[#allocation1 + $0x20] sm:$0xff pattern:$0x73625140]  ;;  %v3232_v45 = vld.sshfl [vmem:[#allocation1 + $0x28] sm:$0xff pattern:$0x73625140] }
 0x45b   :  { %v9406_v4 = vpack.c.bf16 %v3231_v27, %v3231_v27  ;;  %v9408_v53 = vpack.c.bf16 %v3232_v45, %v3232_v45  ;;  %v3233_v56 = vld.sshfl [vmem:[#allocation1 + $0x30] sm:$0xff pattern:$0x73625140]  ;;  %v3234_v14 = vld.sshfl [vmem:[#allocation1 + $0x38] sm:$0xff pattern:$0x73625140] }
 0x45c   :  { %v9414_v6 = vpack.c.bf16 %v3233_v56, %v3233_v56  ;;  %v9416_v27 = vpack.c.bf16 %v3234_v14, %v3234_v14  ;;  %v5998_v45 = vld [vmem:[#allocation14 + $0x50] sm:$0xf0]  ;;  %v7170_v56 = vld [vmem:[#allocation14 + $0x3c4] sm:$0xf] }
 0x45d   :  { %4847 = vmatmul.bf16.vlgmr.msra.gmra.mxu2 %v9406_v4  ;;  %4860 = vmatmul.bf16.vlgmr.msra.gmra.mxu3 %v9408_v53  ;;  %v6001_v30 = vor.u32 %v7058_v15, %v5998_v45  ;;  %v6446_v14 = vld [vmem:[#allocation14 + $0x3d0] sm:$0xf0] }
 0x45e   :  { %4891 = vmatpush.bf16.msra.mxu2 %v6081_v23  ;;  %4904 = vmatpush.bf16.msra.mxu3 %v6209_v34  ;;  %v7090_v23 = vld [vmem:[#allocation14 + $0x144] sm:$0xf]  ;;  %v6126_v34 = vld [vmem:[#allocation14 + $0x150] sm:$0xf0]  ;;  %v6449_v63 = vor.u32 %v7170_v56, %v6446_v14 }
 0x45f   :  { %5055 = vmatmul.bf16.vlgmr.msra.gmra.mxu0 %v9406_v4  ;;  %5068 = vmatmul.bf16.vlgmr.msra.gmra.mxu1 %v9408_v53  ;;  %v6129_v33 = vor.u32 %v7090_v23, %v6126_v34  ;;  %v6430_v15 = vld [vmem:[#allocation14 + $0x3b0] sm:$0xf0]  ;;  %v7130_v34 = vld [vmem:[#allocation14 + $0x284] sm:$0xf] }
 0x460   :  { %5151 = vmatpush.bf16.msra.mxu0 %v6601_v54  ;;  %5164 = vmatpush.bf16.msra.mxu1 %v6729_v49  ;;  %v6518_v54 = vld [vmem:[#allocation14 + $0x458] sm:$0xf0]  ;;  %v7219_v49 = vld [vmem:[#allocation14 + $0x54c] sm:$0xf]  ;;  %v6686_v56 = vld [vmem:[#allocation14 + $0x5b0] sm:$0xf0] }
 0x461   :  { %v6521_v39 = vor.u32 %v7187_v20, %v6518_v54  ;;  %v6649_v40 = vor.u32 %v7219_v49, %v6646_v9  ;;  %v6414_v20 = vld [vmem:[#allocation14 + $0x390] sm:$0xf0]  ;;  %v7158_v9 = vld [vmem:[#allocation14 + $0x364] sm:$0xf] }
 0x462   :  { %4892 = vmatpush.bf16.msra.mxu2 %v6065_v36  ;;  %4905 = vmatpush.bf16.msra.mxu3 %v6193_v10  ;;  %v5982_v36 = vld [vmem:[#allocation14 + $0x30] sm:$0xf0]  ;;  %v7086_v10 = vld [vmem:[#allocation14 + $0x124] sm:$0xf] }
 0x463   :  { %v5985_v29 = vor.u32 %v7054_v35, %v5982_v36  ;;  %v6113_v62 = vor.u32 %v7086_v10, %v6110_v24  ;;  %v6270_v49 = vld [vmem:[#allocation14 + $0x270] sm:$0xf0]  ;;  %v7122_v36 = vld [vmem:[#allocation14 + $0x244] sm:$0xf] }
 0x464   :  { %5152 = vmatpush.bf16.msra.mxu0 %v6585_v7  ;;  %5165 = vmatpush.bf16.msra.mxu1 %v6713_v51  ;;  %v6502_v7 = vld [vmem:[#allocation14 + $0x438] sm:$0xf0]  ;;  %v7215_v51 = vld [vmem:[#allocation14 + $0x52c] sm:$0xf]  ;;  %v6254_v10 = vld [vmem:[#allocation14 + $0x250] sm:$0xf0] }
 0x465   :  { %v6505_v52 = vor.u32 %v7183_v50, %v6502_v7  ;;  %v7154_v24 = vld [vmem:[#allocation14 + $0x344] sm:$0xf] }
 0x466   :  { %4893 = vmatpush.bf16.msra.mxu2 %v6049_v60  ;;  %4906 = vmatpush.bf16.msra.mxu3 %v6177_v3  ;;  %v5966_v60 = vld [vmem:[#allocation14 + $0x10] sm:$0xf0]  ;;  %v7082_v3 = vld [vmem:[#allocation14 + $0x104] sm:$0xf] }
 0x467   :  { %v6097_v8 = vor.u32 %v7082_v3, %v6094_v58  ;;  %v7118_v7 = vld [vmem:[#allocation14 + $0x224] sm:$0xf]  ;;  %v6222_v3 = vld [vmem:[#allocation14 + $0x210] sm:$0xf0] }
 0x468   :  { %5153 = vmatpush.bf16.msra.mxu0 %v6569_v42  ;;  %5166 = vmatpush.bf16.msra.mxu1 %v6697_v26  ;;  %v6633_v42 = vor.u32 %v7215_v51, %v6630_v47  ;;  %v7174_v26 = vld [vmem:[#allocation14 + $0x3e4] sm:$0xf]  ;;  %v6238_v51 = vld [vmem:[#allocation14 + $0x230] sm:$0xf0] }
 0x469   :  { %v6465_v0 = vor.u32 %v7174_v26, %v6462_v18  ;;  %v7150_v47 = vld [vmem:[#allocation14 + $0x324] sm:$0xf]  ;;  %v6718_v26 = vld [vmem:[#allocation14 + $0x5f0] sm:$0xf0] }
 0x46a   :  { %4894 = vmatpush.bf16.msra.mxu2 %v6033_v44  ;;  %4907 = vmatpush.bf16.msra.mxu3 %v6161_v12  ;;  %v6614_v44 = vld [vmem:[#allocation14 + $0x518] sm:$0xf0]  ;;  %v5969_v12 = vor.u32 %v7050_v16, %v5966_v60  ;;  %v7114_v60 = vld [vmem:[#allocation14 + $0x204] sm:$0xf] }
 0x46b   :  { %v6617_v31 = vor.u32 %v7211_v22, %v6614_v44  ;;  %v7146_v58 = vld [vmem:[#allocation14 + $0x304] sm:$0xf]  ;;  %v6225_v18 = vor.u32 %v7114_v60, %v6222_v3  ;;  %v6606_v60 = vld [vmem:[#allocation14 + $0x510] sm:$0xf0] }
 0x46c   :  { %5154 = vmatpush.bf16.msra.mxu0 %v6553_v1  ;;  %5167 = vmatpush.bf16.msra.mxu1 %v6681_v25  ;;  %v7138_v1 = vld [vmem:[#allocation14 + $0x2c4] sm:$0xf]  ;;  %v6318_v25 = vld [vmem:[#allocation14 + $0x2d0] sm:$0xf0]  ;;  %v6353_v11 = vor.u32 %v7146_v58, %v6350_v57 }
 0x46d   :  { %4873 = vmatmul.bf16.vlgmr.msrb.gmra.mxu2 %v9414_v6  ;;  %4886 = vmatmul.bf16.vlgmr.msrb.gmra.mxu3 %v9416_v27  ;;  %v6321_v48 = vor.u32 %v7138_v1, %v6318_v25  ;;  %v7202_v44 = vld [vmem:[#allocation14 + $0x4c4] sm:$0xf]  ;;  %v6558_v1 = vld [vmem:[#allocation14 + $0x4b0] sm:$0xf0] }
 0x46e   :  { %4895 = vmatpush.bf16.msra.mxu2 %v6017_v41  ;;  %4908 = vmatpush.bf16.msra.mxu3 %v6145_v19  ;;  %v6302_v41 = vld [vmem:[#allocation14 + $0x2b0] sm:$0xf0]  ;;  %v7166_v19 = vld [vmem:[#allocation14 + $0x3a4] sm:$0xf] }
 0x46f   :  { %5107 = vmatmul.bf16.vlgmr.msrb.gmra.mxu0 %v9164_v5  ;;  %5120 = vmatmul.bf16.vlgmr.msrb.gmra.mxu1 %v9166_v55  ;;  %v6305_v45 = vor.u32 %v7134_v21, %v6302_v41  ;;  %v6433_v23 = vor.u32 %v7166_v19, %v6430_v15  ;;  %v7230_v25 = vld [vmem:[#allocation14 + $0x5a4] sm:$0xf]  ;;  %v6542_v21 = vld [vmem:[#allocation14 + $0x490] sm:$0xf0] }
 0x470   :  { %5155 = vmatpush.bf16.msra.mxu0 %v6537_v59  ;;  %5168 = vmatpush.bf16.msra.mxu1 %v6665_v61  ;;  %v6286_v59 = vld [vmem:[#allocation14 + $0x290] sm:$0xf0]  ;;  %v7162_v61 = vld [vmem:[#allocation14 + $0x384] sm:$0xf] }
 0x471   :  { %v6417_v54 = vor.u32 %v7162_v61, %v6414_v20  ;;  %v7226_v41 = vld [vmem:[#allocation14 + $0x584] sm:$0xf]  ;;  %v6670_v19 = vld [vmem:[#allocation14 + $0x590] sm:$0xf0] }
 0x472   :  { %4896 = vmatpush.bf16.msra.mxu2 %v6001_v30  ;;  %4909 = vmatpush.bf16.msra.mxu3 %v6129_v33  ;;  %v6398_v30 = vld [vmem:[#allocation14 + $0x370] sm:$0xf0]  ;;  %v7270_v3 = vld [vmem:[#allocation14 + $0x6e4] sm:$0xf] }
 0x473   :  { %v6401_v35 = vor.u32 %v7158_v9, %v6398_v30  ;;  %v6654_v61 = vld [vmem:[#allocation14 + $0x570] sm:$0xf0] }
 0x474   :  { %5156 = vmatpush.bf16.msra.mxu0 %v6521_v39  ;;  %5169 = vmatpush.bf16.msra.mxu1 %v6649_v40  ;;  %v6382_v39 = vld [vmem:[#allocation14 + $0x350] sm:$0xf0]  ;;  %v6257_v40 = vor.u32 %v7122_v36, %v6254_v10  ;;  %v7182_v10 = vld [vmem:[#allocation14 + $0x424] sm:$0xf] }
 0x475   :  { %v6385_v50 = vor.u32 %v7154_v24, %v6382_v39  ;;  %v6638_v9 = vld [vmem:[#allocation14 + $0x550] sm:$0xf0]  ;;  %v7214_v39 = vld [vmem:[#allocation14 + $0x524] sm:$0xf] }
 0x476   :  { %4897 = vmatpush.bf16.msra.mxu2 %v5985_v29  ;;  %4910 = vmatpush.bf16.msra.mxu3 %v6113_v62  ;;  %v6366_v29 = vld [vmem:[#allocation14 + $0x330] sm:$0xf0]  ;;  %v6241_v62 = vor.u32 %v7118_v7, %v6238_v51  ;;  %v5259_v7 = vld [vmem:[#allocation17 + $0xc0] sm:$0xff] }
 0x477   :  { %v6369_v16 = vor.u32 %v7150_v47, %v6366_v29  ;;  %v5265_v30 = vld [vmem:[#allocation17 + $0xf0] sm:$0xff]  ;;  %v7178_v51 = vld [vmem:[#allocation14 + $0x404] sm:$0xf] }
 0x478   :  { %5157 = vmatpush.bf16.msra.mxu0 %v6505_v52  ;;  %5170 = vmatpush.bf16.msra.mxu1 %v6633_v42  ;;  %v6590_v52 = vld [vmem:[#allocation14 + $0x4f0] sm:$0xf0]  ;;  %v7238_v42 = vld [vmem:[#allocation14 + $0x5e4] sm:$0xf] }
 0x479   :  { %v6593_v43 = vor.u32 %v7206_v17, %v6590_v52  ;;  %v6721_v22 = vor.u32 %v7238_v42, %v6718_v26  ;;  %v6494_v24 = vld [vmem:[#allocation14 + $0x430] sm:$0xf0]  ;;  %v7302_v17 = vld [vmem:[#allocation14 + $0x7e4] sm:$0xf] }
 0x47a   :  { %4898 = vmatpush.bf16.msra.mxu2 %v5969_v12  ;;  %4911 = vmatpush.bf16.msra.mxu3 %v6097_v8  ;;  %v6574_v12 = vld [vmem:[#allocation14 + $0x4d0] sm:$0xf0]  ;;  %v7234_v8 = vld [vmem:[#allocation14 + $0x5c4] sm:$0xf]  ;;  %v6497_v47 = vor.u32 %v7182_v10, %v6494_v24 }
 0x47b   :  { %v6846_v58 = vld [vmem:[#allocation14 + $0x6f0] sm:$0xf0]  ;;  %v5255_v42 = vld [vmem:[#allocation17 + $0xa0] sm:$0xff] }
 0x47c   :  { %5158 = vmatpush.bf16.msra.mxu0 %v6489_v46  ;;  %5171 = vmatpush.bf16.msra.mxu1 %v6617_v31  ;;  %v7198_v31 = vld [vmem:[#allocation14 + $0x4a4] sm:$0xf]  ;;  %v5257_v57 = vld [vmem:[#allocation17 + $0xb0] sm:$0xff] }
 0x47d   :  { %4899 = vmatmul.bf16.vlgmr.msra.gmra.mxu2 %v9164_v5  ;;  %4912 = vmatmul.bf16.vlgmr.msra.gmra.mxu3 %v9166_v55  ;;  %v6289_v5 = vor.u32 %v7130_v34, %v6286_v59  ;;  %v7126_v55 = vld [vmem:[#allocation14 + $0x264] sm:$0xf]  ;;  %v6561_v14 = vor.u32 %v7198_v31, %v6558_v1  ;;  %v6526_v34 = vld [vmem:[#allocation14 + $0x470] sm:$0xf0] }
 0x47e   :  { %4917 = vmatpush.bf16.msrb.mxu2 %v6337_v32  ;;  %4930 = vmatpush.bf16.msrb.mxu3 %v6465_v0  ;;  %v6273_v33 = vor.u32 %v7126_v55, %v6270_v49  ;;  %v6702_v32 = vld [vmem:[#allocation14 + $0x5d0] sm:$0xf0]  ;;  %v6577_v0 = vor.u32 %v7202_v44, %v6574_v12  ;;  %v7222_v59 = vld [vmem:[#allocation14 + $0x564] sm:$0xf] }
 0x47f   :  { %5159 = vmatmul.bf16.vlgmr.msra.gmra.mxu0 %v9406_v4  ;;  %5172 = vmatmul.bf16.vlgmr.msra.gmra.mxu1 %v9408_v53  ;;  %v6705_v46 = vor.u32 %v7234_v8, %v6702_v32  ;;  %v6510_v55 = vld [vmem:[#allocation14 + $0x450] sm:$0xf0]  ;;  %v7218_v49 = vld [vmem:[#allocation14 + $0x544] sm:$0xf] }
 0x480   :  { %5363 = vmatpush.msrb.mxu0 %v5265_v30  ;;  %v6641_v36 = vor.u32 %v7218_v49, %v6638_v9  ;;  %v6974_v52 = vld [vmem:[#allocation14 + $0x7f0] sm:$0xf0]  ;;  %v7298_v12 = vld [vmem:[#allocation14 + $0x7c4] sm:$0xf] }
 0x481   :  { %v6830_v44 = vld [vmem:[#allocation14 + $0x6d0] sm:$0xf0]  ;;  %v7262_v1 = vld [vmem:[#allocation14 + $0x6a4] sm:$0xf] }
 0x482   :  { %4918 = vmatpush.bf16.msrb.mxu2 %v6321_v48  ;;  %4931 = vmatpush.bf16.msrb.mxu3 %v6449_v63  ;;  %v6689_v48 = vor.u32 %v7230_v25, %v6686_v56  ;;  %v7194_v63 = vld [vmem:[#allocation14 + $0x484] sm:$0xf]  ;;  %v6958_v8 = vld [vmem:[#allocation14 + $0x7d0] sm:$0xf0] }
 0x483   :  { %v6545_v15 = vor.u32 %v7194_v63, %v6542_v21  ;;  %v5253_v32 = vld [vmem:[#allocation17 + $0x90] sm:$0xff]  ;;  %v6961_v31 = vor.u32 %v7298_v12, %v6958_v8  ;;  %v7294_v56 = vld [vmem:[#allocation14 + $0x7a4] sm:$0xf]  ;;  %v5258_v8 = vld [vmem:[#allocation17 + $0xb8] sm:$0xff] }
 0x484   :  { %v6814_v25 = vld [vmem:[#allocation14 + $0x6b0] sm:$0xf0]  ;;  %v5247_v63 = vld [vmem:[#allocation17 + $0x60] sm:$0xff] }
 0x485   :  { %v6817_v21 = vor.u32 %v7262_v1, %v6814_v25  ;;  %v5239_v49 = vld [vmem:[#allocation17 + $0x20] sm:$0xff]  ;;  %v6894_v10 = vld [vmem:[#allocation14 + $0x750] sm:$0xf0]  ;;  %v7173_v25 = vld [vmem:[#allocation14 + $0x3d4] sm:$0xf0] }
 0x486   :  { %4919 = vmatpush.bf16.msrb.mxu2 %v6305_v45  ;;  %4932 = vmatpush.bf16.msrb.mxu3 %v6433_v23  ;;  %v6673_v45 = vor.u32 %v7226_v41, %v6670_v19  ;;  %v7190_v23 = vld [vmem:[#allocation14 + $0x464] sm:$0xf]  ;;  %v5237_v24 = vld [vmem:[#allocation17 + $0x10] sm:$0xff]  ;;  %v6452_v1 = vld [vmem:[#allocation14 + $0x3c8] sm:$0xf] }
 0x487   :  { %v6529_v20 = vor.u32 %v7190_v23, %v6526_v34  ;;  %v7258_v19 = vld [vmem:[#allocation14 + $0x684] sm:$0xf]  ;;  %v6926_v23 = vld [vmem:[#allocation14 + $0x790] sm:$0xf0] }
 0x488   :  { %v5245_v34 = vld [vmem:[#allocation17 + $0x50] sm:$0xff] }
 0x48a   :  { %4920 = vmatpush.bf16.msrb.mxu2 %v6289_v5  ;;  %4933 = vmatpush.bf16.msrb.mxu3 %v6417_v54  ;;  %v6657_v5 = vor.u32 %v7222_v59, %v6654_v61  ;;  %v7186_v54 = vld [vmem:[#allocation14 + $0x444] sm:$0xf] }
 0x48b   :  { %v5243_v59 = vld [vmem:[#allocation17 + $0x40] sm:$0xff] }
 0x48e   :  { %4921 = vmatpush.bf16.msrb.mxu2 %v6273_v33  ;;  %4934 = vmatpush.bf16.msrb.mxu3 %v6401_v35  ;;  %v5263_v33 = vld [vmem:[#allocation17 + $0xe0] sm:$0xff]  ;;  %v6513_v35 = vor.u32 %v7186_v54, %v6510_v55  ;;  %v6910_v54 = vld [vmem:[#allocation14 + $0x770] sm:$0xf0] }
 0x48f   :  { %5364 = vmatpush.msrb.mxu0 %v5263_v33  ;;  %v5241_v55 = vld [vmem:[#allocation17 + $0x30] sm:$0xff]  ;;  %v7250_v33 = vld [vmem:[#allocation14 + $0x644] sm:$0xf] }
 0x492   :  { %4922 = vmatpush.bf16.msrb.mxu2 %v6257_v40  ;;  %4935 = vmatpush.bf16.msrb.mxu3 %v6385_v50  ;;  %v6622_v40 = vld [vmem:[#allocation14 + $0x530] sm:$0xf0] }
 0x493   :  { %v5261_v50 = vld [vmem:[#allocation17 + $0xd0] sm:$0xff]  ;;  %v6625_v29 = vor.u32 %v7214_v39, %v6622_v40  ;;  %v5235_v39 = vld [vmem:[#allocation17] sm:$0xff]  ;;  %v5266_v40 = vld [vmem:[#allocation17 + $0xf8] sm:$0xff] }
 0x494   :  { %5365 = vmatpush.msrb.mxu0 %v5261_v50 }
 0x496   :  { %4923 = vmatpush.bf16.msrb.mxu2 %v6241_v62  ;;  %4936 = vmatpush.bf16.msrb.mxu3 %v6369_v16  ;;  %v6478_v62 = vld [vmem:[#allocation14 + $0x410] sm:$0xf0]  ;;  %v7210_v16 = vld [vmem:[#allocation14 + $0x504] sm:$0xf] }
 0x497   :  { %5366 = vmatpush.msrb.mxu0 %v5259_v7  ;;  %v6481_v26 = vor.u32 %v7178_v51, %v6478_v62  ;;  %v7246_v51 = vld [vmem:[#allocation14 + $0x624] sm:$0xf]  ;;  %v6878_v62 = vld [vmem:[#allocation14 + $0x730] sm:$0xf0] }
 0x499   :  { %5367 = vmatpush.msrb.mxu0 %v5257_v57  ;;  %v6734_v57 = vld [vmem:[#allocation14 + $0x610] sm:$0xf0] }
 0x49a   :  { %4924 = vmatpush.bf16.msrb.mxu2 %v6225_v18  ;;  %4937 = vmatpush.bf16.msrb.mxu3 %v6353_v11  ;;  %v6609_v18 = vor.u32 %v7210_v16, %v6606_v60  ;;  %v6849_v11 = vor.u32 %v7270_v3, %v6846_v58  ;;  %v5264_v16 = vld [vmem:[#allocation17 + $0xe8] sm:$0xff]  ;;  %v7242_v60 = vld [vmem:[#allocation14 + $0x604] sm:$0xf] }
 0x49b   :  { %5368 = vmatpush.msrb.mxu0 %v5255_v42  ;;  %v6862_v42 = vld [vmem:[#allocation14 + $0x710] sm:$0xf0] }
 0x49d   :  { %4925 = vmatmul.bf16.vlgmr.msrb.gmra.mxu2 %v9197_v2  ;;  %4938 = vmatmul.bf16.vlgmr.msrb.gmra.mxu3 %v9201_v13 }
 0x49e   :  { %4943 = vmatpush.bf16.msra.mxu2 %v6593_v43  ;;  %4956 = vmatpush.bf16.msra.mxu3 %v6721_v22  ;;  %v6977_v43 = vor.u32 %v7302_v17, %v6974_v52  ;;  %v7266_v22 = vld [vmem:[#allocation14 + $0x6c4] sm:$0xf]  ;;  %v5262_v52 = vld [vmem:[#allocation17 + $0xd8] sm:$0xff] }
 0x49f   :  { %5369 = vmatpush.msrb.mxu0 %v5253_v32  ;;  %v7274_v17 = vld [vmem:[#allocation14 + $0x704] sm:$0xf] }
 0x4a0   :  { %v6865_v12 = vor.u32 %v7274_v17, %v6862_v42  ;;  %v5238_v17 = vld [vmem:[#allocation17 + $0x18] sm:$0xff] }
 0x4a2   :  { %4944 = vmatpush.bf16.msra.mxu2 %v6577_v0  ;;  %4957 = vmatpush.bf16.msra.mxu3 %v6705_v46  ;;  %v5251_v0 = vld [vmem:[#allocation17 + $0x80] sm:$0xff]  ;;  %v6833_v46 = vor.u32 %v7266_v22, %v6830_v44  ;;  %v5260_v22 = vld [vmem:[#allocation17 + $0xc8] sm:$0xff]  ;;  %v6737_v44 = vor.u32 %v7242_v60, %v6734_v57 }
 0x4a3   :  { %5370 = vmatpush.msrb.mxu0 %v5251_v0  ;;  %v5240_v60 = vld [vmem:[#allocation17 + $0x28] sm:$0xff]  ;;  %v6244_v57 = vld [vmem:[#allocation14 + $0x228] sm:$0xf] }
 0x4a6   :  { %4945 = vmatpush.bf16.msra.mxu2 %v6561_v14  ;;  %4958 = vmatpush.bf16.msra.mxu3 %v6689_v48  ;;  %v6942_v14 = vld [vmem:[#allocation14 + $0x7b0] sm:$0xf0] }
 0x4a7   :  { %v5249_v48 = vld [vmem:[#allocation17 + $0x70] sm:$0xff]  ;;  %v6945_v41 = vor.u32 %v7294_v56, %v6942_v14  ;;  %v5256_v56 = vld [vmem:[#allocation17 + $0xa8] sm:$0xff] }
 0x4a8   :  { %5371 = vmatpush.msrb.mxu0 %v5249_v48  ;;  %v6453_v48 = vor.u32 %v7173_v25, %v6452_v1  ;;  %v6852_v1 = vld [vmem:[#allocation14 + $0x6e8] sm:$0xf]  ;;  %v7273_v25 = vld [vmem:[#allocation14 + $0x6f4] sm:$0xf0] }
 0x4aa   :  { %4946 = vmatpush.bf16.msra.mxu2 %v6545_v15  ;;  %4959 = vmatpush.bf16.msra.mxu3 %v6673_v45  ;;  %v6798_v15 = vld [vmem:[#allocation14 + $0x690] sm:$0xf0]  ;;  %v7290_v45 = vld [vmem:[#allocation14 + $0x784] sm:$0xf] }
 0x4ab   :  { %5372 = vmatpush.msrb.mxu0 %v5247_v63  ;;  %v6801_v61 = vor.u32 %v7258_v19, %v6798_v15  ;;  %v6308_v63 = vld [vmem:[#allocation14 + $0x2a8] sm:$0xf]  ;;  %v7169_v15 = vld [vmem:[#allocation14 + $0x3b4] sm:$0xf0] }
 0x4ac   :  { %v6436_v19 = vld [vmem:[#allocation14 + $0x3a8] sm:$0xf] }
 0x4ad   :  { %5373 = vmatpush.msrb.mxu0 %v5245_v34  ;;  %v6437_v34 = vor.u32 %v7169_v15, %v6436_v19  ;;  %v6853_v15 = vor.u32 %v7273_v25, %v6852_v1  ;;  %v6900_v1 = vld [vmem:[#allocation14 + $0x748] sm:$0xf]  ;;  %v7285_v25 = vld [vmem:[#allocation14 + $0x754] sm:$0xf0] }
 0x4ae   :  { %4947 = vmatpush.bf16.msra.mxu2 %v6529_v20  ;;  %4960 = vmatpush.bf16.msra.mxu3 %v6657_v5  ;;  %v7254_v20 = vld [vmem:[#allocation14 + $0x664] sm:$0xf] }
 0x4af   :  { %v7286_v5 = vld [vmem:[#allocation14 + $0x764] sm:$0xf]  ;;  %5374 = vmatpush.msrb.mxu0 %v5243_v59  ;;  %v6292_v59 = vld [vmem:[#allocation14 + $0x288] sm:$0xf] }
 0x4b0   :  { %v6913_v30 = vor.u32 %v7286_v5, %v6910_v54  ;;  %v5248_v5 = vld [vmem:[#allocation17 + $0x68] sm:$0xff] }
 0x4b1   :  { %5375 = vmatpush.msrb.mxu0 %v5241_v55 }
 0x4b2   :  { %4948 = vmatpush.bf16.msra.mxu2 %v6513_v35  ;;  %4961 = vmatpush.bf16.msra.mxu3 %v6641_v36  ;;  %v6766_v35 = vld [vmem:[#allocation14 + $0x650] sm:$0xf0]  ;;  %v7282_v36 = vld [vmem:[#allocation14 + $0x744] sm:$0xf] }
 0x4b3   :  { %5376 = vmatpush.msrb.mxu0 %v5239_v49  ;;  %v6769_v50 = vor.u32 %v7250_v33, %v6766_v35  ;;  %v6897_v7 = vor.u32 %v7282_v36, %v6894_v10  ;;  %v6276_v49 = vld [vmem:[#allocation14 + $0x268] sm:$0xf]  ;;  %v7129_v35 = vld [vmem:[#allocation14 + $0x274] sm:$0xf0] }
 0x4b4   :  { %v6404_v36 = vld [vmem:[#allocation14 + $0x368] sm:$0xf]  ;;  %v7161_v10 = vld [vmem:[#allocation14 + $0x374] sm:$0xf0] }
 0x4b5   :  { %5377 = vmatpush.msrb.mxu0 %v5237_v24  ;;  %v5244_v24 = vld [vmem:[#allocation17 + $0x48] sm:$0xff] }
 0x4b6   :  { %4949 = vmatpush.bf16.msra.mxu2 %v6497_v47  ;;  %4962 = vmatpush.bf16.msra.mxu3 %v6625_v29  ;;  %v6750_v47 = vld [vmem:[#allocation14 + $0x630] sm:$0xf0]  ;;  %v7278_v29 = vld [vmem:[#allocation14 + $0x724] sm:$0xf] }
 0x4b7   :  { %5378 = vmatpush.msrb.mxu0 %v5235_v39  ;;  %v6753_v3 = vor.u32 %v7246_v51, %v6750_v47  ;;  %v6881_v58 = vor.u32 %v7278_v29, %v6878_v62  ;;  %v6277_v39 = vor.u32 %v7129_v35, %v6276_v49  ;;  %v7125_v29 = vld [vmem:[#allocation14 + $0x254] sm:$0xf0]  ;;  %v6388_v62 = vld [vmem:[#allocation14 + $0x348] sm:$0xf] }
 0x4b8   :  { %v6820_v35 = vld [vmem:[#allocation14 + $0x6a8] sm:$0xf] }
 0x4b9   :  { %5443 = vmatpush.msra.mxu0 %v5266_v40  ;;  %v6405_v40 = vor.u32 %v7161_v10, %v6404_v36  ;;  %v7265_v10 = vld [vmem:[#allocation14 + $0x6b4] sm:$0xf0] }
 0x4ba   :  { %4950 = vmatpush.bf16.msra.mxu2 %v6481_v26  ;;  %4963 = vmatpush.bf16.msra.mxu3 %v6609_v18  ;;  %v6340_v26 = vld [vmem:[#allocation14 + $0x2e8] sm:$0xf]  ;;  %v7145_v18 = vld [vmem:[#allocation14 + $0x2f4] sm:$0xf0] }
 0x4bb   :  { %5444 = vmatpush.msra.mxu0 %v5264_v16  ;;  %v6341_v32 = vor.u32 %v7145_v18, %v6340_v26  ;;  %v7157_v16 = vld [vmem:[#allocation14 + $0x354] sm:$0xf0]  ;;  %v6372_v18 = vld [vmem:[#allocation14 + $0x328] sm:$0xf] }
 0x4bc   :  { %v7121_v26 = vld [vmem:[#allocation14 + $0x234] sm:$0xf0] }
 0x4bd   :  { %4951 = vmatmul.bf16.vlgmr.msra.gmra.mxu2 %v9406_v4  ;;  %4964 = vmatmul.bf16.vlgmr.msra.gmra.mxu3 %v9408_v53  ;;  %v6929_v4 = vor.u32 %v7290_v45, %v6926_v23  ;;  %v6782_v53 = vld [vmem:[#allocation14 + $0x670] sm:$0xf0]  ;;  %v5252_v45 = vld [vmem:[#allocation17 + $0x88] sm:$0xff] }
 0x4be   :  { %4969 = vmatpush.bf16.msrb.mxu2 %v6849_v11  ;;  %4982 = vmatpush.bf16.msrb.mxu3 %v6977_v43  ;;  %v6785_v9 = vor.u32 %v7254_v20, %v6782_v53  ;;  %v6468_v11 = vld [vmem:[#allocation14 + $0x3e8] sm:$0xf]  ;;  %v7177_v43 = vld [vmem:[#allocation14 + $0x3f4] sm:$0xf0] }
 0x4bf   :  { %5445 = vmatpush.msra.mxu0 %v5262_v52  ;;  %v6469_v0 = vor.u32 %v7177_v43, %v6468_v11  ;;  %v6420_v20 = vld [vmem:[#allocation14 + $0x388] sm:$0xf]  ;;  %v7165_v53 = vld [vmem:[#allocation14 + $0x394] sm:$0xf0]  ;;  %v5236_v43 = vld [vmem:[#allocation17 + $0x8] sm:$0xff] }
 0x4c0   :  { %v6421_v55 = vor.u32 %v7165_v53, %v6420_v20  ;;  %v7153_v11 = vld [vmem:[#allocation14 + $0x334] sm:$0xf0] }
 0x4c1   :  { %5446 = vmatpush.msra.mxu0 %v5260_v22  ;;  %v6245_v22 = vor.u32 %v7121_v26, %v6244_v57  ;;  %v7301_v20 = vld [vmem:[#allocation14 + $0x7d4] sm:$0xf0] }
 0x4c2   :  { %4970 = vmatpush.bf16.msrb.mxu2 %v6833_v46  ;;  %4983 = vmatpush.bf16.msrb.mxu3 %v6961_v31  ;;  %v6324_v46 = vld [vmem:[#allocation14 + $0x2c8] sm:$0xf]  ;;  %v7141_v31 = vld [vmem:[#allocation14 + $0x2d4] sm:$0xf0] }
 0x4c3   :  { %5447 = vmatpush.msra.mxu0 %v5258_v8  ;;  %v6325_v14 = vor.u32 %v7141_v31, %v6324_v46  ;;  %v7117_v8 = vld [vmem:[#allocation14 + $0x214] sm:$0xf0]  ;;  %v6356_v46 = vld [vmem:[#allocation14 + $0x308] sm:$0xf] }
 0x4c4   :  { %v7149_v31 = vld [vmem:[#allocation14 + $0x314] sm:$0xf0] }
 0x4c5   :  { %5448 = vmatpush.msra.mxu0 %v5256_v56  ;;  %v6980_v56 = vld [vmem:[#allocation14 + $0x7e8] sm:$0xf] }
 0x4c6   :  { %4971 = vmatpush.bf16.msrb.mxu2 %v6817_v21  ;;  %4984 = vmatpush.bf16.msrb.mxu3 %v6945_v41  ;;  %v5254_v21 = vld [vmem:[#allocation17 + $0x98] sm:$0xff]  ;;  %v7137_v41 = vld [vmem:[#allocation14 + $0x2b4] sm:$0xf0] }
 0x4c7   :  { %5449 = vmatpush.msra.mxu0 %v5254_v21  ;;  %v6309_v23 = vor.u32 %v7137_v41, %v6308_v63  ;;  %v6357_v21 = vor.u32 %v7149_v31, %v6356_v46  ;;  %v6772_v46 = vld [vmem:[#allocation14 + $0x648] sm:$0xf]  ;;  %v7253_v31 = vld [vmem:[#allocation14 + $0x654] sm:$0xf0] }
 0x4c9   :  { %5450 = vmatpush.msra.mxu0 %v5252_v45 }
 0x4ca   :  { %4972 = vmatpush.bf16.msrb.mxu2 %v6801_v61  ;;  %4985 = vmatpush.bf16.msrb.mxu3 %v6929_v4  ;;  %v5250_v61 = vld [vmem:[#allocation17 + $0x78] sm:$0xff]  ;;  %v7133_v4 = vld [vmem:[#allocation14 + $0x294] sm:$0xf0] }
 0x4cb   :  { %5451 = vmatpush.msra.mxu0 %v5250_v61  ;;  %v6293_v54 = vor.u32 %v7133_v4, %v6292_v59  ;;  %v9439_v61 = vld [vmem:[#allocation15] sm:$0xf]  ;;  %v6964_v4 = vld [vmem:[#allocation14 + $0x7c8] sm:$0xf] }
 0x4cd   :  { %5452 = vmatpush.msra.mxu0 %v5248_v5 }
 0x4ce   :  { %4973 = vmatpush.bf16.msrb.mxu2 %v6785_v9  ;;  %4986 = vmatpush.bf16.msrb.mxu3 %v6913_v30  ;;  %v5246_v9 = vld [vmem:[#allocation17 + $0x58] sm:$0xff] }
 0x4cf   :  { %5453 = vmatpush.msra.mxu0 %v5246_v9  ;;  %v6965_v9 = vor.u32 %v7301_v20, %v6964_v4 }
 0x4d1   :  { %5454 = vmatpush.msra.mxu0 %v5244_v24  ;;  %v6948_v24 = vld [vmem:[#allocation14 + $0x7a8] sm:$0xf] }
 0x4d2   :  { %4974 = vmatpush.bf16.msrb.mxu2 %v6769_v50  ;;  %4987 = vmatpush.bf16.msrb.mxu3 %v6897_v7  ;;  %v6260_v50 = vld [vmem:[#allocation14 + $0x248] sm:$0xf]  ;;  %v5242_v7 = vld [vmem:[#allocation17 + $0x38] sm:$0xff] }
 0x4d3   :  { %5455 = vmatpush.msra.mxu0 %v5242_v7 }
 0x4d5   :  { %5456 = vmatpush.msra.mxu0 %v5240_v60  ;;  %v7261_v60 = vld [vmem:[#allocation14 + $0x694] sm:$0xf0] }
 0x4d6   :  { %4975 = vmatpush.bf16.msrb.mxu2 %v6753_v3  ;;  %4988 = vmatpush.bf16.msrb.mxu3 %v6881_v58  ;;  %v6261_v3 = vor.u32 %v7125_v29, %v6260_v50  ;;  %v6389_v58 = vor.u32 %v7157_v16, %v6388_v62  ;;  %v6804_v62 = vld [vmem:[#allocation14 + $0x688] sm:$0xf] }
 0x4d7   :  { %5457 = vmatpush.msra.mxu0 %v5238_v17 }
 0x4d9   :  { %5458 = vmatpush.msra.mxu0 %v5236_v43 }
 0x4da   :  { %4976 = vmatpush.bf16.msrb.mxu2 %v6737_v44  ;;  %4989 = vmatpush.bf16.msrb.mxu3 %v6865_v12  ;;  %v6373_v44 = vor.u32 %v7153_v11, %v6372_v18  ;;  %v6228_v12 = vld [vmem:[#allocation14 + $0x208] sm:$0xf]  ;;  %v7257_v11 = vld [vmem:[#allocation14 + $0x674] sm:$0xf0] }
 0x4db   :  { %v6229_v63 = vor.u32 %v7117_v8, %v6228_v12  ;;  %v6788_v18 = vld [vmem:[#allocation14 + $0x668] sm:$0xf] }
 0x4dc   :  { %v9432_v30 = vpop.f32.mrf.mxu0  ;;  %v9434_v33 = vpop.f32.mrf.mxu1 }
 0x4dd   :  { %4977 = vmatmul.bf16.vlgmr.msrb.gmra.mxu2 %v9414_v6  ;;  %4990 = vmatmul.bf16.vlgmr.msrb.gmra.mxu3 %v9416_v27 }
 0x4de   :  { %5021 = vmatpush.bf16.msra.mxu2 %v6341_v32  ;;  %5034 = vmatpush.bf16.msra.mxu3 %v6469_v0 }
 0x4e0   :  { %v4848_v51 = vpop.f32.mrf.mxu2  ;;  %v4861_v47 = vpop.f32.mrf.mxu3 }
 0x4e2   :  { %5022 = vmatpush.bf16.msra.mxu2 %v6325_v14  ;;  %5035 = vmatpush.bf16.msra.mxu3 %v6453_v48  ;;  %v7305_v14 = vld [vmem:[#allocation14 + $0x7f4] sm:$0xf0]  ;;  %v4849_v48 = vadd.f32 %v4848_v51, %v9335_v38 }
 0x4e3   :  { %v6981_v45 = vor.u32 %v7305_v14, %v6980_v56 }
 0x4e4   :  { %v5058_v52 = vpop.f32.mrf.mxu0  ;;  %v5071_v42 = vpop.f32.mrf.mxu1  ;;  %v4862_v53 = vadd.f32 %v4861_v47, %v4849_v48  ;;  %v6821_v47 = vor.u32 %v7265_v10, %v6820_v35  ;;  %v6773_v48 = vor.u32 %v7253_v31, %v6772_v46  ;;  %v7175_v35 = vld [vmem:[#allocation14 + $0x3ec] sm:$0xf]  ;;  %v5289_v46 = vld [vmem:[#allocation17 + $0x1b0] sm:$0xff] }
 0x4e5   :  { %v6805_v42 = vor.u32 %v7261_v60, %v6804_v62  ;;  %v6454_v62 = vld [vmem:[#allocation14 + $0x3d8] sm:$0xf0] }
 0x4e6   :  { %5023 = vmatpush.bf16.msra.mxu2 %v6309_v23  ;;  %5036 = vmatpush.bf16.msra.mxu3 %v6437_v34  ;;  %v6836_v23 = vld [vmem:[#allocation14 + $0x6c8] sm:$0xf]  ;;  %v7269_v34 = vld [vmem:[#allocation14 + $0x6d4] sm:$0xf0] }
 0x4e7   :  { %v6837_v49 = vor.u32 %v7269_v34, %v6836_v23 }
 0x4e8   :  { %v4850_v32 = vpop.f32.mrf.mxu2  ;;  %v4863_v0 = vpop.f32.mrf.mxu3 }
 0x4e9   :  { %v6789_v32 = vor.u32 %v7257_v11, %v6788_v18 }
 0x4ea   :  { %5024 = vmatpush.bf16.msra.mxu2 %v6293_v54  ;;  %5037 = vmatpush.bf16.msra.mxu3 %v6421_v55  ;;  %v5205_v54 = vperm.slane %v9439_v61, 0  ;;  %v9445_v55 = vld [vmem:[%s9596_s12] sm:$0xf] }
 0x4eb   :  { %v5219_v50 = vperm.slane %v9445_v55, 0 }
 0x4ec   :  { %v5108_v41 = vpop.f32.mrf.mxu0  ;;  %v5121_v19 = vpop.f32.mrf.mxu1 }
 0x4ed   :  { %v9437_v59 = vadd.f32 %v5121_v19, %v5108_v41  ;;  %v7249_v19 = vld [vmem:[#allocation14 + $0x634] sm:$0xf0] }
 0x4ee   :  { %5025 = vmatpush.bf16.msra.mxu2 %v6277_v39  ;;  %5038 = vmatpush.bf16.msra.mxu3 %v6405_v40  ;;  %v7297_v39 = vld [vmem:[#allocation14 + $0x7b4] sm:$0xf0] }
 0x4ef   :  { %v6949_v29 = vor.u32 %v7297_v39, %v6948_v24 }
 0x4f0   :  { %v4874_v38 = vpop.f32.mrf.mxu2  ;;  %v4887_v5 = vpop.f32.mrf.mxu3 }
 0x4f1   :  { %v4875_v36 = vadd.f32 %v4874_v38, %v4862_v53  ;;  %v6740_v53 = vld [vmem:[#allocation14 + $0x608] sm:$0xf]  ;;  %v7245_v38 = vld [vmem:[#allocation14 + $0x614] sm:$0xf0] }
 0x4f2   :  { %5026 = vmatpush.bf16.msra.mxu2 %v6261_v3  ;;  %5039 = vmatpush.bf16.msra.mxu3 %v6389_v58  ;;  %v6932_v3 = vld [vmem:[#allocation14 + $0x788] sm:$0xf]  ;;  %v7293_v58 = vld [vmem:[#allocation14 + $0x794] sm:$0xf0]  ;;  %v6741_v39 = vor.u32 %v7245_v38, %v6740_v53 }
 0x4f3   :  { %v4888_v40 = vadd.f32 %v4887_v5, %v4875_v36  ;;  %v6933_v26 = vor.u32 %v7293_v58, %v6932_v3  ;;  %v6868_v5 = vld [vmem:[#allocation14 + $0x708] sm:$0xf]  ;;  %v6470_v36 = vld [vmem:[#allocation14 + $0x3f8] sm:$0xf0]  ;;  %v7135_v58 = vld [vmem:[#allocation14 + $0x2ac] sm:$0xf] }
 0x4f4   :  { %v5110_v7 = vpop.f32.mrf.mxu0  ;;  %v5123_v51 = vpop.f32.mrf.mxu1 }
 0x4f5   :  { %v5213_v16 = vmul.f32 %v5205_v54, %v4888_v40  ;;  %v7277_v54 = vld [vmem:[#allocation14 + $0x714] sm:$0xf0]  ;;  %v6473_v7 = vor.u32 %v7175_v35, %v6470_v36  ;;  %v7139_v51 = vld [vmem:[#allocation14 + $0x2cc] sm:$0xf] }
 0x4f6   :  { %5027 = vmatpush.bf16.msra.mxu2 %v6245_v22  ;;  %5040 = vmatpush.bf16.msra.mxu3 %v6373_v44  ;;  %v6916_v22 = vld [vmem:[#allocation14 + $0x768] sm:$0xf]  ;;  %v7289_v44 = vld [vmem:[#allocation14 + $0x774] sm:$0xf0]  ;;  %v6869_v40 = vor.u32 %v7277_v54, %v6868_v5  ;;  %v7119_v5 = vld [vmem:[#allocation14 + $0x22c] sm:$0xf] }
 0x4f7   :  { %v5227_v57 = vadd.f32 %v5219_v50, %v5213_v16  ;;  %v6917_v0 = vor.u32 %v7289_v44, %v6916_v22  ;;  %v5297_v16 = vld [vmem:[#allocation17 + $0x1f0] sm:$0xff]  ;;  %v6294_v22 = vld [vmem:[#allocation14 + $0x298] sm:$0xf0]  ;;  %v7163_v44 = vld [vmem:[#allocation14 + $0x38c] sm:$0xf] }
 0x4f8   :  { %v4876_v17 = vpop.f32.mrf.mxu2  ;;  %v4889_v52 = vpop.f32.mrf.mxu3  ;;  %5383 = vmatpush.msrb.mxu1 %v5297_v16  ;;  %v6246_v54 = vld [vmem:[#allocation14 + $0x238] sm:$0xf0]  ;;  %v7151_v36 = vld [vmem:[#allocation14 + $0x32c] sm:$0xf] }
 0x4f9   :  { %v5231_v43 = vmax.f32 %v5227_v57, 0.0  ;;  %v6310_v57 = vld [vmem:[#allocation14 + $0x2b8] sm:$0xf0]  ;;  %v7167_v17 = vld [vmem:[#allocation14 + $0x3ac] sm:$0xf] }
 0x4fa   :  { %5028 = vmatpush.bf16.msra.mxu2 %v6229_v63  ;;  %5041 = vmatpush.bf16.msra.mxu3 %v6357_v21  ;;  %v6901_v63 = vor.u32 %v7285_v25, %v6900_v1  ;;  %v6756_v21 = vld [vmem:[#allocation14 + $0x628] sm:$0xf]  ;;  %v6438_v52 = vld [vmem:[#allocation14 + $0x3b8] sm:$0xf0]  ;;  %v6313_v18 = vor.u32 %v7135_v58, %v6310_v57  ;;  %v7127_v25 = vld [vmem:[#allocation14 + $0x26c] sm:$0xf] }
 0x4fb   :  { %5379 = vmatmul.f32.vlgmr.msrb.gmra.mxu0 %v5231_v43  ;;  %v6757_v4 = vor.u32 %v7249_v19, %v6756_v21  ;;  %v6441_v11 = vor.u32 %v7167_v17, %v6438_v52  ;;  %v5285_v21 = vld [vmem:[#allocation17 + $0x190] sm:$0xff]  ;;  %v6854_v16 = vld [vmem:[#allocation14 + $0x6f8] sm:$0xf0]  ;;  %v5275_v58 = vld [vmem:[#allocation17 + $0x140] sm:$0xff] }
 0x4fc   :  { %v9450_v12 = vpop.f32.mrf.mxu0  ;;  %v9452_v8 = vpop.f32.mrf.mxu1  ;;  %v5273_v57 = vld [vmem:[#allocation17 + $0x130] sm:$0xff] }
 0x4fd   :  { %5029 = vmatmul.bf16.vlgmr.msra.gmra.mxu2 %v9197_v2  ;;  %5042 = vmatmul.bf16.vlgmr.msra.gmra.mxu3 %v9201_v13 }
 0x4fe   :  { %5073 = vmatpush.bf16.msrb.mxu2 %v6853_v15  ;;  %5086 = vmatpush.bf16.msrb.mxu3 %v6981_v45  ;;  %v6884_v15 = vld [vmem:[#allocation14 + $0x728] sm:$0xf]  ;;  %v7281_v45 = vld [vmem:[#allocation14 + $0x734] sm:$0xf0] }
 0x4ff   :  { %v6885_v20 = vor.u32 %v7281_v45, %v6884_v15  ;;  %v7123_v45 = vld [vmem:[#allocation14 + $0x24c] sm:$0xf] }
 0x500   :  { %v4900_v56 = vpop.f32.mrf.mxu2  ;;  %v4913_v14 = vpop.f32.mrf.mxu3 }
 0x501   :  { %v9454_v41 = vadd.f32 %v4913_v14, %v4900_v56  ;;  %v6278_v56 = vld [vmem:[#allocation14 + $0x278] sm:$0xf0]  ;;  %v7159_v14 = vld [vmem:[#allocation14 + $0x36c] sm:$0xf] }
 0x502   :  { %5074 = vmatpush.bf16.msrb.mxu2 %v6837_v49  ;;  %5087 = vmatpush.bf16.msrb.mxu3 %v6965_v9  ;;  %v7143_v49 = vld [vmem:[#allocation14 + $0x2ec] sm:$0xf]  ;;  %v6342_v9 = vld [vmem:[#allocation14 + $0x2f8] sm:$0xf0]  ;;  %v6281_v19 = vor.u32 %v7127_v25, %v6278_v56  ;;  %v5267_v56 = vld [vmem:[#allocation17 + $0x100] sm:$0xff] }
 0x503   :  { %5459 = vmatmul.f32.vlgmr.msra.gmra.mxu0 %v5231_v43  ;;  %v6345_v50 = vor.u32 %v7143_v49, %v6342_v9  ;;  %v7131_v43 = vld [vmem:[#allocation14 + $0x28c] sm:$0xf]  ;;  %v5281_v49 = vld [vmem:[#allocation17 + $0x170] sm:$0xff] }
 0x504   :  { %v5162_v23 = vpop.f32.mrf.mxu0  ;;  %v5175_v34 = vpop.f32.mrf.mxu1  ;;  %v6297_v31 = vor.u32 %v7131_v43, %v6294_v22  ;;  %v7267_v43 = vld [vmem:[#allocation14 + $0x6cc] sm:$0xf]  ;;  %v5271_v22 = vld [vmem:[#allocation17 + $0x120] sm:$0xff] }
 0x505   :  { %v6262_v23 = vld [vmem:[#allocation14 + $0x258] sm:$0xf0]  ;;  %v7155_v34 = vld [vmem:[#allocation14 + $0x34c] sm:$0xf] }
 0x506   :  { %5075 = vmatpush.bf16.msrb.mxu2 %v6821_v47  ;;  %5088 = vmatpush.bf16.msrb.mxu3 %v6949_v29  ;;  %v6326_v47 = vld [vmem:[#allocation14 + $0x2d8] sm:$0xf0]  ;;  %v7171_v29 = vld [vmem:[#allocation14 + $0x3cc] sm:$0xf]  ;;  %v6265_v53 = vor.u32 %v7123_v45, %v6262_v23 }
 0x507   :  { %v6329_v60 = vor.u32 %v7139_v51, %v6326_v47  ;;  %v6457_v3 = vor.u32 %v7171_v29, %v6454_v62  ;;  %v6230_v51 = vld [vmem:[#allocation14 + $0x218] sm:$0xf0]  ;;  %v7147_v47 = vld [vmem:[#allocation14 + $0x30c] sm:$0xf] }
 0x508   :  { %v4902_v10 = vpop.f32.mrf.mxu2  ;;  %v4915_v24 = vpop.f32.mrf.mxu3  ;;  %v6358_v29 = vld [vmem:[#allocation14 + $0x318] sm:$0xf0]  ;;  %v7271_v62 = vld [vmem:[#allocation14 + $0x6ec] sm:$0xf] }
 0x509   :  { %v6374_v10 = vld [vmem:[#allocation14 + $0x338] sm:$0xf0]  ;;  %v5279_v24 = vld [vmem:[#allocation17 + $0x160] sm:$0xff]  ;;  %v6361_v52 = vor.u32 %v7147_v47, %v6358_v29  ;;  %v7263_v25 = vld [vmem:[#allocation14 + $0x6ac] sm:$0xf] }
 0x50a   :  { %5076 = vmatpush.bf16.msrb.mxu2 %v6805_v42  ;;  %5089 = vmatpush.bf16.msrb.mxu3 %v6933_v26  ;;  %v5295_v42 = vld [vmem:[#allocation17 + $0x1e0] sm:$0xff]  ;;  %v5293_v26 = vld [vmem:[#allocation17 + $0x1d0] sm:$0xff]  ;;  %v7259_v45 = vld [vmem:[#allocation14 + $0x68c] sm:$0xf] }
 0x50b   :  { %5384 = vmatpush.msrb.mxu1 %v5295_v42  ;;  %v5296_v23 = vld [vmem:[#allocation17 + $0x1e8] sm:$0xff]  ;;  %v6902_v47 = vld [vmem:[#allocation14 + $0x758] sm:$0xf0] }
 0x50c   :  { %v5286_v29 = vld [vmem:[#allocation17 + $0x198] sm:$0xff] }
 0x50d   :  { %5385 = vmatpush.msrb.mxu1 %v5293_v26 }
 0x50e   :  { %5077 = vmatpush.bf16.msrb.mxu2 %v6789_v32  ;;  %5090 = vmatpush.bf16.msrb.mxu3 %v6917_v0  ;;  %v6422_v32 = vld [vmem:[#allocation14 + $0x398] sm:$0xf0]  ;;  %v5291_v0 = vld [vmem:[#allocation17 + $0x1c0] sm:$0xff] }
 0x50f   :  { %5386 = vmatpush.msrb.mxu1 %v5291_v0  ;;  %v6425_v1 = vor.u32 %v7163_v44, %v6422_v32  ;;  %v6838_v44 = vld [vmem:[#allocation14 + $0x6d8] sm:$0xf0]  ;;  %v7299_v32 = vld [vmem:[#allocation14 + $0x7cc] sm:$0xf] }
 0x510   :  { %v6966_v0 = vld [vmem:[#allocation14 + $0x7d8] sm:$0xf0] }
 0x511   :  { %5387 = vmatpush.msrb.mxu1 %v5289_v46  ;;  %v5269_v46 = vld [vmem:[#allocation17 + $0x110] sm:$0xff] }
 0x512   :  { %5078 = vmatpush.bf16.msrb.mxu2 %v6773_v48  ;;  %5091 = vmatpush.bf16.msrb.mxu3 %v6901_v63  ;;  %v6406_v48 = vld [vmem:[#allocation14 + $0x378] sm:$0xf0]  ;;  %v5287_v63 = vld [vmem:[#allocation17 + $0x1a0] sm:$0xff] }
 0x513   :  { %5388 = vmatpush.msrb.mxu1 %v5287_v63  ;;  %v6409_v15 = vor.u32 %v7159_v14, %v6406_v48  ;;  %v6822_v14 = vld [vmem:[#allocation14 + $0x6b8] sm:$0xf0]  ;;  %v7295_v48 = vld [vmem:[#allocation14 + $0x7ac] sm:$0xf] }
 0x514   :  { %v6950_v63 = vld [vmem:[#allocation14 + $0x7b8] sm:$0xf0] }
 0x515   :  { %5389 = vmatpush.msrb.mxu1 %v5285_v21  ;;  %v5298_v21 = vld [vmem:[#allocation17 + $0x1f8] sm:$0xff] }
 0x516   :  { %5079 = vmatpush.bf16.msrb.mxu2 %v6757_v4  ;;  %5092 = vmatpush.bf16.msrb.mxu3 %v6885_v20  ;;  %v6390_v4 = vld [vmem:[#allocation14 + $0x358] sm:$0xf0]  ;;  %v5283_v20 = vld [vmem:[#allocation17 + $0x180] sm:$0xff] }
 0x517   :  { %5390 = vmatpush.msrb.mxu1 %v5283_v20  ;;  %v6393_v38 = vor.u32 %v7155_v34, %v6390_v4  ;;  %v6806_v34 = vld [vmem:[#allocation14 + $0x698] sm:$0xf0]  ;;  %v7291_v4 = vld [vmem:[#allocation14 + $0x78c] sm:$0xf] }
 0x518   :  { %v6934_v20 = vld [vmem:[#allocation14 + $0x798] sm:$0xf0] }
 0x519   :  { %5391 = vmatpush.msrb.mxu1 %v5281_v49  ;;  %v7287_v49 = vld [vmem:[#allocation14 + $0x76c] sm:$0xf] }
 0x51a   :  { %5080 = vmatpush.bf16.msrb.mxu2 %v6741_v39  ;;  %5093 = vmatpush.bf16.msrb.mxu3 %v6869_v40  ;;  %v5277_v39 = vld [vmem:[#allocation17 + $0x150] sm:$0xff]  ;;  %v7115_v40 = vld [vmem:[#allocation14 + $0x20c] sm:$0xf] }
 0x51b   :  { %5392 = vmatpush.msrb.mxu1 %v5279_v24  ;;  %v6233_v17 = vor.u32 %v7115_v40, %v6230_v51  ;;  %v7251_v40 = vld [vmem:[#allocation14 + $0x64c] sm:$0xf] }
 0x51c   :  { %v7283_v51 = vld [vmem:[#allocation14 + $0x74c] sm:$0xf] }
 0x51d   :  { %5081 = vmatmul.bf16.vlgmr.msrb.gmra.mxu2 %v9414_v6  ;;  %5094 = vmatmul.bf16.vlgmr.msrb.gmra.mxu3 %v9416_v27 }
 0x51e   :  { %5125 = vmatpush.bf16.msra.mxu2 %v6345_v50  ;;  %5138 = vmatpush.bf16.msra.mxu3 %v6473_v7  ;;  %v6249_v50 = vor.u32 %v7119_v5, %v6246_v54  ;;  %v6377_v7 = vor.u32 %v7151_v36, %v6374_v10  ;;  %v7255_v5 = vld [vmem:[#allocation14 + $0x66c] sm:$0xf]  ;;  %v6790_v54 = vld [vmem:[#allocation14 + $0x678] sm:$0xf0] }
 0x51f   :  { %5393 = vmatpush.msrb.mxu1 %v5277_v39  ;;  %v6918_v36 = vld [vmem:[#allocation14 + $0x778] sm:$0xf0]  ;;  %v6793_v24 = vor.u32 %v7255_v5, %v6790_v54 }
 0x520   :  { %v9458_v9 = vpop.f32.mrf.mxu2  ;;  %v9460_v35 = vpop.f32.mrf.mxu3  ;;  %v5290_v10 = vld [vmem:[#allocation17 + $0x1b8] sm:$0xff]  ;;  %v6921_v39 = vor.u32 %v7287_v49, %v6918_v36 }
 0x521   :  { %5394 = vmatpush.msrb.mxu1 %v5275_v58 }
 0x522   :  { %5126 = vmatpush.bf16.msra.mxu2 %v6329_v60  ;;  %5139 = vmatpush.bf16.msra.mxu3 %v6457_v3  ;;  %v7303_v60 = vld [vmem:[#allocation14 + $0x7ec] sm:$0xf]  ;;  %v6982_v3 = vld [vmem:[#allocation14 + $0x7f8] sm:$0xf0] }
 0x523   :  { %5395 = vmatpush.msrb.mxu1 %v5273_v57 }
 0x525   :  { %5396 = vmatpush.msrb.mxu1 %v5271_v22  ;;  %v5280_v22 = vld [vmem:[#allocation17 + $0x168] sm:$0xff] }
 0x526   :  { %5127 = vmatpush.bf16.msra.mxu2 %v6313_v18  ;;  %5140 = vmatpush.bf16.msra.mxu3 %v6441_v11  ;;  %v6857_v18 = vor.u32 %v7271_v62, %v6854_v16  ;;  %v6985_v11 = vor.u32 %v7303_v60, %v6982_v3  ;;  %v6905_v16 = vor.u32 %v7283_v51, %v6902_v47  ;;  %v7247_v60 = vld [vmem:[#allocation14 + $0x62c] sm:$0xf]  ;;  %v5303_v51 = vld [vmem:[#allocation17 + $0x220] sm:$0xff] }
 0x527   :  { %5397 = vmatpush.msrb.mxu1 %v5269_v46  ;;  %v5284_v3 = vld [vmem:[#allocation17 + $0x188] sm:$0xff]  ;;  %v5278_v46 = vld [vmem:[#allocation17 + $0x158] sm:$0xff] }
 0x528   :  { %v4928_v42 = vpop.f32.mrf.mxu2  ;;  %v4941_v26 = vpop.f32.mrf.mxu3 }
 0x529   :  { %5398 = vmatpush.msrb.mxu1 %v5267_v56  ;;  %v6886_v42 = vld [vmem:[#allocation14 + $0x738] sm:$0xf0] }
 0x52a   :  { %5128 = vmatpush.bf16.msra.mxu2 %v6297_v31  ;;  %5141 = vmatpush.bf16.msra.mxu3 %v6425_v1  ;;  %v6841_v31 = vor.u32 %v7267_v43, %v6838_v44  ;;  %v6969_v1 = vor.u32 %v7299_v32, %v6966_v0  ;;  %v5282_v26 = vld [vmem:[#allocation17 + $0x178] sm:$0xff]  ;;  %v7243_v43 = vld [vmem:[#allocation14 + $0x60c] sm:$0xf] }
 0x52b   :  { %5463 = vmatpush.msra.mxu1 %v5298_v21  ;;  %v6742_v44 = vld [vmem:[#allocation14 + $0x618] sm:$0xf0]  ;;  %v7275_v32 = vld [vmem:[#allocation14 + $0x70c] sm:$0xf] }
 0x52c   :  { %v6870_v0 = vld [vmem:[#allocation14 + $0x718] sm:$0xf0]  ;;  %v5272_v21 = vld [vmem:[#allocation17 + $0x128] sm:$0xff] }
 0x52d   :  { %5464 = vmatpush.msra.mxu1 %v5296_v23  ;;  %v5268_v23 = vld [vmem:[#allocation17 + $0x108] sm:$0xff] }
 0x52e   :  { %5129 = vmatpush.bf16.msra.mxu2 %v6281_v19  ;;  %5142 = vmatpush.bf16.msra.mxu3 %v6409_v15  ;;  %v6825_v19 = vor.u32 %v7263_v25, %v6822_v14  ;;  %v6953_v15 = vor.u32 %v7295_v48, %v6950_v63  ;;  %v5276_v25 = vld [vmem:[#allocation17 + $0x148] sm:$0xff]  ;;  %v5274_v48 = vld [vmem:[#allocation17 + $0x138] sm:$0xff]  ;;  %v5329_v63 = vld [vmem:[#allocation17 + $0x2f0] sm:$0xff] }
 0x532   :  { %5130 = vmatpush.bf16.msra.mxu2 %v6265_v53  ;;  %5143 = vmatpush.bf16.msra.mxu3 %v6393_v38  ;;  %v5294_v53 = vld [vmem:[#allocation17 + $0x1d8] sm:$0xff]  ;;  %v6809_v38 = vor.u32 %v7259_v45, %v6806_v34  ;;  %v5325_v45 = vld [vmem:[#allocation17 + $0x2d0] sm:$0xff]  ;;  %v5323_v34 = vld [vmem:[#allocation17 + $0x2c0] sm:$0xff] }
 0x533   :  { %5465 = vmatpush.msra.mxu1 %v5294_v53  ;;  %v5319_v53 = vld [vmem:[#allocation17 + $0x2a0] sm:$0xff] }
 0x536   :  { %5131 = vmatpush.bf16.msra.mxu2 %v6249_v50  ;;  %5144 = vmatpush.bf16.msra.mxu3 %v6377_v7  ;;  %v5288_v50 = vld [vmem:[#allocation17 + $0x1a8] sm:$0xff]  ;;  %v6774_v7 = vld [vmem:[#allocation14 + $0x658] sm:$0xf0] }
 0x537   :  { %v6777_v62 = vor.u32 %v7251_v40, %v6774_v7  ;;  %v5307_v40 = vld [vmem:[#allocation17 + $0x240] sm:$0xff] }
 0x53a   :  { %5132 = vmatpush.bf16.msra.mxu2 %v6233_v17  ;;  %5145 = vmatpush.bf16.msra.mxu3 %v6361_v52  ;;  %v6758_v17 = vld [vmem:[#allocation14 + $0x638] sm:$0xf0]  ;;  %v7279_v52 = vld [vmem:[#allocation14 + $0x72c] sm:$0xf] }
 0x53d   :  { %5133 = vmatmul.bf16.vlgmr.msra.gmra.mxu2 %v9197_v2  ;;  %5146 = vmatmul.bf16.vlgmr.msra.gmra.mxu3 %v9201_v13  ;;  %v6937_v2 = vor.u32 %v7291_v4, %v6934_v20  ;;  %v5292_v13 = vld [vmem:[#allocation17 + $0x1c8] sm:$0xff]  ;;  %v4927_v4 = vadd.f32 %v9458_v9, %v9454_v41  ;;  %v5321_v20 = vld [vmem:[#allocation17 + $0x2b0] sm:$0xff]  ;;  %v5206_v41 = vperm.slane %v9439_v61, 1  ;;  %v5311_v9 = vld [vmem:[#allocation17 + $0x260] sm:$0xff] }
 0x53e   :  { %5177 = vmatpush.bf16.msrb.mxu2 %v6857_v18  ;;  %5190 = vmatpush.bf16.msrb.mxu3 %v6985_v11  ;;  %v6761_v18 = vor.u32 %v7247_v60, %v6758_v17  ;;  %v6889_v11 = vor.u32 %v7279_v52, %v6886_v42  ;;  %v5299_v60 = vld [vmem:[#allocation17 + $0x200] sm:$0xff]  ;;  %v5324_v17 = vld [vmem:[#allocation17 + $0x2c8] sm:$0xff]  ;;  %v5322_v52 = vld [vmem:[#allocation17 + $0x2b8] sm:$0xff] }
 0x53f   :  { %5466 = vmatpush.msra.mxu1 %v5292_v13  ;;  %v5313_v13 = vld [vmem:[#allocation17 + $0x270] sm:$0xff]  ;;  %v5320_v42 = vld [vmem:[#allocation17 + $0x2a8] sm:$0xff] }
 0x540   :  { %v4952_v58 = vpop.f32.mrf.mxu2  ;;  %v4965_v57 = vpop.f32.mrf.mxu3 }
 0x541   :  { %5467 = vmatpush.msra.mxu1 %v5290_v10  ;;  %v5309_v10 = vld [vmem:[#allocation17 + $0x250] sm:$0xff] }
 0x542   :  { %5178 = vmatpush.bf16.msrb.mxu2 %v6841_v31  ;;  %5191 = vmatpush.bf16.msrb.mxu3 %v6969_v1  ;;  %v6745_v31 = vor.u32 %v7243_v43, %v6742_v44  ;;  %v6873_v1 = vor.u32 %v7275_v32, %v6870_v0  ;;  %v5312_v44 = vld [vmem:[#allocation17 + $0x268] sm:$0xff]  ;;  %v5310_v32 = vld [vmem:[#allocation17 + $0x258] sm:$0xff] }
 0x543   :  { %5468 = vmatpush.msra.mxu1 %v5288_v50  ;;  %v5305_v50 = vld [vmem:[#allocation17 + $0x230] sm:$0xff]  ;;  %v5308_v0 = vld [vmem:[#allocation17 + $0x248] sm:$0xff] }
 0x545   :  { %5469 = vmatpush.msra.mxu1 %v5286_v29 }
 0x546   :  { %5179 = vmatpush.bf16.msrb.mxu2 %v6825_v19  ;;  %5192 = vmatpush.bf16.msrb.mxu3 %v6953_v15  ;;  %v5327_v19 = vld [vmem:[#allocation17 + $0x2e0] sm:$0xff]  ;;  %v5270_v15 = vld [vmem:[#allocation17 + $0x118] sm:$0xff] }
 0x547   :  { %5470 = vmatpush.msra.mxu1 %v5284_v3  ;;  %v5330_v3 = vld [vmem:[#allocation17 + $0x2f8] sm:$0xff] }
 0x548   :  { %v4954_v56 = vpop.f32.mrf.mxu2  ;;  %v4967_v14 = vpop.f32.mrf.mxu3 }
 0x549   :  { %5471 = vmatpush.msra.mxu1 %v5282_v26  ;;  %v5318_v26 = vld [vmem:[#allocation17 + $0x298] sm:$0xff]  ;;  %v5304_v56 = vld [vmem:[#allocation17 + $0x228] sm:$0xff]  ;;  %v5359_v14 = vld [vmem:[#allocation17 + $0x3e0] sm:$0xff] }
 0x54a   :  { %5180 = vmatpush.bf16.msrb.mxu2 %v6809_v38  ;;  %5193 = vmatpush.bf16.msrb.mxu3 %v6937_v2  ;;  %v5317_v38 = vld [vmem:[#allocation17 + $0x290] sm:$0xff]  ;;  %v5315_v2 = vld [vmem:[#allocation17 + $0x280] sm:$0xff] }
 0x54b   :  { %5472 = vmatpush.msra.mxu1 %v5280_v22  ;;  %v5314_v22 = vld [vmem:[#allocation17 + $0x278] sm:$0xff] }
 0x54d   :  { %5473 = vmatpush.msra.mxu1 %v5278_v46 }
 0x54e   :  { %5181 = vmatpush.bf16.msrb.mxu2 %v6793_v24  ;;  %5194 = vmatpush.bf16.msrb.mxu3 %v6921_v39 }
 0x54f   :  { %5474 = vmatpush.msra.mxu1 %v5276_v25  ;;  %v5361_v25 = vld [vmem:[#allocation17 + $0x3f0] sm:$0xff] }
 0x551   :  { %5475 = vmatpush.msra.mxu1 %v5274_v48  ;;  %v5357_v48 = vld [vmem:[#allocation17 + $0x3d0] sm:$0xff] }
 0x552   :  { %5182 = vmatpush.bf16.msrb.mxu2 %v6777_v62  ;;  %5195 = vmatpush.bf16.msrb.mxu3 %v6905_v16  ;;  %v5301_v16 = vld [vmem:[#allocation17 + $0x210] sm:$0xff] }
 0x553   :  { %5476 = vmatpush.msra.mxu1 %v5272_v21  ;;  %v5300_v21 = vld [vmem:[#allocation17 + $0x208] sm:$0xff] }
 0x555   :  { %5477 = vmatpush.msra.mxu1 %v5270_v15 }
 0x556   :  { %5183 = vmatpush.bf16.msrb.mxu2 %v6761_v18  ;;  %5196 = vmatpush.bf16.msrb.mxu3 %v6889_v11  ;;  %v5316_v18 = vld [vmem:[#allocation17 + $0x288] sm:$0xff] }
 0x557   :  { %5478 = vmatpush.msra.mxu1 %v5268_v23  ;;  %v5353_v23 = vld [vmem:[#allocation17 + $0x3b0] sm:$0xff] }
 0x55a   :  { %5184 = vmatpush.bf16.msrb.mxu2 %v6745_v31  ;;  %5197 = vmatpush.bf16.msrb.mxu3 %v6873_v1  ;;  %v5306_v1 = vld [vmem:[#allocation17 + $0x238] sm:$0xff] }
 0x55d   :  { %5185 = vmatmul.bf16.vlgmr.msrb.gmra.mxu2 %v9414_v6  ;;  %5198 = vmatmul.bf16.vlgmr.msrb.gmra.mxu3 %v9416_v27  ;;  %v4940_v6 = vadd.f32 %v9460_v35, %v4927_v4  ;;  %v5220_v35 = vperm.slane %v9445_v55, 1 }
 0x55e   :  { %5403 = vmatpush.msra.mxu2 %v5329_v63  ;;  %5423 = vmatpush.msra.mxu3 %v5361_v25  ;;  %v5302_v63 = vld [vmem:[#allocation17 + $0x218] sm:$0xff] }
 0x55f   :  { %v4953_v27 = vadd.f32 %v4952_v58, %v4940_v6  ;;  %v5328_v58 = vld [vmem:[#allocation17 + $0x2e8] sm:$0xff]  ;;  %v5347_v6 = vld [vmem:[#allocation17 + $0x380] sm:$0xff] }
 0x560   :  { %5404 = vmatpush.msra.mxu2 %v5327_v19  ;;  %v4978_v54 = vpop.f32.mrf.mxu2  ;;  %v4991_v49 = vpop.f32.mrf.mxu3  ;;  %5424 = vmatpush.msra.mxu3 %v5359_v14  ;;  %v5018_v19 = vadd.f32 %v9396_v28, %v9322_v37 }
 0x561   :  { %v4966_v5 = vadd.f32 %v4965_v57, %v4953_v27  ;;  %v5326_v57 = vld [vmem:[#allocation17 + $0x2d8] sm:$0xff]  ;;  %v5345_v27 = vld [vmem:[#allocation17 + $0x370] sm:$0xff] }
 0x562   :  { %5405 = vmatpush.msra.mxu2 %v5325_v45  ;;  %5425 = vmatpush.msra.mxu3 %v5357_v48  ;;  %v5355_v45 = vld [vmem:[#allocation17 + $0x3c0] sm:$0xff]  ;;  %v5208_v48 = vperm.slane %v9439_v61, 3 }
 0x563   :  { %v4979_v36 = vadd.f32 %v4978_v54, %v4966_v5  ;;  %v5207_v5 = vperm.slane %v9439_v61, 2  ;;  %v5341_v54 = vld [vmem:[#allocation17 + $0x350] sm:$0xff]  ;;  %v5572_v61 = vld [vmem:[%s9600_s16 + $0xf8] sm:$0xff] }
 0x564   :  { %5406 = vmatpush.msra.mxu2 %v5323_v34  ;;  %5426 = vmatpush.msra.mxu3 %v5355_v45  ;;  %v5351_v34 = vld [vmem:[#allocation17 + $0x3a0] sm:$0xff] }
 0x565   :  { %v4992_v24 = vadd.f32 %v4991_v49, %v4979_v36  ;;  %v5221_v36 = vperm.slane %v9445_v55, 2 }
 0x566   :  { %5407 = vmatpush.msra.mxu2 %v5321_v20  ;;  %5427 = vmatpush.msra.mxu3 %v5353_v23  ;;  %v5349_v20 = vld [vmem:[#allocation17 + $0x390] sm:$0xff] }
 0x567   :  { %v5214_v39 = vmul.f32 %v5206_v41, %v4992_v24 }
 0x568   :  { %5408 = vmatpush.msra.mxu2 %v5319_v53  ;;  %v4980_v47 = vpop.f32.mrf.mxu2  ;;  %v4993_v29 = vpop.f32.mrf.mxu3  ;;  %5428 = vmatpush.msra.mxu3 %v5351_v34 }
 0x569   :  { %v5228_v7 = vadd.f32 %v5220_v35, %v5214_v39  ;;  %v5358_v47 = vld [vmem:[#allocation17 + $0x3d8] sm:$0xff]  ;;  %v5356_v29 = vld [vmem:[#allocation17 + $0x3c8] sm:$0xff] }
 0x56a   :  { %5409 = vmatpush.msra.mxu2 %v5317_v38  ;;  %5429 = vmatpush.msra.mxu3 %v5349_v20  ;;  %v5553_v20 = vld [vmem:[%s9600_s16 + $0x60] sm:$0xff] }
 0x56b   :  { %v5232_v62 = vmax.f32 %v5228_v7, 0.0  ;;  %v5362_v7 = vld [vmem:[#allocation17 + $0x3f8] sm:$0xff] }
 0x56c   :  { %5410 = vmatpush.msra.mxu2 %v5315_v2  ;;  %5430 = vmatpush.msra.mxu3 %v5347_v6  ;;  %v5552_v6 = vld [vmem:[%s9600_s16 + $0x58] sm:$0xff] }
 0x56d   :  { %5399 = vmatmul.f32.vlgmr.msrb.gmra.mxu1 %v5232_v62 }
 0x56e   :  { %5411 = vmatpush.msra.mxu2 %v5313_v13  ;;  %5431 = vmatpush.msra.mxu3 %v5345_v27  ;;  %v5343_v13 = vld [vmem:[#allocation17 + $0x360] sm:$0xff]  ;;  %v5551_v27 = vld [vmem:[%s9600_s16 + $0x50] sm:$0xff] }
 0x56f   :  { %5597 = vmatpush.msrb.mxu1 %v5572_v61 }
 0x570   :  { %5412 = vmatpush.msra.mxu2 %v5311_v9  ;;  %5432 = vmatpush.msra.mxu3 %v5343_v13  ;;  %v5337_v9 = vld [vmem:[#allocation17 + $0x330] sm:$0xff]  ;;  %v5548_v13 = vld [vmem:[%s9600_s16 + $0x38] sm:$0xff] }
 0x572   :  { %5413 = vmatpush.msra.mxu2 %v5309_v10  ;;  %5433 = vmatpush.msra.mxu3 %v5341_v54  ;;  %v5547_v54 = vld [vmem:[%s9600_s16 + $0x30] sm:$0xff] }
 0x574   :  { %5414 = vmatpush.msra.mxu2 %v5307_v40  ;;  %v5333_v40 = vld [vmem:[#allocation17 + $0x310] sm:$0xff] }
 0x575   :  { %5479 = vmatmul.f32.vlgmr.msra.gmra.mxu1 %v5232_v62  ;;  %v5354_v62 = vld [vmem:[#allocation17 + $0x3b8] sm:$0xff] }
 0x576   :  { %5415 = vmatpush.msra.mxu2 %v5305_v50  ;;  %v5331_v50 = vld [vmem:[#allocation17 + $0x300] sm:$0xff] }
 0x578   :  { %5416 = vmatpush.msra.mxu2 %v5303_v51  ;;  %v5360_v51 = vld [vmem:[#allocation17 + $0x3e8] sm:$0xff] }
 0x57a   :  { %5417 = vmatpush.msra.mxu2 %v5301_v16  ;;  %v5352_v16 = vld [vmem:[#allocation17 + $0x3a8] sm:$0xff] }
 0x57c   :  { %5418 = vmatpush.msra.mxu2 %v5299_v60  ;;  %v5350_v60 = vld [vmem:[#allocation17 + $0x398] sm:$0xff] }
 0x57e   :  { %5483 = vmatpush.msrb.mxu2 %v5330_v3  ;;  %v5348_v3 = vld [vmem:[#allocation17 + $0x388] sm:$0xff] }
 0x580   :  { %5484 = vmatpush.msrb.mxu2 %v5328_v58  ;;  %v5030_v11 = vpop.f32.mrf.mxu2  ;;  %v5043_v43 = vpop.f32.mrf.mxu3 }
 0x581   :  { %v5031_v15 = vadd.f32 %v5030_v11, %v5018_v19 }
 0x582   :  { %5485 = vmatpush.msrb.mxu2 %v5326_v57 }
 0x583   :  { %v5044_v4 = vadd.f32 %v5043_v43, %v5031_v15  ;;  %v5338_v43 = vld [vmem:[#allocation17 + $0x338] sm:$0xff] }
 0x584   :  { %5486 = vmatpush.msrb.mxu2 %v5324_v17  ;;  %v5346_v17 = vld [vmem:[#allocation17 + $0x378] sm:$0xff] }
 0x585   :  { %v5057_v53 = vadd.f32 %v9432_v30, %v5044_v4  ;;  %v5339_v30 = vld [vmem:[#allocation17 + $0x340] sm:$0xff]  ;;  %v5570_v4 = vld [vmem:[%s9600_s16 + $0xe8] sm:$0xff] }
 0x586   :  { %5487 = vmatpush.msrb.mxu2 %v5322_v52  ;;  %5434 = vmatpush.msra.mxu3 %v5339_v30  ;;  %v5344_v52 = vld [vmem:[#allocation17 + $0x368] sm:$0xff]  ;;  %v5544_v30 = vld [vmem:[%s9600_s16 + $0x18] sm:$0xff] }
 0x587   :  { %v5070_v38 = vadd.f32 %v9434_v33, %v5057_v53  ;;  %v5335_v33 = vld [vmem:[#allocation17 + $0x320] sm:$0xff] }
 0x588   :  { %5488 = vmatpush.msrb.mxu2 %v5320_v42  ;;  %v5032_v46 = vpop.f32.mrf.mxu2  ;;  %v5045_v31 = vpop.f32.mrf.mxu3  ;;  %5435 = vmatpush.msra.mxu3 %v5337_v9  ;;  %v5342_v42 = vld [vmem:[#allocation17 + $0x358] sm:$0xff]  ;;  %v5569_v53 = vld [vmem:[%s9600_s16 + $0xe0] sm:$0xff] }
 0x589   :  { %v5564_v9 = vld [vmem:[%s9600_s16 + $0xb8] sm:$0xff] }
 0x58a   :  { %5489 = vmatpush.msrb.mxu2 %v5318_v26  ;;  %5436 = vmatpush.msra.mxu3 %v5335_v33  ;;  %v5340_v26 = vld [vmem:[#allocation17 + $0x348] sm:$0xff]  ;;  %v5563_v33 = vld [vmem:[%s9600_s16 + $0xb0] sm:$0xff] }
 0x58c   :  { %5490 = vmatpush.msrb.mxu2 %v5316_v18  ;;  %5437 = vmatpush.msra.mxu3 %v5333_v40  ;;  %v5561_v40 = vld [vmem:[%s9600_s16 + $0xa0] sm:$0xff] }
 0x58e   :  { %5491 = vmatpush.msrb.mxu2 %v5314_v22  ;;  %5438 = vmatpush.msra.mxu3 %v5331_v50  ;;  %v5336_v22 = vld [vmem:[#allocation17 + $0x328] sm:$0xff]  ;;  %v5560_v50 = vld [vmem:[%s9600_s16 + $0x98] sm:$0xff] }
 0x590   :  { %5492 = vmatpush.msrb.mxu2 %v5312_v44  ;;  %5503 = vmatpush.msrb.mxu3 %v5362_v7  ;;  %v5334_v44 = vld [vmem:[#allocation17 + $0x318] sm:$0xff] }
 0x591   :  { %v5559_v7 = vld [vmem:[%s9600_s16 + $0x90] sm:$0xff] }
 0x592   :  { %5493 = vmatpush.msrb.mxu2 %v5310_v32  ;;  %5504 = vmatpush.msrb.mxu3 %v5360_v51  ;;  %v5332_v32 = vld [vmem:[#allocation17 + $0x308] sm:$0xff] }
 0x593   :  { %v5558_v51 = vld [vmem:[%s9600_s16 + $0x88] sm:$0xff] }
 0x594   :  { %5494 = vmatpush.msrb.mxu2 %v5308_v0  ;;  %5505 = vmatpush.msrb.mxu3 %v5358_v47  ;;  %v5557_v47 = vld [vmem:[%s9600_s16 + $0x80] sm:$0xff] }
 0x596   :  { %5495 = vmatpush.msrb.mxu2 %v5306_v1  ;;  %5506 = vmatpush.msrb.mxu3 %v5356_v29 }
 0x598   :  { %5496 = vmatpush.msrb.mxu2 %v5304_v56  ;;  %5507 = vmatpush.msrb.mxu3 %v5354_v62  ;;  %v5380_v62 = vpop.f32.mrf.mxu0 }
 0x59a   :  { %5497 = vmatpush.msrb.mxu2 %v5302_v63  ;;  %5508 = vmatpush.msrb.mxu3 %v5352_v16 }
 0x59c   :  { %5498 = vmatpush.msrb.mxu2 %v5300_v21  ;;  %5509 = vmatpush.msrb.mxu3 %v5350_v60  ;;  %v5222_v21 = vperm.slane %v9445_v55, 3  ;;  %v5554_v55 = vld [vmem:[%s9600_s16 + $0x68] sm:$0xff]  ;;  %v5523_v60 = vld [vmem:[%s9598_s14] sm:$0x3]  ;;  %s7648_s14 = smov [#allocation21]  }
 0x59e   :  { %5510 = vmatpush.msrb.mxu3 %v5348_v3 }
 0x5a0   :  { %v5082_v37 = vpop.f32.mrf.mxu2  ;;  %v5095_v28 = vpop.f32.mrf.mxu3  ;;  %5511 = vmatpush.msrb.mxu3 %v5346_v17  ;;  %v5525_v17 = vperm.slane %v5523_v60, 0 }
 0x5a1   :  { %v5083_v2 = vadd.f32 %v5082_v37, %v5070_v38  ;;  %v5568_v38 = vld [vmem:[%s9600_s16 + $0xd8] sm:$0xff]  ;;  %v5567_v37 = vld [vmem:[%s9600_s16 + $0xd0] sm:$0xff] }
 0x5a2   :  { %5512 = vmatpush.msrb.mxu3 %v5344_v52 }
 0x5a3   :  { %v5096_v49 = vadd.f32 %v5095_v28, %v5083_v2  ;;  %v5550_v28 = vld [vmem:[%s9600_s16 + $0x48] sm:$0xff] }
 0x5a4   :  { %5513 = vmatpush.msrb.mxu3 %v5342_v42  ;;  %v5566_v2 = vld [vmem:[%s9600_s16 + $0xc8] sm:$0xff] }
 0x5a5   :  { %v5215_v41 = vmul.f32 %v5207_v5, %v5096_v49  ;;  %v5549_v5 = vld [vmem:[%s9600_s16 + $0x40] sm:$0xff]  ;;  %v5546_v49 = vld [vmem:[%s9600_s16 + $0x28] sm:$0xff] }
 0x5a6   :  { %5514 = vmatpush.msrb.mxu3 %v5340_v26 }
 0x5a7   :  { %v5229_v10 = vadd.f32 %v5221_v36, %v5215_v41  ;;  %v5545_v36 = vld [vmem:[%s9600_s16 + $0x20] sm:$0xff] }
 0x5a8   :  { %v5084_v24 = vpop.f32.mrf.mxu2  ;;  %v5097_v35 = vpop.f32.mrf.mxu3  ;;  %5515 = vmatpush.msrb.mxu3 %v5338_v43  ;;  %v5565_v41 = vld [vmem:[%s9600_s16 + $0xc0] sm:$0xff] }
 0x5a9   :  { %v5233_v39 = vmax.f32 %v5229_v10, 0.0  ;;  %v5543_v10 = vld [vmem:[%s9600_s16 + $0x10] sm:$0xff]  ;;  %v5542_v24 = vld [vmem:[%s9600_s16 + $0x8] sm:$0xff]  ;;  %v5460_v43 = vpop.f32.mrf.mxu0 }
 0x5aa   :  { %5516 = vmatpush.msrb.mxu3 %v5336_v22  ;;  %v5562_v35 = vld [vmem:[%s9600_s16 + $0xa8] sm:$0xff] }
 0x5ab   :  { %5419 = vmatmul.f32.vlgmr.msra.gmra.mxu2 %v5233_v39 }
 0x5ac   :  { %5517 = vmatpush.msrb.mxu3 %v5334_v44 }
 0x5ae   :  { %5518 = vmatpush.msrb.mxu3 %v5332_v32 }
 0x5b3   :  { %5499 = vmatmul.f32.vlgmr.msrb.gmra.mxu2 %v5233_v39  ;;  %v5541_v39 = vld [vmem:[%s9600_s16] sm:$0xff] }
 0x5c0   :  { %v5134_v58 = vpop.f32.mrf.mxu2  ;;  %v5147_v57 = vpop.f32.mrf.mxu3 }
 0x5c1   :  { %v5135_v0 = vadd.f32 %v5134_v58, %v9437_v59  ;;  %v5556_v59 = vld [vmem:[%s9600_s16 + $0x78] sm:$0xff] }
 0x5c2   :  { %5577 = vmatpush.msrb.mxu0 %v5556_v59  ;;  %v5531_v58 = vld [vmem:[#allocation18] sm:$0x3] }
 0x5c3   :  { %v5148_v46 = vadd.f32 %v5147_v57, %v5135_v0  ;;  %v5533_v26 = vperm.slane %v5531_v58, 0 }
 0x5c5   :  { %v5161_v31 = vadd.f32 %v9450_v12, %v5148_v46  ;;  %v5555_v12 = vld [vmem:[%s9600_s16 + $0x70] sm:$0xff] }
 0x5c6   :  { %5578 = vmatpush.msrb.mxu0 %v5555_v12 }
 0x5c7   :  { %v5174_v1 = vadd.f32 %v9452_v8, %v5161_v31  ;;  %v5571_v8 = vld [vmem:[%s9600_s16 + $0xf0] sm:$0xff]  ;;  %v5526_v31 = vperm.slane %v5523_v60, 1  ;;  %s5624_s16 = sshll.u32 %s7648_s14, 4  ;;  %s5625_s16 = int_to_ptr.vmem [resolvable:$true] %s5624_s16 }
 0x5c8   :  { %v5136_v18 = vpop.f32.mrf.mxu2  ;;  %v5149_v11 = vpop.f32.mrf.mxu3  ;;  %5598 = vmatpush.msrb.mxu1 %v5571_v8  ;;  %5579 = vmatpush.msrb.mxu0 %v5554_v55 }
 0x5ca   :  { %5599 = vmatpush.msrb.mxu1 %v5570_v4  ;;  %5580 = vmatpush.msrb.mxu0 %v5553_v20 }
 0x5cc   :  { %5600 = vmatpush.msrb.mxu1 %v5569_v53  ;;  %5581 = vmatpush.msrb.mxu0 %v5552_v6 }
 0x5ce   :  { %5601 = vmatpush.msrb.mxu1 %v5568_v38  ;;  %5582 = vmatpush.msrb.mxu0 %v5551_v27 }
 0x5d0   :  { %5602 = vmatpush.msrb.mxu1 %v5567_v37  ;;  %5583 = vmatpush.msrb.mxu0 %v5550_v28 }
 0x5d2   :  { %5603 = vmatpush.msrb.mxu1 %v5566_v2  ;;  %5584 = vmatpush.msrb.mxu0 %v5549_v5 }
 0x5d4   :  { %5585 = vmatpush.msrb.mxu0 %v5548_v13  ;;  %5604 = vmatpush.msrb.mxu1 %v5565_v41 }
 0x5d6   :  { %5586 = vmatpush.msrb.mxu0 %v5547_v54  ;;  %5605 = vmatpush.msrb.mxu1 %v5564_v9 }
 0x5d8   :  { %5587 = vmatpush.msrb.mxu0 %v5546_v49  ;;  %5606 = vmatpush.msrb.mxu1 %v5563_v33 }
 0x5da   :  { %5588 = vmatpush.msrb.mxu0 %v5545_v36  ;;  %5607 = vmatpush.msrb.mxu1 %v5562_v35 }
 0x5dc   :  { %5589 = vmatpush.msrb.mxu0 %v5544_v30  ;;  %5608 = vmatpush.msrb.mxu1 %v5561_v40 }
 0x5de   :  { %5590 = vmatpush.msrb.mxu0 %v5543_v10  ;;  %5609 = vmatpush.msrb.mxu1 %v5560_v50 }
 0x5e0   :  { %v5186_v25 = vpop.f32.mrf.mxu2  ;;  %v5199_v56 = vpop.f32.mrf.mxu3  ;;  %5591 = vmatpush.msrb.mxu0 %v5542_v24  ;;  %5610 = vmatpush.msrb.mxu1 %v5559_v7 }
 0x5e1   :  { %v5187_v14 = vadd.f32 %v5186_v25, %v5174_v1 }
 0x5e2   :  { %5592 = vmatpush.msrb.mxu0 %v5541_v39  ;;  %5611 = vmatpush.msrb.mxu1 %v5558_v51 }
 0x5e3   :  { %v5200_v63 = vadd.f32 %v5199_v56, %v5187_v14  ;;  %v5534_v56 = vperm.slane %v5531_v58, 1 }
 0x5e4   :  { %5612 = vmatpush.msrb.mxu1 %v5557_v47 }
 0x5e5   :  { %v5216_v19 = vmul.f32 %v5208_v48, %v5200_v63 }
 0x5e7   :  { %v5230_v15 = vadd.f32 %v5222_v21, %v5216_v19  ;;  %v7326_v21 = vld [vmem:[#allocation20] ss:$0 sm:$0xff] }
 0x5e8   :  { %v5188_v45 = vpop.f32.mrf.mxu2  ;;  %v5201_v23 = vpop.f32.mrf.mxu3 }
 0x5e9   :  { %v5234_v34 = vmax.f32 %v5230_v15, 0.0 }
 0x5ea   :  { %v5400_v29 = vpop.f32.mrf.mxu1 }
 0x5eb   :  { %5439 = vmatmul.f32.vlgmr.msra.gmra.mxu3 %v5234_v34  ;;  %v5401_v3 = vadd.f32 %v5400_v29, %v5380_v62 }
 0x5f2   :  { %v5480_v18 = vpop.f32.mrf.mxu1 }
 0x5f3   :  { %5519 = vmatmul.f32.vlgmr.msrb.gmra.mxu3 %v5234_v34  ;;  %v5481_v44 = vadd.f32 %v5480_v18, %v5460_v43 }
 0x62e   :  { %v5420_v16 = vpop.f32.mrf.mxu2 }
 0x62f   :  { %v5421_v57 = vadd.f32 %v5420_v16, %v5401_v3 }
 0x636   :  { %v5500_v22 = vpop.f32.mrf.mxu2 }
 0x637   :  { %v5501_v0 = vadd.f32 %v5500_v22, %v5481_v44 }
 0x66e   :  { %v5440_v52 = vpop.f32.mrf.mxu3 }
 0x66f   :  { %v5441_v42 = vadd.f32 %v5440_v52, %v5421_v57 }
 0x671   :  { %v5529_v11 = vmul.f32 %v5525_v17, %v5441_v42 }
 0x673   :  { %v5537_v32 = vadd.f32 %v5533_v26, %v5529_v11 }
 0x675   :  { %v5539_v46 = vmax.f32 %v5537_v32, 0.0 }
 0x676   :  { %v5520_v1 = vpop.f32.mrf.mxu3 }
 0x677   :  { %v5521_v25 = vadd.f32 %v5520_v1, %v5501_v0  ;;  %5593 = vmatmul.f32.vlgmr.msrb.gmra.mxu0 %v5539_v46 }
 0x679   :  { %v5530_v14 = vmul.f32 %v5526_v31, %v5521_v25 }
 0x67b   :  { %v5538_v48 = vadd.f32 %v5534_v56, %v5530_v14 }
 0x67d   :  { %v5540_v63 = vmax.f32 %v5538_v48, 0.0 }
 0x67f   :  { %5613 = vmatmul.f32.vlgmr.msrb.gmra.mxu1 %v5540_v63 }
 0x6f4   :  { %v5594_v19 = vpop.f32.mrf.mxu0 }
 0x6f5   :  { %v5595_v15 = vadd.f32 %v7326_v21, %v5594_v19 }
 0x6fc   :  { %v5614_v45 = vpop.f32.mrf.mxu1 }
 0x6fd   :  { %v5615_v23 = vadd.f32 %v5614_v45, %v5595_v15 }
 0x6ff   :  { %5618 = vst.msk [vmem:[#allocation21] sm:$0x3] %vm5617_vm10, %v5615_v23 }
 0x700   :  { %5629 = dma.vmem_to_hbm [thread:$0]  %s5625_s16, 32, %s5627_s25, [#allocation5]  }
 0x701   :  { %7631 = dma.done.wait [#allocation5], 32  }
 0x702   :  { %7632 = vsyncadd [#allocation5], 4294967264 }
 0x703   :  { %5634 = vsyncpa [#allocation4], 1 }
 0x704   :  { %5635 = vsyncpa [#allocation7], 1 }
 0x705   :  { %5636 = vsyncpa [#allocation10], 1 }
 0x706   :  { %5637 = vsyncpa [#allocation13], 1 }
 0x707   :  { %5638 = vsyncpa [#allocation16], 1 }
 0x708   :  { %5639 = vsyncpa [#allocation19], 1 }
 0x709   :  { %5640 = vsyncpa [#allocation5], 1 }

</bundles_post_ra>
